<compile_context>
chip_gen: v5e
topology: v5e:2x2
jax: 0.10.0
libtpu: 0.0.40
codegen_flags: <defaults>
</compile_context>

<pallas_src>
import functools

import jax
import jax.numpy as jnp
from jax import lax
from jax.experimental import pallas as pl
from jax.experimental.pallas import tpu as pltpu


TM_FUSE = 1024   # max rows for the single fused conv+BN+swish call
                 # (safe on v5e/v6e/v7x; can be raised to ~2048+ on v5e/v6e's
                 #  128 MiB VMEM for realistic image sizes)
TM_TILE = 1024   # row tile for the M-tiled fallback path
_VMEM_LIMIT = 32 * 1024 * 1024   # explicit; well under v7x's 64 MiB physical


def _round_up(x, m):
    return (x + m - 1) // m * m


def _choose_tile(m):
    # Bound padding waste to <256 rows while keeping tiles as large as possible.
    m_pad = _round_up(m, 256)
    for tm in (TM_TILE, TM_TILE // 2, 256):
        if tm <= m_pad and m_pad % tm == 0:
            return tm, m_pad
    return 256, m_pad


# ----------------------------- Pallas kernels ------------------------------ #

def _matmul_bias_swish_kernel(a_ref, w_ref, b_ref, o_ref):
    # conv-as-matmul + bias + swish (bf16 in, f32 accumulate, bf16 out)
    x = jnp.dot(a_ref[...], w_ref[...], preferred_element_type=jnp.float32)
    x = x + b_ref[...]
    o_ref[...] = (x * jax.nn.sigmoid(x)).astype(o_ref.dtype)


def _conv_bn_swish_kernel(a_ref, w_ref, g_ref, bt_ref, o_ref, *, eps):
    # fused conv matmul -> exact (centered) batch stats -> BN -> swish.
    # The f32 conv result never leaves VMEM.
    x = jnp.dot(a_ref[...], w_ref[...], preferred_element_type=jnp.float32)
    mean = jnp.mean(x, axis=0, keepdims=True)
    xc = x - mean
    var = jnp.mean(xc * xc, axis=0, keepdims=True)
    y = xc * (g_ref[...] * lax.rsqrt(var + eps)) + bt_ref[...]
    o_ref[...] = (y * jax.nn.sigmoid(y)).astype(o_ref.dtype)


def _conv_bn_swish_head_kernel(a_ref, w_ref, g_ref, bt_ref, p_ref, w9_ref,
                               b9_ref, o_ref, *, eps):
    # last block fully fused: conv7 matmul -> BN -> swish -> global average
    # pool (as a matmul with the per-batch averaging matrix p) -> 1x1 conv9
    # (+bias) -> sigmoid.  Output is just (B, num_channels).
    x = jnp.dot(a_ref[...], w_ref[...], preferred_element_type=jnp.float32)
    mean = jnp.mean(x, axis=0, keepdims=True)
    xc = x - mean
    var = jnp.mean(xc * xc, axis=0, keepdims=True)
    y = xc * (g_ref[...] * lax.rsqrt(var + eps)) + bt_ref[...]
    y = y * jax.nn.sigmoid(y)                                      # (B*HW, C)
    pooled = jnp.dot(p_ref[...], y, preferred_element_type=jnp.float32)  # (B, C)
    z = jnp.dot(pooled, w9_ref[...], preferred_element_type=jnp.float32) + b9_ref[...]
    o_ref[...] = jax.nn.sigmoid(z)


def _matmul_stats_kernel(a_ref, w_ref, y_ref, stats_ref):
    # fallback pass 1: conv matmul (bias absorbed by BN) + per-tile partial
    # sum / sum-of-squares.  M axis is "parallel" (no resident accumulator).
    x = jnp.dot(a_ref[...], w_ref[...], preferred_element_type=jnp.float32)
    y_ref[...] = x.astype(y_ref.dtype)                # bf16 intermediate
    s = jnp.sum(x, axis=0, keepdims=True)
    ss = jnp.sum(x * x, axis=0, keepdims=True)
    stats_ref[0] = jnp.concatenate([s, ss], axis=0)


def _scale_shift_swish_kernel(y_ref, sc_ref, sh_ref, o_ref):
    # fallback pass 2: per-channel affine (precomputed scale/shift) + swish
    y = y_ref[...].astype(jnp.float32) * sc_ref[...] + sh_ref[...]
    o_ref[...] = (y * jax.nn.sigmoid(y)).astype(o_ref.dtype)


def _head_kernel(x_ref, p_ref, w9_ref, b9_ref, o_ref):
    # fallback head: pool (matmul) -> 1x1 conv -> sigmoid.
    # TODO(synk): tile the pooling matmul over M for very large images.
    pooled = jnp.dot(p_ref[...], x_ref[...].astype(jnp.float32),
                     preferred_element_type=jnp.float32)
    z = jnp.dot(pooled, w9_ref[...], preferred_element_type=jnp.float32) + b9_ref[...]
    o_ref[...] = jax.nn.sigmoid(z)


# ------------------------------ host-side glue ------------------------------ #

def _patches(x_nhwc, k, stride, pad):
    # (N, H, W, C) -> (N*Ho*Wo, C*k*k); feature order is channel-major
    # (c, ky, kx), matching _weight_matrix below.
    n, h, w, c = x_nhwc.shape
    p = lax.conv_general_dilated_patches(
        x_nhwc, (k, k), (stride, stride), [(pad, pad), (pad, pad)],
        dimension_numbers=("NHWC", "HWIO", "NHWC"))
    ho = (h + 2 * pad - k) // stride + 1
    wo = (w + 2 * pad - k) // stride + 1
    return p.reshape(n * ho * wo, c * k * k).astype(jnp.bfloat16), n, ho, wo


def _weight_matrix(w):
    # (kH, kW, Cin, Cout) -> (Cin*kH*kW, Cout), bf16, NO lane padding.
    kh, kw, cin, cout = w.shape
    return (jnp.transpose(w, (2, 0, 1, 3))
            .reshape(cin * kh * kw, cout).astype(jnp.bfloat16))


def _full_spec(shape):
    # one block covering the whole array (grid=(1,))
    return pl.BlockSpec(shape, lambda i: (0,) * len(shape))


def _conv_swish(x_nhwc, w, b, stride):
    k = w.shape[0]
    pad = (k - 1) // 2
    a, n, ho, wo = _patches(x_nhwc, k, stride, pad)
    m, kdim = a.shape
    cout = w.shape[3]
    wm = _weight_matrix(w)
    bias = b.reshape(1, cout).astype(jnp.float32)

    if m <= TM_FUSE:
        y = pl.pallas_call(
            _matmul_bias_swish_kernel,
            grid=(1,),
            in_specs=[_full_spec((m, kdim)), _full_spec((kdim, cout)),
                      _full_spec((1, cout))],
            out_specs=_full_spec((m, cout)),
            out_shape=jax.ShapeDtypeStruct((m, cout), jnp.bfloat16),
            compiler_params=pltpu.CompilerParams(vmem_limit_bytes=_VMEM_LIMIT),
        )(a, wm, bias)
        return y.reshape(n, ho, wo, cout)

    # M-tiled fallback
    tm, m_pad = _choose_tile(m)
    a = jnp.pad(a, ((0, m_pad - m), (0, 0)))
    y = pl.pallas_call(
        _matmul_bias_swish_kernel,
        grid=(m_pad // tm,),
        in_specs=[pl.BlockSpec((tm, kdim), lambda i: (i, 0)),
                  pl.BlockSpec((kdim, cout), lambda i: (0, 0)),
                  pl.BlockSpec((1, cout), lambda i: (0, 0))],
        out_specs=pl.BlockSpec((tm, cout), lambda i: (i, 0)),
        out_shape=jax.ShapeDtypeStruct((m_pad, cout), jnp.bfloat16),
        compiler_params=pltpu.CompilerParams(
            dimension_semantics=("parallel",), vmem_limit_bytes=_VMEM_LIMIT),
    )(a, wm, bias)
    return y[:m].reshape(n, ho, wo, cout)


def _conv_bn_swish_tiled(a, wm, g, bt, m, eps):
    # two-pass fallback for M > TM_FUSE: parallel partial stats (bf16 y),
    # tiny XLA reduction, then a parallel scale/shift/swish pass.
    kdim = a.shape[1]
    cout = wm.shape[1]
    tm, m_pad = _choose_tile(m)
    a = jnp.pad(a, ((0, m_pad - m), (0, 0)))       # zero rows: no effect on sums
    nt = m_pad // tm

    y, stats = pl.pallas_call(
        _matmul_stats_kernel,
        grid=(nt,),
        in_specs=[pl.BlockSpec((tm, kdim), lambda i: (i, 0)),
                  pl.BlockSpec((kdim, cout), lambda i: (0, 0))],
        out_specs=(pl.BlockSpec((tm, cout), lambda i: (i, 0)),
                   pl.BlockSpec((1, 2, cout), lambda i: (i, 0, 0))),
        out_shape=(jax.ShapeDtypeStruct((m_pad, cout), jnp.bfloat16),
                   jax.ShapeDtypeStruct((nt, 2, cout), jnp.float32)),
        compiler_params=pltpu.CompilerParams(
            dimension_semantics=("parallel",), vmem_limit_bytes=_VMEM_LIMIT),
    )(a, wm)

    # per-channel math on (cout,)-sized vectors is negligible -> XLA.
    s = jnp.sum(stats[:, 0, :], axis=0)
    ss = jnp.sum(stats[:, 1, :], axis=0)
    mean = s / m
    # TODO(synk): use a shifted/Welford accumulation if tighter BN matching is
    #             needed for channels with mean >> std.
    var = jnp.maximum(ss / m - mean * mean, 0.0)
    scale = g[0] * lax.rsqrt(var + eps)
    shift = bt[0] - mean * scale
    scale = scale.reshape(1, cout)
    shift = shift.reshape(1, cout)

    out = pl.pallas_call(
        _scale_shift_swish_kernel,
        grid=(nt,),
        in_specs=[pl.BlockSpec((tm, cout), lambda i: (i, 0)),
                  pl.BlockSpec((1, cout), lambda i: (0, 0)),
                  pl.BlockSpec((1, cout), lambda i: (0, 0))],
        out_specs=pl.BlockSpec((tm, cout), lambda i: (i, 0)),
        out_shape=jax.ShapeDtypeStruct((m_pad, cout), jnp.bfloat16),
        compiler_params=pltpu.CompilerParams(
            dimension_semantics=("parallel",), vmem_limit_bytes=_VMEM_LIMIT),
    )(y, scale, shift)
    return out[:m]


def _conv_bn_swish(x_nhwc, w, gamma, beta, stride, eps=1e-5):
    k = w.shape[0]
    pad = (k - 1) // 2
    a, n, ho, wo = _patches(x_nhwc, k, stride, pad)
    m, kdim = a.shape
    cout = w.shape[3]
    wm = _weight_matrix(w)
    g = gamma.reshape(1, cout).astype(jnp.float32)
    bt = beta.reshape(1, cout).astype(jnp.float32)

    if m <= TM_FUSE:
        kern = functools.partial(_conv_bn_swish_kernel, eps=eps)
        y = pl.pallas_call(
            kern,
            grid=(1,),
            in_specs=[_full_spec((m, kdim)), _full_spec((kdim, cout)),
                      _full_spec((1, cout)), _full_spec((1, cout))],
            out_specs=_full_spec((m, cout)),
            out_shape=jax.ShapeDtypeStruct((m, cout), jnp.bfloat16),
            compiler_params=pltpu.CompilerParams(vmem_limit_bytes=_VMEM_LIMIT),
        )(a, wm, g, bt)
        return y.reshape(n, ho, wo, cout)

    y = _conv_bn_swish_tiled(a, wm, g, bt, m, eps)
    return y.reshape(n, ho, wo, cout)


def _conv_bn_swish_head(x_nhwc, w, gamma, beta, w9, b9, stride, eps=1e-5):
    # last conv block + BN + swish + (1x1 conv, global avg pool, sigmoid) head.
    k = w.shape[0]
    pad = (k - 1) // 2
    a, n, ho, wo = _patches(x_nhwc, k, stride, pad)
    m, kdim = a.shape
    cout = w.shape[3]
    nc = w9.shape[3]
    wm = _weight_matrix(w)
    g = gamma.reshape(1, cout).astype(jnp.float32)
    bt = beta.reshape(1, cout).astype(jnp.float32)
    w9m = w9.reshape(cout, nc).astype(jnp.float32)
    b9v = b9.reshape(1, nc).astype(jnp.float32)
    hw = ho * wo
    # per-batch averaging matrix: pooled = pool @ y  (rows are batch-major)
    pool = jnp.repeat(jnp.eye(n, dtype=jnp.float32), hw, axis=1) / hw  # (n, m)

    if m <= TM_FUSE:
        kern = functools.partial(_conv_bn_swish_head_kernel, eps=eps)
        return pl.pallas_call(
            kern,
            grid=(1,),
            in_specs=[_full_spec((m, kdim)), _full_spec((kdim, cout)),
                      _full_spec((1, cout)), _full_spec((1, cout)),
                      _full_spec((n, m)), _full_spec((cout, nc)),
                      _full_spec((1, nc))],
            out_specs=_full_spec((n, nc)),
            out_shape=jax.ShapeDtypeStruct((n, nc), jnp.float32),
            compiler_params=pltpu.CompilerParams(vmem_limit_bytes=_VMEM_LIMIT),
        )(a, wm, g, bt, pool, w9m, b9v)

    # fallback: tiled conv+BN+swish, then a small separate head kernel.
    y = _conv_bn_swish_tiled(a, wm, g, bt, m, eps)          # (m, cout) bf16
    return pl.pallas_call(
        _head_kernel,
        grid=(1,),
        in_specs=[_full_spec((m, cout)), _full_spec((n, m)),
                  _full_spec((cout, nc)), _full_spec((1, nc))],
        out_specs=_full_spec((n, nc)),
        out_shape=jax.ShapeDtypeStruct((n, nc), jnp.float32),
        compiler_params=pltpu.CompilerParams(vmem_limit_bytes=_VMEM_LIMIT),
    )(y, pool, w9m, b9v)


# ------------------------------- forward pass ------------------------------- #

def discriminator_forward(x_nchw, params, eps=1e-5):
    x = jnp.transpose(x_nchw, (0, 2, 3, 1)).astype(jnp.bfloat16)   # NCHW -> NHWC
    x = _conv_swish(x, params["w1"], params["b1"], stride=1)
    # conv bias before BatchNorm cancels in the normalization -> not applied.
    x = _conv_bn_swish(x, params["w3"], params["g3"], params["bt3"], stride=2, eps=eps)
    x = _conv_bn_swish(x, params["w5"], params["g5"], params["bt5"], stride=2, eps=eps)
    return _conv_bn_swish_head(x, params["w7"], params["g7"], params["bt7"],
                               params["w9"], params["b9"], stride=2, eps=eps)


# ---------------------------- reference (pure JAX) --------------------------- #

def _reference_forward(x_nchw, params, eps=1e-5):
    def conv(x, w, b, stride, pad):
        y = lax.conv_general_dilated(
            x, w, (stride, stride), [(pad, pad), (pad, pad)],
            dimension_numbers=("NHWC", "HWIO", "NHWC"))
        return y + b.reshape(1, 1, 1, -1)

    def bn(x, g, b):
        mean = jnp.mean(x, axis=(0, 1, 2), keepdims=True)
        var = jnp.mean((x - mean) ** 2, axis=(0, 1, 2), keepdims=True)
        return (x - mean) * lax.rsqrt(var + eps) * g.reshape(1, 1, 1, -1) + b.reshape(1, 1, 1, -1)

    sw = lambda v: v * jax.nn.sigmoid(v)
    x = jnp.transpose(x_nchw, (0, 2, 3, 1)).astype(jnp.float32)
    x = sw(conv(x, params["w1"], params["b1"], 1, 1))
    x = sw(bn(conv(x, params["w3"], params["b3"], 2, 1), params["g3"], params["bt3"]))
    x = sw(bn(conv(x, params["w5"], params["b5"], 2, 1), params["g5"], params["bt5"]))
    x = sw(bn(conv(x, params["w7"], params["b7"], 2, 1), params["g7"], params["bt7"]))
    y = conv(x, params["w9"], params["b9"], 1, 0)
    return jax.nn.sigmoid(jnp.mean(y, axis=(1, 2)))


# --------------------------- deterministic params --------------------------- #

def init_params(key, num_channels=3, base_filter=16, std=0.02):
    ks = jax.random.split(key, 5)

    def w(k, kh, cin, cout):
        # normal_init(mean=0.0, std=0.02); stored as (kH, kW, Cin, Cout)
        return std * jax.random.normal(k, (kh, kh, cin, cout), jnp.float32)

    bf = base_filter
    return {
        "w1": w(ks[0], 3, num_channels, bf),      "b1": jnp.zeros((1, bf), jnp.float32),
        "w3": w(ks[1], 3, bf, bf * 2),            "b3": jnp.zeros((1, bf * 2), jnp.float32),
        "g3": jnp.ones((1, bf * 2), jnp.float32), "bt3": jnp.zeros((1, bf * 2), jnp.float32),
        "w5": w(ks[2], 3, bf * 2, bf * 4),        "b5": jnp.zeros((1, bf * 4), jnp.float32),
        "g5": jnp.ones((1, bf * 4), jnp.float32), "bt5": jnp.zeros((1, bf * 4), jnp.float32),
        "w7": w(ks[3], 3, bf * 4, bf * 8),        "b7": jnp.zeros((1, bf * 8), jnp.float32),
        "g7": jnp.ones((1, bf * 8), jnp.float32), "bt7": jnp.zeros((1, bf * 8), jnp.float32),
        "w9": w(ks[4], 1, bf * 8, num_channels),  "b9": jnp.zeros((1, num_channels), jnp.float32),
    }


if __name__ == "__main__":
    key = jax.random.PRNGKey(0)
    k_in, k_par = jax.random.split(key)
    num_channels, base_filter = 3, 16
    x = jax.random.normal(k_in, (2, num_channels, 16, 16), jnp.float32)   # NCHW
    params = init_params(k_par, num_channels, base_filter)

    fwd = jax.jit(discriminator_forward)
    out = fwd(x, params)
    jax.block_until_ready(out)

    assert out.shape == (2, num_channels), out.shape
    assert bool(jnp.all(jnp.isfinite(out)))

    ref = _reference_forward(x, params)
    err = float(jnp.max(jnp.abs(out.astype(jnp.float32) - ref)))
    assert err < 5e-2, f"max abs err vs reference: {err}"   # bf16 matmul tolerance

    print("KERNEL_OK")
</pallas_src>

<mosaic_0001>
module attributes {stable_mosaic.version = 11 : i64} {
  func.func @_matmul_bias_swish_kernel(%arg0: i32, %arg1: memref<512x27xbf16, #tpu.memory_space<vmem>>, %arg2: memref<27x16xbf16, #tpu.memory_space<vmem>>, %arg3: memref<1x16xf32, #tpu.memory_space<vmem>>, %arg4: memref<512x16xbf16, #tpu.memory_space<vmem>>) attributes {dimension_semantics = [#tpu.dimension_semantics<arbitrary>], iteration_bounds = array<i64: 1>, scalar_prefetch = 0 : i64, scratch_operands = 0 : i64, tpu.core_type = #tpu.core_type<tc>, window_params = [{pipeline_mode = #tpu.pipeline_mode<synchronous>, transform_indices = @transform_0, window_bounds = array<i64: 512, 27>}, {pipeline_mode = #tpu.pipeline_mode<synchronous>, transform_indices = @transform_1, window_bounds = array<i64: 27, 16>}, {pipeline_mode = #tpu.pipeline_mode<synchronous>, transform_indices = @transform_2, window_bounds = array<i64: 1, 16>}, {pipeline_mode = #tpu.pipeline_mode<synchronous>, transform_indices = @transform_3, window_bounds = array<i64: 512, 16>}]} {
    %c0 = arith.constant 0 : index
    %c0_0 = arith.constant 0 : index
    %0 = vector.load %arg1[%c0, %c0_0] : memref<512x27xbf16, #tpu.memory_space<vmem>>, vector<512x27xbf16>
    %c0_1 = arith.constant 0 : index
    %c0_2 = arith.constant 0 : index
    %1 = vector.load %arg2[%c0_1, %c0_2] : memref<27x16xbf16, #tpu.memory_space<vmem>>, vector<27x16xbf16>
    %cst = arith.constant dense<0.000000e+00> : vector<512x16xf32>
    %2 = tpu.matmul %0, %1, %cst {dimension_numbers = #tpu.dot_dimension_numbers<[1], [0], [0], [1], [0, 0, 1, 1], [], []>} : vector<512x27xbf16>, vector<27x16xbf16>, vector<512x16xf32> -> vector<512x16xf32>
    %c0_3 = arith.constant 0 : index
    %c0_4 = arith.constant 0 : index
    %3 = vector.load %arg3[%c0_3, %c0_4] : memref<1x16xf32, #tpu.memory_space<vmem>>, vector<1x16xf32>
    %4 = vector.broadcast %3 : vector<1x16xf32> to vector<512x16xf32>
    %5 = arith.addf %2, %4 : vector<512x16xf32>
    %6 = arith.negf %5 : vector<512x16xf32>
    %7 = math.exp %6 : vector<512x16xf32>
    %cst_5 = arith.constant 1.000000e+00 : f32
    %8 = vector.broadcast %cst_5 : f32 to vector<512x16xf32>
    %9 = arith.addf %8, %7 : vector<512x16xf32>
    %10 = arith.divf %8, %9 : vector<512x16xf32>
    %11 = arith.mulf %5, %10 : vector<512x16xf32>
    %12 = arith.truncf %11 : vector<512x16xf32> to vector<512x16xbf16>
    %c0_6 = arith.constant 0 : index
    %c0_7 = arith.constant 0 : index
    %13 = vector.load %arg4[%c0_6, %c0_7] : memref<512x16xbf16, #tpu.memory_space<vmem>>, vector<512x16xbf16>
    tpu.vector_store %arg4[%c0_6, %c0_7], %12 {strides = array<i32>} : memref<512x16xbf16, #tpu.memory_space<vmem>>, vector<512x16xbf16>,
    return
  }
  func.func @transform_0(%arg0: i32) -> (i32, i32) {
    %c0_i32 = arith.constant 0 : i32
    %c0_i32_0 = arith.constant 0 : i32
    %c0_i32_1 = arith.constant 0 : i32
    return %c0_i32, %c0_i32_0 : i32, i32
  }
  func.func @transform_1(%arg0: i32) -> (i32, i32) {
    %c0_i32 = arith.constant 0 : i32
    %c0_i32_0 = arith.constant 0 : i32
    %c0_i32_1 = arith.constant 0 : i32
    return %c0_i32, %c0_i32_0 : i32, i32
  }
  func.func @transform_2(%arg0: i32) -> (i32, i32) {
    %c0_i32 = arith.constant 0 : i32
    %c0_i32_0 = arith.constant 0 : i32
    %c0_i32_1 = arith.constant 0 : i32
    return %c0_i32, %c0_i32_0 : i32, i32
  }
  func.func @transform_3(%arg0: i32) -> (i32, i32) {
    %c0_i32 = arith.constant 0 : i32
    %c0_i32_0 = arith.constant 0 : i32
    %c0_i32_1 = arith.constant 0 : i32
    return %c0_i32, %c0_i32_0 : i32, i32
  }
}

module attributes {stable_mosaic.version = 11 : i64} {
  func.func @_conv_bn_swish_kernel(%arg0: i32, %arg1: memref<128x144xbf16, #tpu.memory_space<vmem>>, %arg2: memref<144x32xbf16, #tpu.memory_space<vmem>>, %arg3: memref<1x32xf32, #tpu.memory_space<vmem>>, %arg4: memref<1x32xf32, #tpu.memory_space<vmem>>, %arg5: memref<128x32xbf16, #tpu.memory_space<vmem>>) attributes {dimension_semantics = [#tpu.dimension_semantics<arbitrary>], iteration_bounds = array<i64: 1>, scalar_prefetch = 0 : i64, scratch_operands = 0 : i64, tpu.core_type = #tpu.core_type<tc>, window_params = [{pipeline_mode = #tpu.pipeline_mode<synchronous>, transform_indices = @transform_0, window_bounds = array<i64: 128, 144>}, {pipeline_mode = #tpu.pipeline_mode<synchronous>, transform_indices = @transform_1, window_bounds = array<i64: 144, 32>}, {pipeline_mode = #tpu.pipeline_mode<synchronous>, transform_indices = @transform_2, window_bounds = array<i64: 1, 32>}, {pipeline_mode = #tpu.pipeline_mode<synchronous>, transform_indices = @transform_3, window_bounds = array<i64: 1, 32>}, {pipeline_mode = #tpu.pipeline_mode<synchronous>, transform_indices = @transform_4, window_bounds = array<i64: 128, 32>}]} {
    %c0 = arith.constant 0 : index
    %c0_0 = arith.constant 0 : index
    %0 = vector.load %arg1[%c0, %c0_0] : memref<128x144xbf16, #tpu.memory_space<vmem>>, vector<128x144xbf16>
    %c0_1 = arith.constant 0 : index
    %c0_2 = arith.constant 0 : index
    %1 = vector.load %arg2[%c0_1, %c0_2] : memref<144x32xbf16, #tpu.memory_space<vmem>>, vector<144x32xbf16>
    %cst = arith.constant dense<0.000000e+00> : vector<128x32xf32>
    %2 = tpu.matmul %0, %1, %cst {dimension_numbers = #tpu.dot_dimension_numbers<[1], [0], [0], [1], [0, 0, 1, 1], [], []>} : vector<128x144xbf16>, vector<144x32xbf16>, vector<128x32xf32> -> vector<128x32xf32>
    %cst_3 = arith.constant dense<0.000000e+00> : vector<32xf32>
    %3 = vector.multi_reduction <add>, %2, %cst_3 [0] : vector<128x32xf32> to vector<32xf32>
    %4 = vector.shape_cast %3 : vector<32xf32> to vector<1x32xf32>
    %cst_4 = arith.constant 1.280000e+02 : f32
    %5 = vector.broadcast %cst_4 : f32 to vector<1x32xf32>
    %6 = arith.divf %4, %5 : vector<1x32xf32>
    %7 = vector.broadcast %6 : vector<1x32xf32> to vector<128x32xf32>
    %8 = arith.subf %2, %7 : vector<128x32xf32>
    %9 = arith.mulf %8, %8 : vector<128x32xf32>
    %cst_5 = arith.constant dense<0.000000e+00> : vector<32xf32>
    %10 = vector.multi_reduction <add>, %9, %cst_5 [0] : vector<128x32xf32> to vector<32xf32>
    %11 = vector.shape_cast %10 : vector<32xf32> to vector<1x32xf32>
    %cst_6 = arith.constant 1.280000e+02 : f32
    %12 = vector.broadcast %cst_6 : f32 to vector<1x32xf32>
    %13 = arith.divf %11, %12 : vector<1x32xf32>
    %c0_7 = arith.constant 0 : index
    %c0_8 = arith.constant 0 : index
    %14 = vector.load %arg3[%c0_7, %c0_8] : memref<1x32xf32, #tpu.memory_space<vmem>>, vector<1x32xf32>
    %cst_9 = arith.constant 9.99999974E-6 : f32
    %15 = vector.broadcast %cst_9 : f32 to vector<1x32xf32>
    %16 = arith.addf %13, %15 : vector<1x32xf32>
    %17 = math.rsqrt %16 : vector<1x32xf32>
    %18 = arith.mulf %14, %17 : vector<1x32xf32>
    %19 = vector.broadcast %18 : vector<1x32xf32> to vector<128x32xf32>
    %20 = arith.mulf %8, %19 : vector<128x32xf32>
    %c0_10 = arith.constant 0 : index
    %c0_11 = arith.constant 0 : index
    %21 = vector.load %arg4[%c0_10, %c0_11] : memref<1x32xf32, #tpu.memory_space<vmem>>, vector<1x32xf32>
    %22 = vector.broadcast %21 : vector<1x32xf32> to vector<128x32xf32>
    %23 = arith.addf %20, %22 : vector<128x32xf32>
    %24 = arith.negf %23 : vector<128x32xf32>
    %25 = math.exp %24 : vector<128x32xf32>
    %cst_12 = arith.constant 1.000000e+00 : f32
    %26 = vector.broadcast %cst_12 : f32 to vector<128x32xf32>
    %27 = arith.addf %26, %25 : vector<128x32xf32>
    %28 = arith.divf %26, %27 : vector<128x32xf32>
    %29 = arith.mulf %23, %28 : vector<128x32xf32>
    %30 = arith.truncf %29 : vector<128x32xf32> to vector<128x32xbf16>
    %c0_13 = arith.constant 0 : index
    %c0_14 = arith.constant 0 : index
    %31 = vector.load %arg5[%c0_13, %c0_14] : memref<128x32xbf16, #tpu.memory_space<vmem>>, vector<128x32xbf16>
    tpu.vector_store %arg5[%c0_13, %c0_14], %30 {strides = array<i32>} : memref<128x32xbf16, #tpu.memory_space<vmem>>, vector<128x32xbf16>,
    return
  }
  func.func @transform_0(%arg0: i32) -> (i32, i32) {
    %c0_i32 = arith.constant 0 : i32
    %c0_i32_0 = arith.constant 0 : i32
    %c0_i32_1 = arith.constant 0 : i32
    return %c0_i32, %c0_i32_0 : i32, i32
  }
  func.func @transform_1(%arg0: i32) -> (i32, i32) {
    %c0_i32 = arith.constant 0 : i32
    %c0_i32_0 = arith.constant 0 : i32
    %c0_i32_1 = arith.constant 0 : i32
    return %c0_i32, %c0_i32_0 : i32, i32
  }
  func.func @transform_2(%arg0: i32) -> (i32, i32) {
    %c0_i32 = arith.constant 0 : i32
    %c0_i32_0 = arith.constant 0 : i32
    %c0_i32_1 = arith.constant 0 : i32
    return %c0_i32, %c0_i32_0 : i32, i32
  }
  func.func @transform_3(%arg0: i32) -> (i32, i32) {
    %c0_i32 = arith.constant 0 : i32
    %c0_i32_0 = arith.constant 0 : i32
    %c0_i32_1 = arith.constant 0 : i32
    return %c0_i32, %c0_i32_0 : i32, i32
  }
  func.func @transform_4(%arg0: i32) -> (i32, i32) {
    %c0_i32 = arith.constant 0 : i32
    %c0_i32_0 = arith.constant 0 : i32
    %c0_i32_1 = arith.constant 0 : i32
    return %c0_i32, %c0_i32_0 : i32, i32
  }
}

module attributes {stable_mosaic.version = 11 : i64} {
  func.func @_conv_bn_swish_kernel(%arg0: i32, %arg1: memref<32x288xbf16, #tpu.memory_space<vmem>>, %arg2: memref<288x64xbf16, #tpu.memory_space<vmem>>, %arg3: memref<1x64xf32, #tpu.memory_space<vmem>>, %arg4: memref<1x64xf32, #tpu.memory_space<vmem>>, %arg5: memref<32x64xbf16, #tpu.memory_space<vmem>>) attributes {dimension_semantics = [#tpu.dimension_semantics<arbitrary>], iteration_bounds = array<i64: 1>, scalar_prefetch = 0 : i64, scratch_operands = 0 : i64, tpu.core_type = #tpu.core_type<tc>, window_params = [{pipeline_mode = #tpu.pipeline_mode<synchronous>, transform_indices = @transform_0, window_bounds = array<i64: 32, 288>}, {pipeline_mode = #tpu.pipeline_mode<synchronous>, transform_indices = @transform_1, window_bounds = array<i64: 288, 64>}, {pipeline_mode = #tpu.pipeline_mode<synchronous>, transform_indices = @transform_2, window_bounds = array<i64: 1, 64>}, {pipeline_mode = #tpu.pipeline_mode<synchronous>, transform_indices = @transform_3, window_bounds = array<i64: 1, 64>}, {pipeline_mode = #tpu.pipeline_mode<synchronous>, transform_indices = @transform_4, window_bounds = array<i64: 32, 64>}]} {
    %c0 = arith.constant 0 : index
    %c0_0 = arith.constant 0 : index
    %0 = vector.load %arg1[%c0, %c0_0] : memref<32x288xbf16, #tpu.memory_space<vmem>>, vector<32x288xbf16>
    %c0_1 = arith.constant 0 : index
    %c0_2 = arith.constant 0 : index
    %1 = vector.load %arg2[%c0_1, %c0_2] : memref<288x64xbf16, #tpu.memory_space<vmem>>, vector<288x64xbf16>
    %cst = arith.constant dense<0.000000e+00> : vector<32x64xf32>
    %2 = tpu.matmul %0, %1, %cst {dimension_numbers = #tpu.dot_dimension_numbers<[1], [0], [0], [1], [0, 0, 1, 1], [], []>} : vector<32x288xbf16>, vector<288x64xbf16>, vector<32x64xf32> -> vector<32x64xf32>
    %cst_3 = arith.constant dense<0.000000e+00> : vector<64xf32>
    %3 = vector.multi_reduction <add>, %2, %cst_3 [0] : vector<32x64xf32> to vector<64xf32>
    %4 = vector.shape_cast %3 : vector<64xf32> to vector<1x64xf32>
    %cst_4 = arith.constant 3.200000e+01 : f32
    %5 = vector.broadcast %cst_4 : f32 to vector<1x64xf32>
    %6 = arith.divf %4, %5 : vector<1x64xf32>
    %7 = vector.broadcast %6 : vector<1x64xf32> to vector<32x64xf32>
    %8 = arith.subf %2, %7 : vector<32x64xf32>
    %9 = arith.mulf %8, %8 : vector<32x64xf32>
    %cst_5 = arith.constant dense<0.000000e+00> : vector<64xf32>
    %10 = vector.multi_reduction <add>, %9, %cst_5 [0] : vector<32x64xf32> to vector<64xf32>
    %11 = vector.shape_cast %10 : vector<64xf32> to vector<1x64xf32>
    %cst_6 = arith.constant 3.200000e+01 : f32
    %12 = vector.broadcast %cst_6 : f32 to vector<1x64xf32>
    %13 = arith.divf %11, %12 : vector<1x64xf32>
    %c0_7 = arith.constant 0 : index
    %c0_8 = arith.constant 0 : index
    %14 = vector.load %arg3[%c0_7, %c0_8] : memref<1x64xf32, #tpu.memory_space<vmem>>, vector<1x64xf32>
    %cst_9 = arith.constant 9.99999974E-6 : f32
    %15 = vector.broadcast %cst_9 : f32 to vector<1x64xf32>
    %16 = arith.addf %13, %15 : vector<1x64xf32>
    %17 = math.rsqrt %16 : vector<1x64xf32>
    %18 = arith.mulf %14, %17 : vector<1x64xf32>
    %19 = vector.broadcast %18 : vector<1x64xf32> to vector<32x64xf32>
    %20 = arith.mulf %8, %19 : vector<32x64xf32>
    %c0_10 = arith.constant 0 : index
    %c0_11 = arith.constant 0 : index
    %21 = vector.load %arg4[%c0_10, %c0_11] : memref<1x64xf32, #tpu.memory_space<vmem>>, vector<1x64xf32>
    %22 = vector.broadcast %21 : vector<1x64xf32> to vector<32x64xf32>
    %23 = arith.addf %20, %22 : vector<32x64xf32>
    %24 = arith.negf %23 : vector<32x64xf32>
    %25 = math.exp %24 : vector<32x64xf32>
    %cst_12 = arith.constant 1.000000e+00 : f32
    %26 = vector.broadcast %cst_12 : f32 to vector<32x64xf32>
    %27 = arith.addf %26, %25 : vector<32x64xf32>
    %28 = arith.divf %26, %27 : vector<32x64xf32>
    %29 = arith.mulf %23, %28 : vector<32x64xf32>
    %30 = arith.truncf %29 : vector<32x64xf32> to vector<32x64xbf16>
    %c0_13 = arith.constant 0 : index
    %c0_14 = arith.constant 0 : index
    %31 = vector.load %arg5[%c0_13, %c0_14] : memref<32x64xbf16, #tpu.memory_space<vmem>>, vector<32x64xbf16>
    tpu.vector_store %arg5[%c0_13, %c0_14], %30 {strides = array<i32>} : memref<32x64xbf16, #tpu.memory_space<vmem>>, vector<32x64xbf16>,
    return
  }
  func.func @transform_0(%arg0: i32) -> (i32, i32) {
    %c0_i32 = arith.constant 0 : i32
    %c0_i32_0 = arith.constant 0 : i32
    %c0_i32_1 = arith.constant 0 : i32
    return %c0_i32, %c0_i32_0 : i32, i32
  }
  func.func @transform_1(%arg0: i32) -> (i32, i32) {
    %c0_i32 = arith.constant 0 : i32
    %c0_i32_0 = arith.constant 0 : i32
    %c0_i32_1 = arith.constant 0 : i32
    return %c0_i32, %c0_i32_0 : i32, i32
  }
  func.func @transform_2(%arg0: i32) -> (i32, i32) {
    %c0_i32 = arith.constant 0 : i32
    %c0_i32_0 = arith.constant 0 : i32
    %c0_i32_1 = arith.constant 0 : i32
    return %c0_i32, %c0_i32_0 : i32, i32
  }
  func.func @transform_3(%arg0: i32) -> (i32, i32) {
    %c0_i32 = arith.constant 0 : i32
    %c0_i32_0 = arith.constant 0 : i32
    %c0_i32_1 = arith.constant 0 : i32
    return %c0_i32, %c0_i32_0 : i32, i32
  }
  func.func @transform_4(%arg0: i32) -> (i32, i32) {
    %c0_i32 = arith.constant 0 : i32
    %c0_i32_0 = arith.constant 0 : i32
    %c0_i32_1 = arith.constant 0 : i32
    return %c0_i32, %c0_i32_0 : i32, i32
  }
}

module attributes {stable_mosaic.version = 11 : i64} {
  func.func @_conv_bn_swish_head_kernel(%arg0: i32, %arg1: memref<8x576xbf16, #tpu.memory_space<vmem>>, %arg2: memref<576x128xbf16, #tpu.memory_space<vmem>>, %arg3: memref<1x128xf32, #tpu.memory_space<vmem>>, %arg4: memref<1x128xf32, #tpu.memory_space<vmem>>, %arg5: memref<2x8xf32, #tpu.memory_space<vmem>>, %arg6: memref<128x3xf32, #tpu.memory_space<vmem>>, %arg7: memref<1x3xf32, #tpu.memory_space<vmem>>, %arg8: memref<2x3xf32, #tpu.memory_space<vmem>>) attributes {dimension_semantics = [#tpu.dimension_semantics<arbitrary>], iteration_bounds = array<i64: 1>, scalar_prefetch = 0 : i64, scratch_operands = 0 : i64, tpu.core_type = #tpu.core_type<tc>, window_params = [{pipeline_mode = #tpu.pipeline_mode<synchronous>, transform_indices = @transform_0, window_bounds = array<i64: 8, 576>}, {pipeline_mode = #tpu.pipeline_mode<synchronous>, transform_indices = @transform_1, window_bounds = array<i64: 576, 128>}, {pipeline_mode = #tpu.pipeline_mode<synchronous>, transform_indices = @transform_2, window_bounds = array<i64: 1, 128>}, {pipeline_mode = #tpu.pipeline_mode<synchronous>, transform_indices = @transform_3, window_bounds = array<i64: 1, 128>}, {pipeline_mode = #tpu.pipeline_mode<synchronous>, transform_indices = @transform_4, window_bounds = array<i64: 2, 8>}, {pipeline_mode = #tpu.pipeline_mode<synchronous>, transform_indices = @transform_5, window_bounds = array<i64: 128, 3>}, {pipeline_mode = #tpu.pipeline_mode<synchronous>, transform_indices = @transform_6, window_bounds = array<i64: 1, 3>}, {pipeline_mode = #tpu.pipeline_mode<synchronous>, transform_indices = @transform_7, window_bounds = array<i64: 2, 3>}]} {
    %c0 = arith.constant 0 : index
    %c0_0 = arith.constant 0 : index
    %0 = vector.load %arg1[%c0, %c0_0] : memref<8x576xbf16, #tpu.memory_space<vmem>>, vector<8x576xbf16>
    %c0_1 = arith.constant 0 : index
    %c0_2 = arith.constant 0 : index
    %1 = vector.load %arg2[%c0_1, %c0_2] : memref<576x128xbf16, #tpu.memory_space<vmem>>, vector<576x128xbf16>
    %cst = arith.constant dense<0.000000e+00> : vector<8x128xf32>
    %2 = tpu.matmul %0, %1, %cst {dimension_numbers = #tpu.dot_dimension_numbers<[1], [0], [0], [1], [0, 0, 1, 1], [], []>} : vector<8x576xbf16>, vector<576x128xbf16>, vector<8x128xf32> -> vector<8x128xf32>
    %cst_3 = arith.constant dense<0.000000e+00> : vector<128xf32>
    %3 = vector.multi_reduction <add>, %2, %cst_3 [0] : vector<8x128xf32> to vector<128xf32>
    %4 = vector.shape_cast %3 : vector<128xf32> to vector<1x128xf32>
    %cst_4 = arith.constant 8.000000e+00 : f32
    %5 = vector.broadcast %cst_4 : f32 to vector<1x128xf32>
    %6 = arith.divf %4, %5 : vector<1x128xf32>
    %7 = vector.broadcast %6 : vector<1x128xf32> to vector<8x128xf32>
    %8 = arith.subf %2, %7 : vector<8x128xf32>
    %9 = arith.mulf %8, %8 : vector<8x128xf32>
    %cst_5 = arith.constant dense<0.000000e+00> : vector<128xf32>
    %10 = vector.multi_reduction <add>, %9, %cst_5 [0] : vector<8x128xf32> to vector<128xf32>
    %11 = vector.shape_cast %10 : vector<128xf32> to vector<1x128xf32>
    %cst_6 = arith.constant 8.000000e+00 : f32
    %12 = vector.broadcast %cst_6 : f32 to vector<1x128xf32>
    %13 = arith.divf %11, %12 : vector<1x128xf32>
    %c0_7 = arith.constant 0 : index
    %c0_8 = arith.constant 0 : index
    %14 = vector.load %arg3[%c0_7, %c0_8] : memref<1x128xf32, #tpu.memory_space<vmem>>, vector<1x128xf32>
    %cst_9 = arith.constant 9.99999974E-6 : f32
    %15 = vector.broadcast %cst_9 : f32 to vector<1x128xf32>
    %16 = arith.addf %13, %15 : vector<1x128xf32>
    %17 = math.rsqrt %16 : vector<1x128xf32>
    %18 = arith.mulf %14, %17 : vector<1x128xf32>
    %19 = vector.broadcast %18 : vector<1x128xf32> to vector<8x128xf32>
    %20 = arith.mulf %8, %19 : vector<8x128xf32>
    %c0_10 = arith.constant 0 : index
    %c0_11 = arith.constant 0 : index
    %21 = vector.load %arg4[%c0_10, %c0_11] : memref<1x128xf32, #tpu.memory_space<vmem>>, vector<1x128xf32>
    %22 = vector.broadcast %21 : vector<1x128xf32> to vector<8x128xf32>
    %23 = arith.addf %20, %22 : vector<8x128xf32>
    %24 = arith.negf %23 : vector<8x128xf32>
    %25 = math.exp %24 : vector<8x128xf32>
    %cst_12 = arith.constant 1.000000e+00 : f32
    %26 = vector.broadcast %cst_12 : f32 to vector<8x128xf32>
    %27 = arith.addf %26, %25 : vector<8x128xf32>
    %28 = arith.divf %26, %27 : vector<8x128xf32>
    %29 = arith.mulf %23, %28 : vector<8x128xf32>
    %c0_13 = arith.constant 0 : index
    %c0_14 = arith.constant 0 : index
    %30 = vector.load %arg5[%c0_13, %c0_14] : memref<2x8xf32, #tpu.memory_space<vmem>>, vector<2x8xf32>
    %cst_15 = arith.constant dense<0.000000e+00> : vector<2x128xf32>
    %31 = tpu.matmul %30, %29, %cst_15 {dimension_numbers = #tpu.dot_dimension_numbers<[1], [0], [0], [1], [0, 0, 1, 1], [], []>} : vector<2x8xf32>, vector<8x128xf32>, vector<2x128xf32> -> vector<2x128xf32>
    %c0_16 = arith.constant 0 : index
    %c0_17 = arith.constant 0 : index
    %32 = vector.load %arg6[%c0_16, %c0_17] : memref<128x3xf32, #tpu.memory_space<vmem>>, vector<128x3xf32>
    %cst_18 = arith.constant dense<0.000000e+00> : vector<2x3xf32>
    %33 = tpu.matmul %31, %32, %cst_18 {dimension_numbers = #tpu.dot_dimension_numbers<[1], [0], [0], [1], [0, 0, 1, 1], [], []>} : vector<2x128xf32>, vector<128x3xf32>, vector<2x3xf32> -> vector<2x3xf32>
    %c0_19 = arith.constant 0 : index
    %c0_20 = arith.constant 0 : index
    %34 = vector.load %arg7[%c0_19, %c0_20] : memref<1x3xf32, #tpu.memory_space<vmem>>, vector<1x3xf32>
    %35 = vector.broadcast %34 : vector<1x3xf32> to vector<2x3xf32>
    %36 = arith.addf %33, %35 : vector<2x3xf32>
    %37 = arith.negf %36 : vector<2x3xf32>
    %38 = math.exp %37 : vector<2x3xf32>
    %cst_21 = arith.constant 1.000000e+00 : f32
    %39 = vector.broadcast %cst_21 : f32 to vector<2x3xf32>
    %40 = arith.addf %39, %38 : vector<2x3xf32>
    %41 = arith.divf %39, %40 : vector<2x3xf32>
    %c0_22 = arith.constant 0 : index
    %c0_23 = arith.constant 0 : index
    %42 = vector.load %arg8[%c0_22, %c0_23] : memref<2x3xf32, #tpu.memory_space<vmem>>, vector<2x3xf32>
    tpu.vector_store %arg8[%c0_22, %c0_23], %41 {strides = array<i32>} : memref<2x3xf32, #tpu.memory_space<vmem>>, vector<2x3xf32>,
    return
  }
  func.func @transform_0(%arg0: i32) -> (i32, i32) {
    %c0_i32 = arith.constant 0 : i32
    %c0_i32_0 = arith.constant 0 : i32
    %c0_i32_1 = arith.constant 0 : i32
    return %c0_i32, %c0_i32_0 : i32, i32
  }
  func.func @transform_1(%arg0: i32) -> (i32, i32) {
    %c0_i32 = arith.constant 0 : i32
    %c0_i32_0 = arith.constant 0 : i32
    %c0_i32_1 = arith.constant 0 : i32
    return %c0_i32, %c0_i32_0 : i32, i32
  }
  func.func @transform_2(%arg0: i32) -> (i32, i32) {
    %c0_i32 = arith.constant 0 : i32
    %c0_i32_0 = arith.constant 0 : i32
    %c0_i32_1 = arith.constant 0 : i32
    return %c0_i32, %c0_i32_0 : i32, i32
  }
  func.func @transform_3(%arg0: i32) -> (i32, i32) {
    %c0_i32 = arith.constant 0 : i32
    %c0_i32_0 = arith.constant 0 : i32
    %c0_i32_1 = arith.constant 0 : i32
    return %c0_i32, %c0_i32_0 : i32, i32
  }
  func.func @transform_4(%arg0: i32) -> (i32, i32) {
    %c0_i32 = arith.constant 0 : i32
    %c0_i32_0 = arith.constant 0 : i32
    %c0_i32_1 = arith.constant 0 : i32
    return %c0_i32, %c0_i32_0 : i32, i32
  }
  func.func @transform_5(%arg0: i32) -> (i32, i32) {
    %c0_i32 = arith.constant 0 : i32
    %c0_i32_0 = arith.constant 0 : i32
    %c0_i32_1 = arith.constant 0 : i32
    return %c0_i32, %c0_i32_0 : i32, i32
  }
  func.func @transform_6(%arg0: i32) -> (i32, i32) {
    %c0_i32 = arith.constant 0 : i32
    %c0_i32_0 = arith.constant 0 : i32
    %c0_i32_1 = arith.constant 0 : i32
    return %c0_i32, %c0_i32_0 : i32, i32
  }
  func.func @transform_7(%arg0: i32) -> (i32, i32) {
    %c0_i32 = arith.constant 0 : i32
    %c0_i32_0 = arith.constant 0 : i32
    %c0_i32_1 = arith.constant 0 : i32
    return %c0_i32, %c0_i32_0 : i32, i32
  }
}

</mosaic_0001>

<bundles_post_ra>
// kernel: discriminator_forward.4
= control target key start
LH: loop header
LB: loop body
LE: loop exit
PB: predicated region body
PF: predicated region fallthrough
CT: control target
= control target key end

     0   :  { %vm355_vm0 = vcmask 1044480   ;;  %vm356_vm1 = vcmask 1045504   ;;  %v2476_v2 = vmov 65535   ;;  %vm258_vm2 = vcmask 220160   ;;  %s4116_s1 = inlined_call_operand.vmem [shape: bf16[27,16], index: 1, kind: input, shape index: {}]   ;;  %s4117_s2 = inlined_call_operand.vmem [shape: f32[1,16], index: 2, kind: input, shape index: {}]   ;;  %s4118_s0 = inlined_call_operand.vmem [shape: bf16[512,27], index: 0, kind: input, shape index: {}]   ;;  %s4119_s3 = inlined_call_operand.vmem [shape: bf16[512,16], index: 3, kind: output, shape index: {}]  }
   0x1   :  { %v2078_v0 = vld [vmem:[%s4116_s1 + $0x8] sm:$0xf]  ;;  %v2209_v1 = vld [vmem:[%s4116_s1 + $0x8] sm:$0x30]  ;;  %v357_v3 = vsel %vm355_vm0, 4294967295, %v2476_v2  ;;  %v2208_v7 = vld [vmem:[%s4116_s1] sm:$0xff] }
   0x2   :  { %v2079_v4 = vor.u32 %v2209_v1, %v2078_v0  ;;  %v358_v5 = vsel %vm356_vm1, %v357_v3, 0  ;;  %v2176_v8 = vld [vmem:[%s4118_s0] sm:$0xff]  ;;  %v2177_v12 = vld [vmem:[%s4118_s0 + $0x8] sm:$0xff]  ;;  %v2178_v16 = vld [vmem:[%s4118_s0 + $0x10] sm:$0xff]  ;;  %vm1875_vm8 = vcmask 125952  }
   0x3   :  { %v2184_v9 = vld [vmem:[%s4118_s0 + $0x40] sm:$0xff]  ;;  %v2185_v13 = vld [vmem:[%s4118_s0 + $0x48] sm:$0xff]  ;;  %v2186_v17 = vld [vmem:[%s4118_s0 + $0x50] sm:$0xff] }
   0x4   :  { %v360_v6 = vand.u32 %v2079_v4, %v358_v5  ;;  %v2192_v10 = vld [vmem:[%s4118_s0 + $0x80] sm:$0xff]  ;;  %v2193_v14 = vld [vmem:[%s4118_s0 + $0x88] sm:$0xff]  ;;  %v2194_v18 = vld [vmem:[%s4118_s0 + $0x90] sm:$0xff] }
   0x5   :  { %v2200_v11 = vld [vmem:[%s4118_s0 + $0xc0] sm:$0xff]  ;;  %v2201_v15 = vld [vmem:[%s4118_s0 + $0xc8] sm:$0xff]  ;;  %v2202_v19 = vld [vmem:[%s4118_s0 + $0xd0] sm:$0xff] }
   0x6   :  { %368 = vmatpush.bf16.msra.mxu0 %v360_v6  ;;  %2210 = vmatpush.bf16.msra.mxu1 %v360_v6  ;;  %v2179_v20 = vld [vmem:[%s4118_s0 + $0x18] sm:$0xff]  ;;  %v2180_v24 = vld [vmem:[%s4118_s0 + $0x20] sm:$0xff]  ;;  %v2181_v28 = vld [vmem:[%s4118_s0 + $0x28] sm:$0xff] }
   0x7   :  { %2211 = vmatpush.bf16.msra.mxu2 %v360_v6  ;;  %2212 = vmatpush.bf16.msra.mxu3 %v360_v6  ;;  %v2187_v21 = vld [vmem:[%s4118_s0 + $0x58] sm:$0xff]  ;;  %v2188_v25 = vld [vmem:[%s4118_s0 + $0x60] sm:$0xff]  ;;  %v2189_v29 = vld [vmem:[%s4118_s0 + $0x68] sm:$0xff] }
   0x8   :  { %v2195_v22 = vld [vmem:[%s4118_s0 + $0x98] sm:$0xff]  ;;  %v2196_v26 = vld [vmem:[%s4118_s0 + $0xa0] sm:$0xff]  ;;  %v2197_v30 = vld [vmem:[%s4118_s0 + $0xa8] sm:$0xff] }
   0x9   :  { %v2203_v23 = vld [vmem:[%s4118_s0 + $0xd8] sm:$0xff]  ;;  %v2204_v27 = vld [vmem:[%s4118_s0 + $0xe0] sm:$0xff]  ;;  %v2205_v31 = vld [vmem:[%s4118_s0 + $0xe8] sm:$0xff] }
   0xa   :  { %369 = vmatpush.bf16.msra.mxu0 %v2208_v7  ;;  %2213 = vmatpush.bf16.msra.mxu1 %v2208_v7  ;;  %v2182_v32 = vld [vmem:[%s4118_s0 + $0x30] sm:$0xff]  ;;  %v2183_v36 = vld [vmem:[%s4118_s0 + $0x38] sm:$0xff]  ;;  %v2637_v40 = vld [vmem:[%s4117_s2] ss:$0 sm:$0xff] }
   0xb   :  { %2214 = vmatpush.bf16.msra.mxu2 %v2208_v7  ;;  %2215 = vmatpush.bf16.msra.mxu3 %v2208_v7  ;;  %v2190_v33 = vld [vmem:[%s4118_s0 + $0x70] sm:$0xff]  ;;  %v2191_v37 = vld [vmem:[%s4118_s0 + $0x78] sm:$0xff] }
   0xc   :  { %v2198_v34 = vld [vmem:[%s4118_s0 + $0xb0] sm:$0xff]  ;;  %v2199_v38 = vld [vmem:[%s4118_s0 + $0xb8] sm:$0xff] }
   0xd   :  { %2080 = vmatmul.msk.bf16.vlgmr.msra.gmra.mxu0 %vm258_vm2, %v2176_v8  ;;  %2088 = vmatmul.msk.bf16.vlgmr.msra.gmra.mxu1 %vm258_vm2, %v2184_v9  ;;  %v2206_v35 = vld [vmem:[%s4118_s0 + $0xf0] sm:$0xff]  ;;  %v2207_v39 = vld [vmem:[%s4118_s0 + $0xf8] sm:$0xff] }
   0xe   :  { %2096 = vmatmul.msk.bf16.vlgmr.msra.gmra.mxu2 %vm258_vm2, %v2192_v10  ;;  %2104 = vmatmul.msk.bf16.vlgmr.msra.gmra.mxu3 %vm258_vm2, %v2200_v11 }
  0x1d   :  { %2081 = vmatmul.msk.bf16.gmra.mxu0 %vm258_vm2, %v2177_v12  ;;  %2089 = vmatmul.msk.bf16.gmra.mxu1 %vm258_vm2, %v2185_v13 }
  0x1e   :  { %2097 = vmatmul.msk.bf16.gmra.mxu2 %vm258_vm2, %v2193_v14  ;;  %2105 = vmatmul.msk.bf16.gmra.mxu3 %vm258_vm2, %v2201_v15 }
  0x2d   :  { %2082 = vmatmul.msk.bf16.gmra.mxu0 %vm258_vm2, %v2178_v16  ;;  %2090 = vmatmul.msk.bf16.gmra.mxu1 %vm258_vm2, %v2186_v17 }
  0x2e   :  { %2098 = vmatmul.msk.bf16.gmra.mxu2 %vm258_vm2, %v2194_v18  ;;  %2106 = vmatmul.msk.bf16.gmra.mxu3 %vm258_vm2, %v2202_v19 }
  0x3d   :  { %2083 = vmatmul.msk.bf16.gmra.mxu0 %vm258_vm2, %v2179_v20  ;;  %2091 = vmatmul.msk.bf16.gmra.mxu1 %vm258_vm2, %v2187_v21 }
  0x3e   :  { %2099 = vmatmul.msk.bf16.gmra.mxu2 %vm258_vm2, %v2195_v22  ;;  %2107 = vmatmul.msk.bf16.gmra.mxu3 %vm258_vm2, %v2203_v23 }
  0x4d   :  { %2084 = vmatmul.msk.bf16.gmra.mxu0 %vm258_vm2, %v2180_v24  ;;  %2092 = vmatmul.msk.bf16.gmra.mxu1 %vm258_vm2, %v2188_v25 }
  0x4e   :  { %2100 = vmatmul.msk.bf16.gmra.mxu2 %vm258_vm2, %v2196_v26  ;;  %2108 = vmatmul.msk.bf16.gmra.mxu3 %vm258_vm2, %v2204_v27 }
  0x5d   :  { %2085 = vmatmul.msk.bf16.gmra.mxu0 %vm258_vm2, %v2181_v28  ;;  %2093 = vmatmul.msk.bf16.gmra.mxu1 %vm258_vm2, %v2189_v29 }
  0x5e   :  { %2101 = vmatmul.msk.bf16.gmra.mxu2 %vm258_vm2, %v2197_v30  ;;  %2109 = vmatmul.msk.bf16.gmra.mxu3 %vm258_vm2, %v2205_v31 }
  0x6d   :  { %2086 = vmatmul.msk.bf16.gmra.mxu0 %vm258_vm2, %v2182_v32  ;;  %2094 = vmatmul.msk.bf16.gmra.mxu1 %vm258_vm2, %v2190_v33 }
  0x6e   :  { %2102 = vmatmul.msk.bf16.gmra.mxu2 %vm258_vm2, %v2198_v34  ;;  %2110 = vmatmul.msk.bf16.gmra.mxu3 %vm258_vm2, %v2206_v35 }
  0x7d   :  { %2087 = vmatmul.msk.bf16.gmra.mxu0 %vm258_vm2, %v2183_v36  ;;  %2095 = vmatmul.msk.bf16.gmra.mxu1 %vm258_vm2, %v2191_v37 }
  0x7e   :  { %2103 = vmatmul.msk.bf16.gmra.mxu2 %vm258_vm2, %v2199_v38  ;;  %2111 = vmatmul.msk.bf16.gmra.mxu3 %vm258_vm2, %v2207_v39 }
  0x8a   :  { %v371_v41 = vpop.f32.mrf.mxu0  ;;  %v411_v42 = vpop.f32.mrf.mxu1 }
  0x8b   :  { %v2640_v43 = vadd.f32 %v2637_v40, %v371_v41  ;;  %v2643_v44 = vadd.f32 %v2637_v40, %v411_v42 }
  0x8d   :  { %v2112_v45 = vmul.f32 -1.442695, %v2640_v43  ;;  %v2128_v46 = vmul.f32 -1.442695, %v2643_v44 }
  0x8f   :  { %2218 = vpow2.f32 %v2112_v45 }
  0x90   :  { %2220 = vpow2.f32 %v2128_v46 }
  0x91   :  { %v451_v47 = vpop.f32.mrf.mxu2  ;;  %v491_v48 = vpop.f32.mrf.mxu3 }
  0x92   :  { %v2648_v49 = vadd.f32 %v2637_v40, %v451_v47  ;;  %v2651_v50 = vadd.f32 %v2637_v40, %v491_v48  ;;  %v373_v51 = vpop.f32.mrf.mxu0  ;;  %v413_v52 = vpop.f32.mrf.mxu1 }
  0x93   :  { %v2654_v53 = vadd.f32 %v2637_v40, %v373_v51  ;;  %v2657_v54 = vadd.f32 %v2637_v40, %v413_v52 }
  0x94   :  { %v2144_v55 = vmul.f32 -1.442695, %v2648_v49  ;;  %v2160_v56 = vmul.f32 -1.442695, %v2651_v50 }
  0x95   :  { %v2219_v57 = vpop.eup %2218  ;;  %v2113_v60 = vmul.f32 -1.442695, %v2654_v53  ;;  %v2129_v62 = vmul.f32 -1.442695, %v2657_v54 }
  0x96   :  { %v2221_v58 = vpop.eup %2220  ;;  %v2661_v59 = vadd.f32 1.0, %v2219_v57  ;;  %2222 = vpow2.f32 %v2144_v55 }
  0x97   :  { %v2664_v61 = vadd.f32 1.0, %v2221_v58  ;;  %2224 = vpow2.f32 %v2160_v56 }
  0x98   :  { %2226 = vrcp.f32 %v2661_v59  ;;  %v796_v3 = vand.u32 2147483647, %v2661_v59  ;;  %v798_v4 = vand.u32 2147483648, %v2661_v59  ;;  %vm792_vm3 = vweird.f32 %v2661_v59 }
  0x99   :  { %2228 = vrcp.f32 %v2664_v61  ;;  %v453_v63 = vpop.f32.mrf.mxu2  ;;  %v493_v0 = vpop.f32.mrf.mxu3  ;;  %v1036_v7 = vand.u32 2147483647, %v2664_v61  ;;  %v1038_v11 = vand.u32 2147483648, %v2664_v61  ;;  %vm1032_vm4 = vweird.f32 %v2664_v61 }
  0x9a   :  { %2230 = vpow2.f32 %v2113_v60  ;;  %v2670_v1 = vadd.f32 %v2637_v40, %v453_v63  ;;  %v376_v2 = vpop.f32.mrf.mxu0  ;;  %v416_v5 = vpop.f32.mrf.mxu1  ;;  %v2677_v9 = vadd.f32 %v2637_v40, %v493_v0  ;;  %vm2693_vm5 = vcmp.eq.f32.partialorder %v796_v3, 8.507059e+37 }
  0x9b   :  { %2232 = vpow2.f32 %v2129_v62  ;;  %v2683_v13 = vadd.f32 %v2637_v40, %v376_v2  ;;  %v2690_v16 = vadd.f32 %v2637_v40, %v416_v5  ;;  %v799_v20 = vor.u32 1.1754944e-38, %v798_v4 }
  0x9c   :  { %v2223_v6 = vpop.eup %2222  ;;  %v2145_v8 = vmul.f32 -1.442695, %v2670_v1  ;;  %vm2699_vm6 = vcmp.eq.f32.partialorder %v1036_v7, 8.507059e+37  ;;  %v2161_v24 = vmul.f32 -1.442695, %v2677_v9  ;;  %v1039_v27 = vor.u32 1.1754944e-38, %v1038_v11 }
  0x9d   :  { %v2225_v10 = vpop.eup %2224  ;;  %v2680_v12 = vadd.f32 1.0, %v2223_v6  ;;  %v2706_v28 = vmul.f32 -1.442695, %v2683_v13  ;;  %v2710_v31 = vmul.f32 -1.442695, %v2690_v16 }
  0x9e   :  { %v2227_v14 = vpop.eup %2226  ;;  %v2687_v15 = vadd.f32 1.0, %v2225_v10 }
  0x9f   :  { %v2229_v17 = vpop.eup %2228  ;;  %v788_v18 = vmul.f32 %v2227_v14, %v2661_v59  ;;  %2234 = vrcp.f32 %v2680_v12  ;;  %vm793_vm7 = vweird.f32 %v2227_v14  ;;  %v1276_v30 = vand.u32 2147483647, %v2680_v12 }
  0xa0   :  { %v2231_v21 = vpop.eup %2230  ;;  %v1028_v22 = vmul.f32 %v2229_v17, %v2664_v61  ;;  %2236 = vpow2.f32 %v2145_v8  ;;  %v1278_v33 = vand.u32 2147483648, %v2680_v12  ;;  %vm1033_vm9 = vweird.f32 %v2229_v17  ;;  %vm794_vm11 = vmor %vm792_vm3, %vm793_vm7 }
  0xa1   :  { %v2233_v25 = vpop.eup %2232  ;;  %v789_v26 = vsub.f32 1.0, %v788_v18  ;;  %2238 = vrcp.f32 %v2687_v15  ;;  %v2713_v34 = vadd.f32 1.0, %v2231_v21  ;;  %v1516_v37 = vand.u32 2147483647, %v2687_v15  ;;  %v456_v48 = vpop.f32.mrf.mxu2  ;;  %vm1034_vm14 = vmor %vm1032_vm4, %vm1033_vm9 }
  0xa2   :  { %v1029_v29 = vsub.f32 1.0, %v1028_v22  ;;  %v2715_v35 = vadd.f32 1.0, %v2233_v25  ;;  %2240 = vpow2.f32 %v2161_v24  ;;  %vm1272_vm10 = vweird.f32 %v2680_v12 }
  0xa3   :  { %v790_v32 = vmul.f32 %v2227_v14, %v789_v26  ;;  %v1518_v41 = vand.u32 2147483648, %v2687_v15  ;;  %2242 = vrcp.f32 %v2713_v34  ;;  %vm2725_vm12 = vcmp.eq.f32.partialorder %v1276_v30, 8.507059e+37 }
  0xa4   :  { %v1030_v36 = vmul.f32 %v2229_v17, %v1029_v29  ;;  %vm1512_vm13 = vweird.f32 %v2687_v15  ;;  %v1279_v55 = vor.u32 1.1754944e-38, %v1278_v33  ;;  %v811_v56 = vand.u32 2147483647, %v2713_v34 }
  0xa5   :  { %v2235_v38 = vpop.eup %2234  ;;  %v791_v39 = vadd.f32 %v2227_v14, %v790_v32  ;;  %2244 = vrcp.f32 %v2715_v35  ;;  %vm2738_vm15 = vcmp.eq.f32.partialorder %v1516_v37, 8.507059e+37  ;;  %v1519_v0 = vor.u32 1.1754944e-38, %v1518_v41 }
  0xa6   :  { %v2237_v42 = vpop.eup %2236  ;;  %v1031_v45 = vadd.f32 %v2229_v17, %v1030_v36  ;;  %v1268_v46 = vmul.f32 %v2235_v38, %v2680_v12  ;;  %v2746_v2 = vadd.f32 %v2637_v40, %v456_v48  ;;  %vm1273_vm0 = vweird.f32 %v2235_v38 }
  0xa7   :  { %v2239_v51 = vpop.eup %2238  ;;  %v795_v52 = vsel %vm794_vm11, %v2227_v14, %v791_v39  ;;  %vm807_vm1 = vweird.f32 %v2713_v34  ;;  %v2751_v10 = vadd.f32 1.0, %v2237_v42  ;;  %vm2754_vm3 = vcmp.eq.f32.partialorder %v811_v56, 8.507059e+37  ;;  %vm1274_vm4 = vmor %vm1272_vm10, %vm1273_vm0 }
  0xa8   :  { %v800_v57 = vsel %vm2693_vm5, %v799_v20, %v795_v52  ;;  %v1035_v58 = vsel %vm1034_vm14, %v2229_v17, %v1031_v45  ;;  %v1269_v59 = vsub.f32 1.0, %v1268_v46  ;;  %v1508_v60 = vmul.f32 %v2239_v51, %v2687_v15  ;;  %v2241_v3 = vpop.eup %2240 }
  0xa9   :  { %v1747_v63 = vmul.f32 %v800_v57, %v2640_v43  ;;  %v1040_v61 = vsel %vm2699_vm6, %v1039_v27, %v1035_v58  ;;  %v2243_v7 = vpop.eup %2242  ;;  %vm1513_vm2 = vweird.f32 %v2239_v51  ;;  %v813_v43 = vand.u32 2147483648, %v2713_v34 }
  0xaa   :  { %v1763_v4 = vmul.f32 %v1040_v61, %v2643_v44  ;;  %v1270_v5 = vmul.f32 %v2235_v38, %v1269_v59  ;;  %v1509_v6 = vsub.f32 1.0, %v1508_v60  ;;  %v803_v18 = vmul.f32 %v2243_v7, %v2713_v34  ;;  %vm1514_vm6 = vmor %vm1512_vm13, %vm1513_vm2  ;;  %v496_v34 = vpop.f32.mrf.mxu3  ;;  %v378_v60 = vpop.f32.mrf.mxu0 }
  0xab   :  { %v1811_v8 = vpack.c.bf16 %v1747_v63, %v1747_v63  ;;  %v2245_v44 = vpop.eup %2244  ;;  %vm1047_vm5 = vweird.f32 %v2715_v35  ;;  %v1051_v20 = vand.u32 2147483647, %v2715_v35  ;;  %2246 = vrcp.f32 %v2751_v10 }
  0xac   :  { %v1827_v11 = vpack.c.bf16 %v1763_v4, %v1763_v4  ;;  %v1271_v14 = vadd.f32 %v2235_v38, %v1270_v5  ;;  %v1510_v17 = vmul.f32 %v2239_v51, %v1509_v6  ;;  %v2768_v21 = vadd.f32 1.0, %v2241_v3 }
  0xad   :  { %1876 = vst.msk [vmem:[%s4119_s3] sm:$0xf] %vm1875_vm8, %v1811_v8  ;;  %v804_v24 = vsub.f32 1.0, %v803_v18  ;;  %v1043_v25 = vmul.f32 %v2245_v44, %v2715_v35  ;;  %vm808_vm7 = vweird.f32 %v2243_v7  ;;  %vm1048_vm9 = vweird.f32 %v2245_v44 }
  0xae   :  { %1892 = vst.msk [vmem:[%s4119_s3 + $0x40] sm:$0xf] %vm1875_vm8, %v1827_v11  ;;  %v1275_v22 = vsel %vm1274_vm4, %v2235_v38, %v1271_v14  ;;  %v1511_v23 = vadd.f32 %v2239_v51, %v1510_v17  ;;  %v1053_v26 = vand.u32 2147483648, %v2715_v35  ;;  %v1291_v36 = vand.u32 2147483647, %v2751_v10  ;;  %vm809_vm10 = vmor %vm807_vm1, %vm808_vm7 }
  0xaf   :  { %v1280_v12 = vsel %vm2725_vm12, %v1279_v55, %v1275_v22  ;;  %v805_v30 = vmul.f32 %v2243_v7, %v804_v24  ;;  %v1044_v32 = vsub.f32 1.0, %v1043_v25  ;;  %v1293_v37 = vand.u32 2147483648, %v2751_v10  ;;  %vm1049_vm13 = vmor %vm1047_vm5, %vm1048_vm9 }
  0xb0   :  { %v1779_v27 = vmul.f32 %v1280_v12, %v2648_v49  ;;  %v1515_v29 = vsel %vm1514_vm6, %v2239_v51, %v1511_v23  ;;  %2248 = vrcp.f32 %v2768_v21  ;;  %v814_v49 = vor.u32 1.1754944e-38, %v813_v43  ;;  %v458_v43 = vpop.f32.mrf.mxu2 }
  0xb1   :  { %v1520_v33 = vsel %vm2738_vm15, %v1519_v0, %v1515_v29  ;;  %v806_v39 = vadd.f32 %v2243_v7, %v805_v30  ;;  %v1045_v41 = vmul.f32 %v2245_v44, %v1044_v32  ;;  %v2247_v42 = vpop.eup %2246  ;;  %vm2791_vm11 = vcmp.eq.f32.partialorder %v1051_v20, 8.507059e+37  ;;  %v418_v0 = vpop.f32.mrf.mxu1 }
  0xb2   :  { %v1843_v15 = vpack.c.bf16 %v1779_v27, %v1779_v27  ;;  %v1795_v38 = vmul.f32 %v1520_v33, %v2651_v50  ;;  %v1054_v46 = vor.u32 1.1754944e-38, %v1053_v26  ;;  %vm1287_vm12 = vweird.f32 %v2751_v10  ;;  %v498_v27 = vpop.f32.mrf.mxu3 }
  0xb3   :  { %v810_v47 = vsel %vm809_vm10, %v2243_v7, %v806_v39  ;;  %v1046_v48 = vadd.f32 %v2245_v44, %v1045_v41  ;;  %v1283_v51 = vmul.f32 %v2247_v42, %v2751_v10  ;;  %vm1288_vm14 = vweird.f32 %v2247_v42 }
  0xb4   :  { %1908 = vst.msk [vmem:[%s4119_s3 + $0x80] sm:$0xf] %vm1875_vm8, %v1843_v15  ;;  %v1859_v50 = vpack.c.bf16 %v1795_v38, %v1795_v38  ;;  %v815_v52 = vsel %vm2754_vm3, %v814_v49, %v810_v47  ;;  %vm2806_vm15 = vcmp.eq.f32.partialorder %v1291_v36, 8.507059e+37  ;;  %v1294_v56 = vor.u32 1.1754944e-38, %v1293_v37  ;;  %vm1289_vm1 = vmor %vm1287_vm12, %vm1288_vm14  ;;  %v381_v36 = vpop.f32.mrf.mxu0 }
  0xb5   :  { %v1748_v57 = vmul.f32 %v815_v52, %v2654_v53  ;;  %v1050_v58 = vsel %vm1049_vm13, %v2245_v44, %v1046_v48  ;;  %v1284_v59 = vsub.f32 1.0, %v1283_v51  ;;  %2250 = vpow2.f32 %v2706_v28 }
  0xb6   :  { %1924 = vst.msk [vmem:[%s4119_s3 + $0xc0] sm:$0xf] %vm1875_vm8, %v1859_v50  ;;  %v2249_v35 = vpop.eup %2248  ;;  %v1055_v62 = vsel %vm2791_vm11, %v1054_v46, %v1050_v58  ;;  %2252 = vpow2.f32 %v2710_v31  ;;  %v2146_v63 = vmul.f32 -1.442695, %v2746_v2  ;;  %v2821_v61 = vadd.f32 %v2637_v40, %v496_v34 }
  0xb7   :  { %v1812_v3 = vpack.c.bf16 %v1748_v57, %v1748_v57  ;;  %v1764_v53 = vmul.f32 %v1055_v62, %v2657_v54  ;;  %v1285_v4 = vmul.f32 %v2247_v42, %v1284_v59  ;;  %v1523_v5 = vmul.f32 %v2249_v35, %v2768_v21 }
  0xb8   :  { %vm1527_vm0 = vweird.f32 %v2768_v21  ;;  %2254 = vpow2.f32 %v2146_v63  ;;  %v2162_v28 = vmul.f32 -1.442695, %v2821_v61  ;;  %v2828_v6 = vadd.f32 %v2637_v40, %v378_v60 }
  0xb9   :  { %1877 = vst.msk [vmem:[%s4119_s3 + $0x4] sm:$0xf] %vm1875_vm8, %v1812_v3  ;;  %v1828_v31 = vpack.c.bf16 %v1764_v53, %v1764_v53  ;;  %v1286_v7 = vadd.f32 %v2247_v42, %v1285_v4  ;;  %v1524_v8 = vsub.f32 1.0, %v1523_v5  ;;  %v2835_v54 = vadd.f32 %v2637_v40, %v418_v0 }
  0xba   :  { %v1531_v11 = vand.u32 2147483647, %v2768_v21  ;;  %v1533_v14 = vand.u32 2147483648, %v2768_v21  ;;  %2256 = vpow2.f32 %v2162_v28  ;;  %v2115_v17 = vmul.f32 -1.442695, %v2828_v6 }
  0xbb   :  { %v2251_v18 = vpop.eup %2250  ;;  %1893 = vst.msk [vmem:[%s4119_s3 + $0x44] sm:$0xf] %vm1875_vm8, %v1828_v31  ;;  %v1290_v19 = vsel %vm1289_vm1, %v2247_v42, %v1286_v7  ;;  %v1525_v44 = vmul.f32 %v2249_v35, %v1524_v8  ;;  %vm1528_vm2 = vweird.f32 %v2249_v35  ;;  %v2131_v20 = vmul.f32 -1.442695, %v2835_v54 }
  0xbc   :  { %v2253_v10 = vpop.eup %2252  ;;  %v1295_v22 = vsel %vm2806_vm15, %v1294_v56, %v1290_v19  ;;  %v2850_v23 = vadd.f32 1.0, %v2251_v18  ;;  %2258 = vpow2.f32 %v2115_v17  ;;  %v2853_v24 = vadd.f32 %v2637_v40, %v458_v43  ;;  %vm1529_vm3 = vmor %vm1527_vm0, %vm1528_vm2 }
  0xbd   :  { %v1780_v25 = vmul.f32 %v1295_v22, %v2670_v1  ;;  %v1526_v12 = vadd.f32 %v2249_v35, %v1525_v44  ;;  %v2856_v26 = vadd.f32 1.0, %v2253_v10  ;;  %2260 = vpow2.f32 %v2131_v20 }
  0xbe   :  { %v2255_v29 = vpop.eup %2254  ;;  %v1534_v30 = vor.u32 1.1754944e-38, %v1533_v14  ;;  %2262 = vrcp.f32 %v2850_v23  ;;  %vm1532_vm4 = vcmp.eq.f32.partialorder %v1531_v11, 8.507059e+37  ;;  %v826_v15 = vand.u32 2147483647, %v2850_v23  ;;  %v501_v14 = vpop.f32.mrf.mxu3 }
  0xbf   :  { %v1844_v32 = vpack.c.bf16 %v1780_v25, %v1780_v25  ;;  %v1530_v33 = vsel %vm1529_vm3, %v2249_v35, %v1526_v12  ;;  %2264 = vrcp.f32 %v2856_v26  ;;  %v2147_v38 = vmul.f32 -1.442695, %v2853_v24 }
  0xc0   :  { %v2257_v37 = vpop.eup %2256  ;;  %v1535_v1 = vsel %vm1532_vm4, %v1534_v30, %v1530_v33  ;;  %v2865_v39 = vadd.f32 %v2637_v40, %v498_v27  ;;  %v828_v41 = vand.u32 2147483648, %v2850_v23  ;;  %v2873_v42 = vadd.f32 1.0, %v2255_v29 }
  0xc1   :  { %1909 = vst.msk [vmem:[%s4119_s3 + $0x84] sm:$0xf] %vm1875_vm8, %v1844_v32  ;;  %v1796_v21 = vmul.f32 %v1535_v1, %v2677_v9  ;;  %v2875_v49 = vadd.f32 1.0, %v2257_v37  ;;  %v1066_v46 = vand.u32 2147483647, %v2856_v26  ;;  %v1068_v50 = vand.u32 2147483648, %v2856_v26 }
  0xc2   :  { %v2259_v45 = vpop.eup %2258  ;;  %v2880_v47 = vadd.f32 %v2637_v40, %v381_v36  ;;  %2266 = vrcp.f32 %v2873_v42  ;;  %vm822_vm5 = vweird.f32 %v2850_v23  ;;  %vm1062_vm6 = vweird.f32 %v2856_v26 }
  0xc3   :  { %v2261_v48 = vpop.eup %2260  ;;  %v1860_v51 = vpack.c.bf16 %v1796_v21, %v1796_v21  ;;  %2268 = vrcp.f32 %v2875_v49  ;;  %v2163_v9 = vmul.f32 -1.442695, %v2865_v39  ;;  %vm2892_vm7 = vcmp.eq.f32.partialorder %v826_v15, 8.507059e+37 }
  0xc4   :  { %v2263_v34 = vpop.eup %2262  ;;  %v829_v57 = vor.u32 1.1754944e-38, %v828_v41  ;;  %2270 = vpow2.f32 %v2147_v38  ;;  %vm2897_vm9 = vcmp.eq.f32.partialorder %v1066_v46, 8.507059e+37  ;;  %v1069_v60 = vor.u32 1.1754944e-38, %v1068_v50 }
  0xc5   :  { %v2265_v52 = vpop.eup %2264  ;;  %1925 = vst.msk [vmem:[%s4119_s3 + $0xc4] sm:$0xf] %vm1875_vm8, %v1860_v51  ;;  %v818_v55 = vmul.f32 %v2263_v34, %v2850_v23  ;;  %v1306_v35 = vand.u32 2147483647, %v2873_v42  ;;  %v2903_v62 = vmul.f32 -1.442695, %v2880_v47  ;;  %vm1302_vm10 = vweird.f32 %v2873_v42  ;;  %v421_v51 = vpop.f32.mrf.mxu1 }
  0xc6   :  { %v1058_v58 = vmul.f32 %v2265_v52, %v2856_v26  ;;  %v1308_v0 = vand.u32 2147483648, %v2873_v42  ;;  %v1546_v3 = vand.u32 2147483647, %v2875_v49  ;;  %v2907_v53 = vadd.f32 1.0, %v2259_v45 }
  0xc7   :  { %v819_v63 = vsub.f32 1.0, %v818_v55  ;;  %v1548_v5 = vand.u32 2147483648, %v2875_v49  ;;  %v2911_v28 = vadd.f32 1.0, %v2261_v48  ;;  %2272 = vpow2.f32 %v2163_v9 }
  0xc8   :  { %v1059_v4 = vsub.f32 1.0, %v1058_v58  ;;  %v2267_v31 = vpop.eup %2266  ;;  %vm823_vm11 = vweird.f32 %v2263_v34  ;;  %vm1542_vm12 = vweird.f32 %v2875_v49  ;;  %2274 = vrcp.f32 %v2907_v53 }
  0xc9   :  { %v820_v7 = vmul.f32 %v2263_v34, %v819_v63  ;;  %v2269_v8 = vpop.eup %2268  ;;  %vm1063_vm13 = vweird.f32 %v2265_v52  ;;  %v1298_v11 = vmul.f32 %v2267_v31, %v2873_v42  ;;  %vm2916_vm14 = vcmp.eq.f32.partialorder %v1306_v35, 8.507059e+37  ;;  %vm824_vm0 = vmor %vm822_vm5, %vm823_vm11 }
  0xca   :  { %v1060_v43 = vmul.f32 %v2265_v52, %v1059_v4  ;;  %v2271_v17 = vpop.eup %2270  ;;  %v1309_v19 = vor.u32 1.1754944e-38, %v1308_v0  ;;  %v1538_v44 = vmul.f32 %v2269_v8, %v2875_v49  ;;  %vm2921_vm15 = vcmp.eq.f32.partialorder %v1546_v3, 8.507059e+37  ;;  %vm1064_vm1 = vmor %vm1062_vm6, %vm1063_vm13 }
  0xcb   :  { %v821_v18 = vadd.f32 %v2263_v34, %v820_v7  ;;  %v1299_v22 = vsub.f32 1.0, %v1298_v11  ;;  %v1549_v25 = vor.u32 1.1754944e-38, %v1548_v5  ;;  %2276 = vrcp.f32 %v2911_v28 }
  0xcc   :  { %v1061_v10 = vadd.f32 %v2265_v52, %v1060_v43  ;;  %vm1303_vm2 = vweird.f32 %v2267_v31  ;;  %v1539_v27 = vsub.f32 1.0, %v1538_v44  ;;  %v841_v29 = vand.u32 2147483647, %v2907_v53 }
  0xcd   :  { %v825_v12 = vsel %vm824_vm0, %v2263_v34, %v821_v18  ;;  %v2273_v30 = vpop.eup %2272  ;;  %v1300_v23 = vmul.f32 %v2267_v31, %v1299_v22  ;;  %v843_v36 = vand.u32 2147483648, %v2907_v53  ;;  %vm1543_vm3 = vweird.f32 %v2269_v8  ;;  %vm1304_vm4 = vmor %vm1302_vm10, %vm1303_vm2  ;;  %v383_v22 = vpop.f32.mrf.mxu0 }
  0xce   :  { %v830_v32 = vsel %vm2892_vm7, %v829_v57, %v825_v12  ;;  %v1065_v33 = vsel %vm1064_vm1, %v2265_v52, %v1061_v10  ;;  %v2275_v37 = vpop.eup %2274  ;;  %v1540_v26 = vmul.f32 %v2269_v8, %v1539_v27  ;;  %v1081_v45 = vand.u32 2147483647, %v2911_v28  ;;  %vm1544_vm5 = vmor %vm1542_vm12, %vm1543_vm3 }
  0xcf   :  { %v1749_v1 = vmul.f32 %v830_v32, %v2683_v13  ;;  %v1070_v15 = vsel %vm2897_vm9, %v1069_v60, %v1065_v33  ;;  %v1301_v21 = vadd.f32 %v2267_v31, %v1300_v23  ;;  %v833_v41 = vmul.f32 %v2275_v37, %v2907_v53  ;;  %v461_v60 = vpop.f32.mrf.mxu2 }
  0xd0   :  { %v1765_v38 = vmul.f32 %v1070_v15, %v2690_v16  ;;  %v1541_v50 = vadd.f32 %v2269_v8, %v1540_v26  ;;  %v1083_v13 = vand.u32 2147483648, %v2911_v28  ;;  %v2944_v48 = vadd.f32 1.0, %v2271_v17 }
  0xd1   :  { %v1813_v46 = vpack.c.bf16 %v1749_v1, %v1749_v1  ;;  %v2277_v34 = vpop.eup %2276  ;;  %v1305_v52 = vsel %vm1304_vm4, %v2267_v31, %v1301_v21  ;;  %v834_v16 = vsub.f32 1.0, %v833_v41  ;;  %v2948_v55 = vadd.f32 1.0, %v2273_v30 }
  0xd2   :  { %v1829_v9 = vpack.c.bf16 %v1765_v38, %v1765_v38  ;;  %v1310_v42 = vsel %vm2916_vm14, %v1309_v19, %v1305_v52  ;;  %v1545_v56 = vsel %vm1544_vm5, %v2269_v8, %v1541_v50  ;;  %vm838_vm6 = vweird.f32 %v2275_v37 }
  0xd3   :  { %1878 = vst.msk [vmem:[%s4119_s3 + $0x8] sm:$0xf] %vm1875_vm8, %v1813_v46  ;;  %v1073_v57 = vmul.f32 %v2277_v34, %v2911_v28  ;;  %v1781_v49 = vmul.f32 %v1310_v42, %v2746_v2  ;;  %v1550_v58 = vsel %vm2921_vm15, %v1549_v25, %v1545_v56  ;;  %v835_v59 = vmul.f32 %v2275_v37, %v834_v16  ;;  %v423_v25 = vpop.f32.mrf.mxu1 }
  0xd4   :  { %1894 = vst.msk [vmem:[%s4119_s3 + $0x48] sm:$0xf] %vm1875_vm8, %v1829_v9  ;;  %2278 = vrcp.f32 %v2944_v48  ;;  %v1797_v35 = vmul.f32 %v1550_v58, %v2821_v61  ;;  %vm837_vm7 = vweird.f32 %v2907_v53  ;;  %v2968_v0 = vadd.f32 %v2637_v40, %v421_v51 }
  0xd5   :  { %v1074_v63 = vsub.f32 1.0, %v1073_v57  ;;  %v1845_v3 = vpack.c.bf16 %v1781_v49, %v1781_v49  ;;  %v836_v4 = vadd.f32 %v2275_v37, %v835_v59  ;;  %vm842_vm9 = vcmp.eq.f32.partialorder %v841_v29, 8.507059e+37  ;;  %vm839_vm10 = vmor %vm837_vm7, %vm838_vm6 }
  0xd6   :  { %2280 = vrcp.f32 %v2948_v55  ;;  %v1861_v2 = vpack.c.bf16 %v1797_v35, %v1797_v35  ;;  %v844_v5 = vor.u32 1.1754944e-38, %v843_v36  ;;  %vm1078_vm11 = vweird.f32 %v2277_v34 }
  0xd7   :  { %v1075_v31 = vmul.f32 %v2277_v34, %v1074_v63  ;;  %1910 = vst.msk [vmem:[%s4119_s3 + $0x88] sm:$0xf] %vm1875_vm8, %v1845_v3  ;;  %v840_v61 = vsel %vm839_vm10, %v2275_v37, %v836_v4  ;;  %vm1077_vm12 = vweird.f32 %v2911_v28  ;;  %vm2977_vm13 = vcmp.eq.f32.partialorder %v1081_v45, 8.507059e+37 }
  0xd8   :  { %v1084_v7 = vor.u32 1.1754944e-38, %v1083_v13  ;;  %1926 = vst.msk [vmem:[%s4119_s3 + $0xc8] sm:$0xf] %vm1875_vm8, %v1861_v2  ;;  %v845_v8 = vsel %vm842_vm9, %v844_v5, %v840_v61  ;;  %vm1317_vm14 = vweird.f32 %v2944_v48  ;;  %2282 = vpow2.f32 %v2903_v62  ;;  %vm1079_vm15 = vmor %vm1077_vm12, %vm1078_vm11 }
  0xd9   :  { %v1076_v43 = vadd.f32 %v2277_v34, %v1075_v31  ;;  %v2132_v11 = vmul.f32 -1.442695, %v2968_v0  ;;  %v1750_v17 = vmul.f32 %v845_v8, %v2828_v6  ;;  %v1321_v18 = vand.u32 2147483647, %v2944_v48 }
  0xda   :  { %v2279_v28 = vpop.eup %2278  ;;  %v1323_v19 = vand.u32 2147483648, %v2944_v48  ;;  %v2993_v44 = vadd.f32 %v2637_v40, %v461_v60  ;;  %v1561_v62 = vand.u32 2147483647, %v2948_v55  ;;  %v3001_v30 = vadd.f32 %v2637_v40, %v501_v14  ;;  %v503_v60 = vpop.f32.mrf.mxu3 }
  0xdb   :  { %v1080_v20 = vsel %vm1079_vm15, %v2277_v34, %v1076_v43  ;;  %v1313_v10 = vmul.f32 %v2279_v28, %v2944_v48  ;;  %2284 = vpow2.f32 %v2132_v11  ;;  %v1814_v27 = vpack.c.bf16 %v1750_v17, %v1750_v17 }
  0xdc   :  { %v2281_v12 = vpop.eup %2280  ;;  %v1085_v6 = vsel %vm2977_vm13, %v1084_v7, %v1080_v20  ;;  %v2148_v29 = vmul.f32 -1.442695, %v2993_v44  ;;  %v1563_v36 = vand.u32 2147483648, %v2948_v55  ;;  %v2164_v37 = vmul.f32 -1.442695, %v3001_v30 }
  0xdd   :  { %v1766_v32 = vmul.f32 %v1085_v6, %v2835_v54  ;;  %v1314_v33 = vsub.f32 1.0, %v1313_v10  ;;  %v1553_v23 = vmul.f32 %v2281_v12, %v2948_v55  ;;  %1879 = vst.msk [vmem:[%s4119_s3 + $0xc] sm:$0xf] %vm1875_vm8, %v1814_v27  ;;  %v3012_v1 = vadd.f32 %v2637_v40, %v383_v22  ;;  %v463_v54 = vpop.f32.mrf.mxu2 }
  0xde   :  { %2286 = vpow2.f32 %v2148_v29  ;;  %v3015_v15 = vadd.f32 %v2637_v40, %v423_v25  ;;  %v2283_v26 = vpop.eup %2282  ;;  %vm1318_vm0 = vweird.f32 %v2279_v28  ;;  %vm1558_vm1 = vweird.f32 %v2281_v12 }
  0xdf   :  { %v1830_v38 = vpack.c.bf16 %v1766_v32, %v1766_v32  ;;  %v1315_v21 = vmul.f32 %v2279_v28, %v1314_v33  ;;  %v1554_v41 = vsub.f32 1.0, %v1553_v23  ;;  %v3017_v45 = vadd.f32 1.0, %v2283_v26  ;;  %vm1319_vm2 = vmor %vm1317_vm14, %vm1318_vm0 }
  0xe0   :  { %2288 = vpow2.f32 %v2164_v37  ;;  %v2117_v46 = vmul.f32 -1.442695, %v3012_v1  ;;  %v2133_v50 = vmul.f32 -1.442695, %v3015_v15  ;;  %v3026_v9 = vadd.f32 %v2637_v40, %v463_v54 }
  0xe1   :  { %v2285_v13 = vpop.eup %2284  ;;  %1895 = vst.msk [vmem:[%s4119_s3 + $0x4c] sm:$0xf] %vm1875_vm8, %v1830_v38  ;;  %v1316_v51 = vadd.f32 %v2279_v28, %v1315_v21  ;;  %v1555_v34 = vmul.f32 %v2281_v12, %v1554_v41  ;;  %vm1322_vm3 = vcmp.eq.f32.partialorder %v1321_v18, 8.507059e+37  ;;  %v1324_v52 = vor.u32 1.1754944e-38, %v1323_v19 }
  0xe2   :  { %vm1557_vm4 = vweird.f32 %v2948_v55  ;;  %2290 = vrcp.f32 %v3017_v45  ;;  %v3032_v56 = vadd.f32 1.0, %v2285_v13  ;;  %vm1562_vm6 = vcmp.eq.f32.partialorder %v1561_v62, 8.507059e+37  ;;  %v506_v22 = vpop.f32.mrf.mxu3 }
  0xe3   :  { %v1320_v16 = vsel %vm1319_vm2, %v2279_v28, %v1316_v51  ;;  %v1556_v42 = vadd.f32 %v2281_v12, %v1555_v34  ;;  %2292 = vpow2.f32 %v2117_v46  ;;  %vm1559_vm5 = vmor %vm1557_vm4, %vm1558_vm1  ;;  %v1564_v58 = vor.u32 1.1754944e-38, %v1563_v36 }
  0xe4   :  { %v2287_v57 = vpop.eup %2286  ;;  %v1325_v49 = vsel %vm1322_vm3, %v1324_v52, %v1320_v16  ;;  %2294 = vpow2.f32 %v2133_v50  ;;  %v2149_v55 = vmul.f32 -1.442695, %v3026_v9  ;;  %v856_v3 = vand.u32 2147483647, %v3017_v45 }
  0xe5   :  { %v1782_v48 = vmul.f32 %v1325_v49, %v2853_v24  ;;  %v1560_v59 = vsel %vm1559_vm5, %v2281_v12, %v1556_v42  ;;  %2296 = vrcp.f32 %v3032_v56  ;;  %v858_v4 = vand.u32 2147483648, %v3017_v45 }
  0xe6   :  { %v2289_v35 = vpop.eup %2288  ;;  %v1565_v63 = vsel %vm1562_vm6, %v1564_v58, %v1560_v59  ;;  %v3039_v2 = vadd.f32 1.0, %v2287_v57  ;;  %v1096_v53 = vand.u32 2147483647, %v3032_v56  ;;  %v1098_v7 = vand.u32 2147483648, %v3032_v56 }
  0xe7   :  { %v1846_v5 = vpack.c.bf16 %v1782_v48, %v1782_v48  ;;  %v1798_v31 = vmul.f32 %v1565_v63, %v2865_v39  ;;  %v3042_v61 = vadd.f32 1.0, %v2289_v35  ;;  %v3048_v8 = vadd.f32 %v2637_v40, %v503_v60 }
  0xe8   :  { %v2291_v24 = vpop.eup %2290  ;;  %2298 = vrcp.f32 %v3039_v2  ;;  %vm852_vm7 = vweird.f32 %v3017_v45  ;;  %vm3056_vm9 = vcmp.eq.f32.partialorder %v856_v3, 8.507059e+37  ;;  %v859_v17 = vor.u32 1.1754944e-38, %v858_v4  ;;  %v386_v4 = vpop.f32.mrf.mxu0 }
  0xe9   :  { %v2293_v43 = vpop.eup %2292  ;;  %1911 = vst.msk [vmem:[%s4119_s3 + $0x8c] sm:$0xf] %vm1875_vm8, %v1846_v5  ;;  %v1862_v11 = vpack.c.bf16 %v1798_v31, %v1798_v31  ;;  %v848_v39 = vmul.f32 %v2291_v24, %v3017_v45  ;;  %2300 = vpow2.f32 %v2149_v55  ;;  %v1336_v40 = vand.u32 2147483647, %v3039_v2 }
  0xea   :  { %v2295_v14 = vpop.eup %2294  ;;  %2302 = vrcp.f32 %v3042_v61  ;;  %vm1092_vm10 = vweird.f32 %v3032_v56  ;;  %v1338_v20 = vand.u32 2147483648, %v3039_v2  ;;  %v3068_v10 = vadd.f32 1.0, %v2293_v43 }
  0xeb   :  { %v2297_v18 = vpop.eup %2296  ;;  %1927 = vst.msk [vmem:[%s4119_s3 + $0xcc] sm:$0xf] %vm1875_vm8, %v1862_v11  ;;  %v849_v19 = vsub.f32 1.0, %v848_v39  ;;  %vm3071_vm11 = vcmp.eq.f32.partialorder %v1096_v53, 8.507059e+37  ;;  %v1099_v25 = vor.u32 1.1754944e-38, %v1098_v7  ;;  %v1578_v12 = vand.u32 2147483648, %v3042_v61  ;;  %v466_v53 = vpop.f32.mrf.mxu2 }
  0xec   :  { %v1088_v62 = vmul.f32 %v2297_v18, %v3032_v56  ;;  %vm853_vm12 = vweird.f32 %v2291_v24  ;;  %v1576_v6 = vand.u32 2147483647, %v3042_v61  ;;  %2304 = vrcp.f32 %v3068_v10 }
  0xed   :  { %v850_v27 = vmul.f32 %v2291_v24, %v849_v19  ;;  %vm1332_vm13 = vweird.f32 %v3039_v2  ;;  %v873_v33 = vand.u32 2147483648, %v3068_v10  ;;  %v3080_v23 = vadd.f32 1.0, %v2295_v14  ;;  %vm854_vm1 = vmor %vm852_vm7, %vm853_vm12 }
  0xee   :  { %v2299_v29 = vpop.eup %2298  ;;  %v1089_v32 = vsub.f32 1.0, %v1088_v62  ;;  %vm1093_vm14 = vweird.f32 %v2297_v18  ;;  %vm3083_vm15 = vcmp.eq.f32.partialorder %v1336_v40, 8.507059e+37  ;;  %v1339_v38 = vor.u32 1.1754944e-38, %v1338_v20 }
  0xef   :  { %v2301_v36 = vpop.eup %2300  ;;  %v851_v37 = vadd.f32 %v2291_v24, %v850_v27  ;;  %v1328_v54 = vmul.f32 %v2299_v29, %v3039_v2  ;;  %vm1572_vm0 = vweird.f32 %v3042_v61  ;;  %v1579_v46 = vor.u32 1.1754944e-38, %v1578_v12  ;;  %vm1094_vm5 = vmor %vm1092_vm10, %vm1093_vm14 }
  0xf0   :  { %v2303_v21 = vpop.eup %2302  ;;  %v1090_v41 = vmul.f32 %v2297_v18, %v1089_v32  ;;  %v871_v50 = vand.u32 2147483647, %v3068_v10  ;;  %2306 = vrcp.f32 %v3080_v23  ;;  %vm1333_vm2 = vweird.f32 %v2299_v29 }
  0xf1   :  { %v855_v13 = vsel %vm854_vm1, %v2291_v24, %v851_v37  ;;  %v1329_v51 = vsub.f32 1.0, %v1328_v54  ;;  %v1568_v34 = vmul.f32 %v2303_v21, %v3042_v61  ;;  %vm3094_vm3 = vcmp.eq.f32.partialorder %v1576_v6, 8.507059e+37  ;;  %v426_v24 = vpop.f32.mrf.mxu1  ;;  %v3154_v37 = vld [vmem:[%s4117_s2] ss:$0 sm:$0xff] }
  0xf2   :  { %v860_v16 = vsel %vm3056_vm9, %v859_v17, %v855_v13  ;;  %v1091_v45 = vadd.f32 %v2297_v18, %v1090_v41  ;;  %vm867_vm4 = vweird.f32 %v3068_v10  ;;  %v874_v42 = vor.u32 1.1754944e-38, %v873_v33  ;;  %v2305_v49 = vpop.eup %2304  ;;  %vm1334_vm9 = vmor %vm1332_vm13, %vm1333_vm2 }
  0xf3   :  { %v3101_v57 = vadd.f32 1.0, %v2301_v36  ;;  %v1751_v58 = vmul.f32 %v860_v16, %v2880_v47  ;;  %v1330_v48 = vmul.f32 %v2299_v29, %v1329_v51  ;;  %v1569_v59 = vsub.f32 1.0, %v1568_v34  ;;  %v468_v52 = vpop.f32.mrf.mxu2 }
  0xf4   :  { %vm1573_vm6 = vweird.f32 %v2303_v21  ;;  %v1095_v55 = vsel %vm1094_vm5, %v2297_v18, %v1091_v45  ;;  %v863_v60 = vmul.f32 %v2305_v49, %v3068_v10  ;;  %vm3108_vm7 = vcmp.eq.f32.partialorder %v871_v50, 8.507059e+37  ;;  %v388_v50 = vpop.f32.mrf.mxu0 }
  0xf5   :  { %v1111_v63 = vand.u32 2147483647, %v3080_v23  ;;  %v1113_v3 = vand.u32 2147483648, %v3080_v23  ;;  %v1815_v47 = vpack.c.bf16 %v1751_v58, %v1751_v58  ;;  %v1100_v56 = vsel %vm3071_vm11, %v1099_v25, %v1095_v55  ;;  %vm1574_vm12 = vmor %vm1572_vm0, %vm1573_vm6 }
  0xf6   :  { %v1331_v5 = vadd.f32 %v2299_v29, %v1330_v48  ;;  %v1570_v31 = vmul.f32 %v2303_v21, %v1569_v59  ;;  %v2307_v7 = vpop.eup %2306  ;;  %v1767_v43 = vmul.f32 %v1100_v56, %v2968_v0  ;;  %v864_v11 = vsub.f32 1.0, %v863_v60 }
  0xf7   :  { %vm1107_vm10 = vweird.f32 %v3080_v23  ;;  %2308 = vrcp.f32 %v3101_v57  ;;  %1880 = vst.msk [vmem:[%s4119_s3 + $0x10] sm:$0xf] %vm1875_vm8, %v1815_v47  ;;  %vm868_vm11 = vweird.f32 %v2305_v49  ;;  %v1103_v28 = vmul.f32 %v2307_v7, %v3080_v23  ;;  %v508_v47 = vpop.f32.mrf.mxu3 }
  0xf8   :  { %v1335_v39 = vsel %vm1334_vm9, %v2299_v29, %v1331_v5  ;;  %v1571_v14 = vadd.f32 %v2303_v21, %v1570_v31  ;;  %v1831_v0 = vpack.c.bf16 %v1767_v43, %v1767_v43  ;;  %v865_v17 = vmul.f32 %v2305_v49, %v864_v11 }
  0xf9   :  { %v1340_v2 = vsel %vm3083_vm15, %v1339_v38, %v1335_v39  ;;  %vm3132_vm13 = vcmp.eq.f32.partialorder %v1111_v63, 8.507059e+37  ;;  %v1104_v20 = vsub.f32 1.0, %v1103_v28  ;;  %v1114_v62 = vor.u32 1.1754944e-38, %v1113_v3  ;;  %vm869_vm15 = vmor %vm867_vm4, %vm868_vm11  ;;  %v428_v34 = vpop.f32.mrf.mxu1 }
  0xfa   :  { %v1783_v18 = vmul.f32 %v1340_v2, %v2993_v44  ;;  %v1575_v19 = vsel %vm1574_vm12, %v2303_v21, %v1571_v14  ;;  %1896 = vst.msk [vmem:[%s4119_s3 + $0x50] sm:$0xf] %vm1875_vm8, %v1831_v0  ;;  %v866_v25 = vadd.f32 %v2305_v49, %v865_v17  ;;  %vm1108_vm14 = vweird.f32 %v2307_v7 }
  0xfb   :  { %v1580_v61 = vsel %vm3094_vm3, %v1579_v46, %v1575_v19  ;;  %v2165_v12 = vmul.f32 -1.442695, %v3048_v8  ;;  %v1105_v44 = vmul.f32 %v2307_v7, %v1104_v20  ;;  %vm1347_vm0 = vweird.f32 %v3101_v57  ;;  %vm1109_vm1 = vmor %vm1107_vm10, %vm1108_vm14 }
  0xfc   :  { %v1847_v27 = vpack.c.bf16 %v1783_v18, %v1783_v18  ;;  %v1799_v6 = vmul.f32 %v1580_v61, %v3001_v30  ;;  %v1351_v29 = vand.u32 2147483647, %v3101_v57  ;;  %v870_v33 = vsel %vm869_vm15, %v2305_v49, %v866_v25  ;;  %v391_v20 = vpop.f32.mrf.mxu0 }
  0xfd   :  { %v2309_v32 = vpop.eup %2308  ;;  %v1353_v36 = vand.u32 2147483648, %v3101_v57  ;;  %2310 = vpow2.f32 %v2165_v12  ;;  %v3157_v30 = vadd.f32 %v3154_v37, %v386_v4  ;;  %v875_v54 = vsel %vm3108_vm7, %v874_v42, %v870_v33 }
  0xfe   :  { %1912 = vst.msk [vmem:[%s4119_s3 + $0x90] sm:$0xf] %vm1875_vm8, %v1847_v27  ;;  %v1863_v10 = vpack.c.bf16 %v1799_v6, %v1799_v6  ;;  %v1106_v26 = vadd.f32 %v2307_v7, %v1105_v44  ;;  %v1343_v38 = vmul.f32 %v2309_v32, %v3101_v57  ;;  %v1752_v21 = vmul.f32 %v875_v54, %v3012_v1 }
  0xff   :  { %vm1348_vm2 = vweird.f32 %v2309_v32  ;;  %v2118_v41 = vmul.f32 -1.442695, %v3157_v30  ;;  %v3172_v46 = vadd.f32 %v3154_v37, %v426_v24  ;;  %v3179_v1 = vadd.f32 %v3154_v37, %v466_v53 }
 0x100   :  { %1928 = vst.msk [vmem:[%s4119_s3 + $0xd0] sm:$0xf] %vm1875_vm8, %v1863_v10  ;;  %v1110_v13 = vsel %vm1109_vm1, %v2307_v7, %v1106_v26  ;;  %v1344_v51 = vsub.f32 1.0, %v1343_v38  ;;  %v3182_v23 = vadd.f32 %v3154_v37, %v506_v22  ;;  %v1816_v16 = vpack.c.bf16 %v1752_v21, %v1752_v21  ;;  %vm1349_vm3 = vmor %vm1347_vm0, %vm1348_vm2 }
 0x101   :  { %v1115_v45 = vsel %vm3132_vm13, %v1114_v62, %v1110_v13  ;;  %2312 = vpow2.f32 %v2118_v41  ;;  %v2134_v42 = vmul.f32 -1.442695, %v3172_v46  ;;  %v2150_v48 = vmul.f32 -1.442695, %v3179_v1  ;;  %v431_v33 = vpop.f32.mrf.mxu1 }
 0x102   :  { %v1768_v49 = vmul.f32 %v1115_v45, %v3015_v15  ;;  %v1345_v58 = vmul.f32 %v2309_v32, %v1344_v51  ;;  %v2166_v59 = vmul.f32 -1.442695, %v3182_v23  ;;  %1881 = vst.msk [vmem:[%s4119_s3 + $0x14] sm:$0xf] %vm1875_vm8, %v1816_v16  ;;  %v3195_v60 = vadd.f32 %v3154_v37, %v388_v50 }
 0x103   :  { %v2311_v55 = vpop.eup %2310  ;;  %2314 = vpow2.f32 %v2134_v42  ;;  %v3198_v35 = vadd.f32 %v3154_v37, %v428_v34  ;;  %v3201_v15 = vadd.f32 %v3154_v37, %v468_v52  ;;  %v1354_v56 = vor.u32 1.1754944e-38, %v1353_v36 }
 0x104   :  { %v1832_v63 = vpack.c.bf16 %v1768_v49, %v1768_v49  ;;  %v1346_v3 = vadd.f32 %v2309_v32, %v1345_v58  ;;  %v3203_v4 = vadd.f32 1.0, %v2311_v55  ;;  %2316 = vpow2.f32 %v2150_v48 }
 0x105   :  { %2318 = vpow2.f32 %v2166_v59  ;;  %v2119_v5 = vmul.f32 -1.442695, %v3195_v60  ;;  %vm1352_vm4 = vcmp.eq.f32.partialorder %v1351_v29, 8.507059e+37  ;;  %v2135_v7 = vmul.f32 -1.442695, %v3198_v35 }
 0x106   :  { %1897 = vst.msk [vmem:[%s4119_s3 + $0x54] sm:$0xf] %vm1875_vm8, %v1832_v63  ;;  %v1350_v31 = vsel %vm1349_vm3, %v2309_v32, %v1346_v3  ;;  %2320 = vrcp.f32 %v3203_v4  ;;  %v3216_v57 = vadd.f32 %v3154_v37, %v508_v47  ;;  %v2151_v39 = vmul.f32 -1.442695, %v3201_v15 }
 0x107   :  { %v2313_v24 = vpop.eup %2312  ;;  %v1355_v53 = vsel %vm1352_vm4, %v1354_v56, %v1350_v31  ;;  %2322 = vpow2.f32 %v2119_v5  ;;  %v1591_v2 = vand.u32 2147483647, %v3203_v4  ;;  %v1593_v17 = vand.u32 2147483648, %v3203_v4 }
 0x108   :  { %v1784_v43 = vmul.f32 %v1355_v53, %v3026_v9  ;;  %v3219_v11 = vadd.f32 1.0, %v2313_v24  ;;  %v2167_v9 = vmul.f32 -1.442695, %v3216_v57  ;;  %vm1587_vm5 = vweird.f32 %v3203_v4 }
 0x109   :  { %v2315_v14 = vpop.eup %2314  ;;  %vm3240_vm6 = vcmp.eq.f32.partialorder %v1591_v2, 8.507059e+37  ;;  %v3247_v6 = vadd.f32 %v3154_v37, %v391_v20  ;;  %v1594_v32 = vor.u32 1.1754944e-38, %v1593_v17  ;;  %v3266_v45 = vadd.f32 %v3154_v37, %v431_v33 }
 0x10a   :  { %v2317_v28 = vpop.eup %2316  ;;  %v1848_v0 = vpack.c.bf16 %v1784_v43, %v1784_v43  ;;  %2324 = vrcp.f32 %v3219_v11  ;;  %v3225_v18 = vadd.f32 1.0, %v2315_v14  ;;  %v886_v25 = vand.u32 2147483647, %v3219_v11 }
 0x10b   :  { %v2319_v40 = vpop.eup %2318  ;;  %v3227_v19 = vadd.f32 1.0, %v2317_v28  ;;  %2326 = vpow2.f32 %v2135_v7  ;;  %v888_v27 = vand.u32 2147483648, %v3219_v11  ;;  %vm882_vm7 = vweird.f32 %v3219_v11 }
 0x10c   :  { %v2321_v62 = vpop.eup %2320  ;;  %1913 = vst.msk [vmem:[%s4119_s3 + $0x94] sm:$0xf] %vm1875_vm8, %v1848_v0  ;;  %v3234_v22 = vadd.f32 1.0, %v2319_v40  ;;  %2328 = vpow2.f32 %v2151_v39  ;;  %v1126_v10 = vand.u32 2147483647, %v3225_v18  ;;  %v1128_v54 = vand.u32 2147483648, %v3225_v18 }
 0x10d   :  { %v1583_v61 = vmul.f32 %v2321_v62, %v3203_v4  ;;  %2330 = vrcp.f32 %v3225_v18  ;;  %v2323_v44 = vpop.eup %2322  ;;  %v1368_v26 = vand.u32 2147483648, %v3227_v19  ;;  %vm1588_vm9 = vweird.f32 %v2321_v62 }
 0x10e   :  { %2332 = vrcp.f32 %v3227_v19  ;;  %vm3255_vm10 = vcmp.eq.f32.partialorder %v886_v25, 8.507059e+37  ;;  %v1366_v13 = vand.u32 2147483647, %v3227_v19  ;;  %v889_v34 = vor.u32 1.1754944e-38, %v888_v27  ;;  %vm1589_vm13 = vmor %vm1587_vm5, %vm1588_vm9 }
 0x10f   :  { %v1584_v29 = vsub.f32 1.0, %v1583_v61  ;;  %2334 = vpow2.f32 %v2167_v9  ;;  %v3260_v52 = vadd.f32 1.0, %v2323_v44  ;;  %v3263_v16 = vmul.f32 -1.442695, %v3247_v6 }
 0x110   :  { %v2325_v36 = vpop.eup %2324  ;;  %2336 = vrcp.f32 %v3234_v22  ;;  %vm1122_vm11 = vweird.f32 %v3225_v18  ;;  %vm1362_vm12 = vweird.f32 %v3227_v19  ;;  %vm3274_vm15 = vcmp.eq.f32.partialorder %v1126_v10, 8.507059e+37 }
 0x111   :  { %v2327_v38 = vpop.eup %2326  ;;  %v1585_v21 = vmul.f32 %v2321_v62, %v1584_v29  ;;  %v878_v41 = vmul.f32 %v2325_v36, %v3219_v11  ;;  %vm883_vm14 = vweird.f32 %v2325_v36  ;;  %v1129_v63 = vor.u32 1.1754944e-38, %v1128_v54 }
 0x112   :  { %v2329_v51 = vpop.eup %2328  ;;  %v1369_v3 = vor.u32 1.1754944e-38, %v1368_v26  ;;  %vm3281_vm0 = vcmp.eq.f32.partialorder %v1366_v13, 8.507059e+37  ;;  %vm1602_vm1 = vweird.f32 %v3234_v22  ;;  %v1606_v4 = vand.u32 2147483647, %v3234_v22  ;;  %vm884_vm2 = vmor %vm882_vm7, %vm883_vm14 }
 0x113   :  { %v2331_v42 = vpop.eup %2330  ;;  %v1586_v49 = vadd.f32 %v2321_v62, %v1585_v21  ;;  %v879_v58 = vsub.f32 1.0, %v878_v41  ;;  %2338 = vrcp.f32 %v3260_v52  ;;  %v3290_v39 = vadd.f32 1.0, %v2327_v38 }
 0x114   :  { %v2333_v48 = vpop.eup %2332  ;;  %v1118_v59 = vmul.f32 %v2331_v42, %v3225_v18  ;;  %vm1123_vm3 = vweird.f32 %v2331_v42  ;;  %v1608_v40 = vand.u32 2147483648, %v3234_v22  ;;  %v901_v12 = vand.u32 2147483647, %v3260_v52 }
 0x115   :  { %v3278_v47 = vpop.eup %2334  ;;  %v1590_v56 = vsel %vm1589_vm13, %v2321_v62, %v1586_v49  ;;  %v880_v5 = vmul.f32 %v2325_v36, %v879_v58  ;;  %v1358_v31 = vmul.f32 %v2333_v48, %v3227_v19  ;;  %vm1363_vm4 = vweird.f32 %v2333_v48 }
 0x116   :  { %v2337_v53 = vpop.eup %2336  ;;  %v1595_v7 = vsel %vm3240_vm6, %v1594_v32, %v1590_v56  ;;  %v1119_v43 = vsub.f32 1.0, %v1118_v59  ;;  %vm1124_vm6 = vmor %vm1122_vm11, %vm1123_vm3  ;;  %2340 = vrcp.f32 %v3290_v39  ;;  %vm3312_vm9 = vcmp.eq.f32.partialorder %v1606_v4, 8.507059e+37  ;;  %v471_v56 = vpop.f32.mrf.mxu2 }
 0x117   :  { %v1800_v14 = vmul.f32 %v1595_v7, %v3048_v8  ;;  %v881_v28 = vadd.f32 %v2325_v36, %v880_v5  ;;  %v1359_v0 = vsub.f32 1.0, %v1358_v31  ;;  %v1598_v2 = vmul.f32 %v2337_v53, %v3234_v22  ;;  %vm1364_vm7 = vmor %vm1362_vm12, %vm1363_vm4 }
 0x118   :  { %v1120_v17 = vmul.f32 %v2331_v42, %v1119_v43  ;;  %vm1603_vm5 = vweird.f32 %v2337_v53  ;;  %v3316_v10 = vadd.f32 1.0, %v2329_v51  ;;  %v903_v41 = vand.u32 2147483648, %v3260_v52 }
 0x119   :  { %v1864_v9 = vpack.c.bf16 %v1800_v14, %v1800_v14  ;;  %v885_v20 = vsel %vm884_vm2, %v2325_v36, %v881_v28  ;;  %v1360_v62 = vmul.f32 %v2333_v48, %v1359_v0  ;;  %v1599_v61 = vsub.f32 1.0, %v1598_v2  ;;  %v2339_v29 = vpop.eup %2338  ;;  %v511_v28 = vpop.f32.mrf.mxu3 }
 0x11a   :  { %v890_v8 = vsel %vm3255_vm10, %v889_v34, %v885_v20  ;;  %v1121_v25 = vadd.f32 %v2331_v42, %v1120_v17  ;;  %v1609_v36 = vor.u32 1.1754944e-38, %v1608_v40  ;;  %vm1604_vm10 = vmor %vm1602_vm1, %vm1603_vm5  ;;  %v893_v19 = vmul.f32 %v2339_v29, %v3260_v52  ;;  %v393_v0 = vpop.f32.mrf.mxu0 }
 0x11b   :  { %1929 = vst.msk [vmem:[%s4119_s3 + $0xd4] sm:$0xf] %vm1875_vm8, %v1864_v9  ;;  %v1753_v11 = vmul.f32 %v890_v8, %v3157_v30  ;;  %v1361_v27 = vadd.f32 %v2333_v48, %v1360_v62  ;;  %v1600_v44 = vmul.f32 %v2337_v53, %v1599_v61  ;;  %vm897_vm11 = vweird.f32 %v3260_v52 }
 0x11c   :  { %v1125_v32 = vsel %vm1124_vm6, %v2331_v42, %v1121_v25  ;;  %vm3334_vm12 = vcmp.eq.f32.partialorder %v901_v12, 8.507059e+37  ;;  %v894_v34 = vsub.f32 1.0, %v893_v19  ;;  %2342 = vrcp.f32 %v3316_v10  ;;  %v2341_v42 = vpop.eup %2340 }
 0x11d   :  { %v1817_v30 = vpack.c.bf16 %v1753_v11, %v1753_v11  ;;  %v1130_v18 = vsel %vm3274_vm15, %v1129_v63, %v1125_v32  ;;  %v1365_v54 = vsel %vm1364_vm7, %v2333_v48, %v1361_v27  ;;  %v1601_v26 = vadd.f32 %v2337_v53, %v1600_v44  ;;  %v433_v44 = vpop.f32.mrf.mxu1 }
 0x11e   :  { %v1769_v38 = vmul.f32 %v1130_v18, %v3172_v46  ;;  %v1370_v21 = vsel %vm3281_vm0, %v1369_v3, %v1365_v54  ;;  %v1143_v48 = vand.u32 2147483648, %v3290_v39  ;;  %v895_v59 = vmul.f32 %v2339_v29, %v894_v34 }
 0x11f   :  { %1882 = vst.msk [vmem:[%s4119_s3 + $0x18] sm:$0xf] %vm1875_vm8, %v1817_v30  ;;  %v1785_v50 = vmul.f32 %v1370_v21, %v3179_v1  ;;  %v1605_v13 = vsel %vm1604_vm10, %v2337_v53, %v1601_v26  ;;  %v1141_v1 = vand.u32 2147483647, %v3290_v39  ;;  %vm898_vm13 = vweird.f32 %v2339_v29 }
 0x120   :  { %v1833_v22 = vpack.c.bf16 %v1769_v38, %v1769_v38  ;;  %v1610_v51 = vsel %vm3312_vm9, %v1609_v36, %v1605_v13  ;;  %v904_v55 = vor.u32 1.1754944e-38, %v903_v41  ;;  %v1133_v63 = vmul.f32 %v2341_v42, %v3290_v39  ;;  %vm899_vm15 = vmor %vm897_vm11, %vm898_vm13 }
 0x121   :  { %v1849_v49 = vpack.c.bf16 %v1785_v50, %v1785_v50  ;;  %v1801_v58 = vmul.f32 %v1610_v51, %v3182_v23  ;;  %vm1137_vm14 = vweird.f32 %v3290_v39  ;;  %v3355_v3 = vadd.f32 1.0, %v3278_v47  ;;  %v513_v47 = vpop.f32.mrf.mxu3 }
 0x122   :  { %1898 = vst.msk [vmem:[%s4119_s3 + $0x58] sm:$0xf] %vm1875_vm8, %v1833_v22  ;;  %2344 = vpow2.f32 %v3263_v16  ;;  %v896_v5 = vadd.f32 %v2339_v29, %v895_v59  ;;  %v1134_v31 = vsub.f32 1.0, %v1133_v63  ;;  %v1381_v24 = vand.u32 2147483647, %v3316_v10  ;;  %v2343_v53 = vpop.eup %2342 }
 0x123   :  { %1914 = vst.msk [vmem:[%s4119_s3 + $0x98] sm:$0xf] %vm1875_vm8, %v1849_v49  ;;  %v1865_v23 = vpack.c.bf16 %v1801_v58, %v1801_v58  ;;  %v2136_v4 = vmul.f32 -1.442695, %v3266_v45  ;;  %vm1138_vm0 = vweird.f32 %v2341_v42  ;;  %vm3366_vm1 = vcmp.eq.f32.partialorder %v1141_v1, 8.507059e+37 }
 0x124   :  { %v1144_v16 = vor.u32 1.1754944e-38, %v1143_v48  ;;  %2346 = vrcp.f32 %v3355_v3  ;;  %v900_v7 = vsel %vm899_vm15, %v2339_v29, %v896_v5  ;;  %v1135_v43 = vmul.f32 %v2341_v42, %v1134_v31  ;;  %vm1139_vm4 = vmor %vm1137_vm14, %vm1138_vm0 }
 0x125   :  { %1930 = vst.msk [vmem:[%s4119_s3 + $0xd8] sm:$0xf] %vm1875_vm8, %v1865_v23  ;;  %2348 = vpow2.f32 %v2136_v4  ;;  %v3372_v14 = vadd.f32 %v3154_v37, %v471_v56  ;;  %v905_v52 = vsel %vm3334_vm12, %v904_v55, %v900_v7  ;;  %v1373_v2 = vmul.f32 %v2343_v53, %v3316_v10  ;;  %v473_v23 = vpop.f32.mrf.mxu2 }
 0x126   :  { %vm1377_vm2 = vweird.f32 %v3316_v10  ;;  %v1383_v17 = vand.u32 2147483648, %v3316_v10  ;;  %v1754_v40 = vmul.f32 %v905_v52, %v3195_v60  ;;  %v1136_v9 = vadd.f32 %v2341_v42, %v1135_v43 }
 0x127   :  { %vm3380_vm3 = vcmp.eq.f32.partialorder %v1381_v24, 8.507059e+37  ;;  %v2152_v62 = vmul.f32 -1.442695, %v3372_v14  ;;  %v1374_v8 = vsub.f32 1.0, %v1373_v2  ;;  %vm1378_vm5 = vweird.f32 %v2343_v53 }
 0x128   :  { %v2345_v61 = vpop.eup %2344  ;;  %v3389_v25 = vadd.f32 %v3154_v37, %v511_v28  ;;  %v3392_v12 = vadd.f32 %v3154_v37, %v393_v0  ;;  %v1818_v60 = vpack.c.bf16 %v1754_v40, %v1754_v40  ;;  %v1140_v11 = vsel %vm1139_vm4, %v2341_v42, %v1136_v9  ;;  %vm1379_vm6 = vmor %vm1377_vm2, %vm1378_vm5 }
 0x129   :  { %v3394_v27 = vadd.f32 1.0, %v2345_v61  ;;  %2350 = vpow2.f32 %v2152_v62  ;;  %v1145_v32 = vsel %vm3366_vm1, %v1144_v16, %v1140_v11  ;;  %v1375_v39 = vmul.f32 %v2343_v53, %v1374_v8 }
 0x12a   :  { %v2347_v29 = vpop.eup %2346  ;;  %v2168_v33 = vmul.f32 -1.442695, %v3389_v25  ;;  %v2121_v36 = vmul.f32 -1.442695, %v3392_v12  ;;  %1883 = vst.msk [vmem:[%s4119_s3 + $0x1c] sm:$0xf] %vm1875_vm8, %v1818_v60  ;;  %v1770_v18 = vmul.f32 %v1145_v32, %v3198_v35  ;;  %v3410_v41 = vadd.f32 %v3154_v37, %v433_v44 }
 0x12b   :  { %v2349_v30 = vpop.eup %2348  ;;  %v1384_v54 = vor.u32 1.1754944e-38, %v1383_v17  ;;  %v1613_v26 = vmul.f32 %v2347_v29, %v3355_v3  ;;  %2352 = vrcp.f32 %v3394_v27  ;;  %v1376_v38 = vadd.f32 %v2343_v53, %v1375_v39 }
 0x12c   :  { %v1621_v21 = vand.u32 2147483647, %v3355_v3  ;;  %v1623_v19 = vand.u32 2147483648, %v3355_v3  ;;  %v1834_v50 = vpack.c.bf16 %v1770_v18, %v1770_v18  ;;  %v3415_v35 = vadd.f32 1.0, %v2349_v30  ;;  %v396_v18 = vpop.f32.mrf.mxu0 }
 0x12d   :  { %v1614_v13 = vsub.f32 1.0, %v1613_v26  ;;  %2354 = vpow2.f32 %v2168_v33  ;;  %v1380_v46 = vsel %vm1379_vm6, %v2343_v53, %v1376_v38  ;;  %v916_v22 = vand.u32 2147483647, %v3394_v27 }
 0x12e   :  { %v918_v51 = vand.u32 2147483648, %v3394_v27  ;;  %2356 = vpow2.f32 %v2121_v36  ;;  %1899 = vst.msk [vmem:[%s4119_s3 + $0x5c] sm:$0xf] %vm1875_vm8, %v1834_v50  ;;  %v1385_v10 = vsel %vm3380_vm3, %v1384_v54, %v1380_v46  ;;  %vm1618_vm7 = vweird.f32 %v2347_v29 }
 0x12f   :  { %v2351_v34 = vpop.eup %2350  ;;  %v1615_v42 = vmul.f32 %v2347_v29, %v1614_v13  ;;  %2358 = vrcp.f32 %v3415_v35  ;;  %v1786_v49 = vmul.f32 %v1385_v10, %v3201_v15  ;;  %vm1617_vm9 = vweird.f32 %v3355_v3 }
 0x130   :  { %vm3428_vm10 = vcmp.eq.f32.partialorder %v1621_v21, 8.507059e+37  ;;  %v3432_v1 = vadd.f32 1.0, %v2351_v34  ;;  %v1624_v55 = vor.u32 1.1754944e-38, %v1623_v19  ;;  %vm912_vm11 = vweird.f32 %v3394_v27  ;;  %vm1619_vm12 = vmor %vm1617_vm9, %vm1618_vm7 }
 0x131   :  { %v2353_v48 = vpop.eup %2352  ;;  %v1616_v59 = vadd.f32 %v2347_v29, %v1615_v42  ;;  %v2137_v63 = vmul.f32 -1.442695, %v3410_v41  ;;  %v1850_v56 = vpack.c.bf16 %v1786_v49, %v1786_v49  ;;  %vm3437_vm13 = vcmp.eq.f32.partialorder %v916_v22, 8.507059e+37 }
 0x132   :  { %v908_v15 = vmul.f32 %v2353_v48, %v3394_v27  ;;  %v919_v5 = vor.u32 1.1754944e-38, %v918_v51  ;;  %vm1152_vm14 = vweird.f32 %v3415_v35  ;;  %v1156_v4 = vand.u32 2147483647, %v3415_v35 }
 0x133   :  { %v2355_v31 = vpop.eup %2354  ;;  %v1620_v24 = vsel %vm1619_vm12, %v2347_v29, %v1616_v59  ;;  %2360 = vrcp.f32 %v3432_v1  ;;  %1915 = vst.msk [vmem:[%s4119_s3 + $0x9c] sm:$0xf] %vm1875_vm8, %v1850_v56  ;;  %v1158_v43 = vand.u32 2147483648, %v3415_v35  ;;  %v3452_v28 = vadd.f32 %v3154_v37, %v473_v23 }
 0x134   :  { %v2357_v16 = vpop.eup %2356  ;;  %v1625_v53 = vsel %vm3428_vm10, %v1624_v55, %v1620_v24  ;;  %v909_v7 = vsub.f32 1.0, %v908_v15  ;;  %v3455_v2 = vadd.f32 1.0, %v2355_v31  ;;  %2362 = vpow2.f32 %v2137_v63  ;;  %v436_v24 = vpop.f32.mrf.mxu1 }
 0x135   :  { %v2359_v0 = vpop.eup %2358  ;;  %v1802_v52 = vmul.f32 %v1625_v53, %v3216_v57  ;;  %v3457_v17 = vadd.f32 1.0, %v2357_v16  ;;  %vm913_vm15 = vweird.f32 %v2353_v48  ;;  %v3461_v20 = vadd.f32 %v3154_v37, %v513_v47  ;;  %v476_v53 = vpop.f32.mrf.mxu2 }
 0x136   :  { %v910_v40 = vmul.f32 %v2353_v48, %v909_v7  ;;  %v1148_v9 = vmul.f32 %v2359_v0, %v3415_v35  ;;  %v1396_v61 = vand.u32 2147483647, %v3432_v1  ;;  %v1398_v8 = vand.u32 2147483648, %v3432_v1  ;;  %vm914_vm1 = vmor %vm912_vm11, %vm913_vm15  ;;  %v516_v7 = vpop.f32.mrf.mxu3 }
 0x137   :  { %v1866_v62 = vpack.c.bf16 %v1802_v52, %v1802_v52  ;;  %2364 = vrcp.f32 %v3455_v2  ;;  %vm3466_vm0 = vcmp.eq.f32.partialorder %v1156_v4, 8.507059e+37  ;;  %v1159_v44 = vor.u32 1.1754944e-38, %v1158_v43 }
 0x138   :  { %v911_v57 = vadd.f32 %v2353_v48, %v910_v40  ;;  %v1149_v60 = vsub.f32 1.0, %v1148_v9  ;;  %vm1153_vm2 = vweird.f32 %v2359_v0  ;;  %vm1392_vm3 = vweird.f32 %v3432_v1 }
 0x139   :  { %v2361_v29 = vpop.eup %2360  ;;  %1931 = vst.msk [vmem:[%s4119_s3 + $0xdc] sm:$0xf] %vm1875_vm8, %v1866_v62  ;;  %v1638_v32 = vand.u32 2147483648, %v3455_v2  ;;  %2366 = vrcp.f32 %v3457_v17  ;;  %v1636_v30 = vand.u32 2147483647, %v3455_v2  ;;  %vm3483_vm4 = vcmp.eq.f32.partialorder %v1396_v61, 8.507059e+37  ;;  %vm1154_vm6 = vmor %vm1152_vm14, %vm1153_vm2  ;;  %v398_v62 = vpop.f32.mrf.mxu0 }
 0x13a   :  { %v915_v39 = vsel %vm914_vm1, %v2353_v48, %v911_v57  ;;  %v1150_v33 = vmul.f32 %v2359_v0, %v1149_v60  ;;  %v1388_v36 = vmul.f32 %v2361_v29, %v3432_v1  ;;  %v2363_v54 = vpop.eup %2362  ;;  %v1399_v38 = vor.u32 1.1754944e-38, %v1398_v8 }
 0x13b   :  { %v920_v26 = vsel %vm3437_vm13, %v919_v5, %v915_v39  ;;  %v931_v21 = vand.u32 2147483647, %v3457_v17  ;;  %vm1632_vm5 = vweird.f32 %v3455_v2  ;;  %v933_v46 = vand.u32 2147483648, %v3457_v17 }
 0x13c   :  { %v1755_v19 = vmul.f32 %v920_v26, %v3247_v6  ;;  %v1151_v50 = vadd.f32 %v2359_v0, %v1150_v33  ;;  %v1389_v13 = vsub.f32 1.0, %v1388_v36  ;;  %vm1393_vm7 = vweird.f32 %v2361_v29 }
 0x13d   :  { %v2365_v22 = vpop.eup %2364  ;;  %v1639_v51 = vor.u32 1.1754944e-38, %v1638_v32  ;;  %v3494_v34 = vadd.f32 1.0, %v2363_v54  ;;  %v2153_v10 = vmul.f32 -1.442695, %v3452_v28  ;;  %vm3498_vm9 = vcmp.eq.f32.partialorder %v1636_v30, 8.507059e+37  ;;  %vm1394_vm11 = vmor %vm1392_vm3, %vm1393_vm7 }
 0x13e   :  { %v1819_v42 = vpack.c.bf16 %v1755_v19, %v1755_v19  ;;  %v1155_v49 = vsel %vm1154_vm6, %v2359_v0, %v1151_v50  ;;  %v1390_v6 = vmul.f32 %v2361_v29, %v1389_v13  ;;  %v1628_v58 = vmul.f32 %v2365_v22, %v3455_v2 }
 0x13f   :  { %vm927_vm10 = vweird.f32 %v3457_v17  ;;  %v2367_v59 = vpop.eup %2366  ;;  %v1160_v35 = vsel %vm3466_vm0, %v1159_v44, %v1155_v49  ;;  %2368 = vrcp.f32 %v3494_v34  ;;  %v2169_v55 = vmul.f32 -1.442695, %v3461_v20 }
 0x140   :  { %v3508_v63 = vadd.f32 %v3154_v37, %v396_v18  ;;  %1884 = vst.msk [vmem:[%s4119_s3 + $0x20] sm:$0xf] %vm1875_vm8, %v1819_v42  ;;  %v1771_v23 = vmul.f32 %v1160_v35, %v3266_v45  ;;  %v1391_v56 = vadd.f32 %v2361_v29, %v1390_v6  ;;  %v1629_v15 = vsub.f32 1.0, %v1628_v58 }
 0x141   :  { %v923_v3 = vmul.f32 %v2367_v59, %v3457_v17  ;;  %vm1633_vm12 = vweird.f32 %v2365_v22  ;;  %vm3519_vm13 = vcmp.eq.f32.partialorder %v931_v21, 8.507059e+37  ;;  %v934_v31 = vor.u32 1.1754944e-38, %v933_v46 }
 0x142   :  { %2370 = vpow2.f32 %v2153_v10  ;;  %v1835_v4 = vpack.c.bf16 %v1771_v23, %v1771_v23  ;;  %v1395_v47 = vsel %vm1394_vm11, %v2361_v29, %v1391_v56  ;;  %v1630_v16 = vmul.f32 %v2365_v22, %v1629_v15  ;;  %vm1634_vm15 = vmor %vm1632_vm5, %vm1633_vm12 }
 0x143   :  { %v924_v45 = vsub.f32 1.0, %v923_v3  ;;  %v1400_v43 = vsel %vm3483_vm4, %v1399_v38, %v1395_v47  ;;  %vm928_vm14 = vweird.f32 %v2367_v59  ;;  %v1171_v1 = vand.u32 2147483647, %v3494_v34 }
 0x144   :  { %2372 = vpow2.f32 %v2169_v55  ;;  %1900 = vst.msk [vmem:[%s4119_s3 + $0x60] sm:$0xf] %vm1875_vm8, %v1835_v4  ;;  %v1787_v0 = vmul.f32 %v1400_v43, %v3372_v14  ;;  %v1631_v52 = vadd.f32 %v2365_v22, %v1630_v16  ;;  %v2122_v9 = vmul.f32 -1.442695, %v3508_v63  ;;  %vm929_vm0 = vmor %vm927_vm10, %vm928_vm14 }
 0x145   :  { %v925_v40 = vmul.f32 %v2367_v59, %v924_v45  ;;  %v2369_v61 = vpop.eup %2368  ;;  %v1173_v8 = vand.u32 2147483648, %v3494_v34  ;;  %v3537_v57 = vadd.f32 %v3154_v37, %v436_v24  ;;  %v3540_v60 = vadd.f32 %v3154_v37, %v476_v53 }
 0x146   :  { %v3543_v14 = vadd.f32 %v3154_v37, %v516_v7  ;;  %v1851_v11 = vpack.c.bf16 %v1787_v0, %v1787_v0  ;;  %v1635_v44 = vsel %vm1634_vm15, %v2365_v22, %v1631_v52  ;;  %v1163_v32 = vmul.f32 %v2369_v61, %v3494_v34 }
 0x147   :  { %v926_v29 = vadd.f32 %v2367_v59, %v925_v40  ;;  %v1640_v2 = vsel %vm3498_vm9, %v1639_v51, %v1635_v44  ;;  %2374 = vpow2.f32 %v2122_v9  ;;  %v2138_v33 = vmul.f32 -1.442695, %v3537_v57 }
 0x148   :  { %v2371_v39 = vpop.eup %2370  ;;  %v3553_v36 = vadd.f32 %v3154_v37, %v398_v62  ;;  %1916 = vst.msk [vmem:[%s4119_s3 + $0xa0] sm:$0xf] %vm1875_vm8, %v1851_v11  ;;  %v1803_v30 = vmul.f32 %v1640_v2, %v3389_v25  ;;  %v1164_v54 = vsub.f32 1.0, %v1163_v32  ;;  %vm1168_vm1 = vweird.f32 %v2369_v61 }
 0x149   :  { %v930_v18 = vsel %vm929_vm0, %v2367_v59, %v926_v29  ;;  %v3560_v26 = vadd.f32 1.0, %v2371_v39  ;;  %2376 = vpow2.f32 %v2138_v33  ;;  %v2154_v38 = vmul.f32 -1.442695, %v3540_v60  ;;  %v438_v59 = vpop.f32.mrf.mxu1 }
 0x14a   :  { %v2373_v27 = vpop.eup %2372  ;;  %v935_v17 = vsel %vm3519_vm13, %v934_v31, %v930_v18  ;;  %v1867_v21 = vpack.c.bf16 %v1803_v30, %v1803_v30  ;;  %v1165_v50 = vmul.f32 %v2369_v61, %v1164_v54  ;;  %v2170_v25 = vmul.f32 -1.442695, %v3543_v14  ;;  %v478_v31 = vpop.f32.mrf.mxu2 }
 0x14b   :  { %v1756_v19 = vmul.f32 %v935_v17, %v3392_v12  ;;  %2378 = vrcp.f32 %v3560_v26  ;;  %v3567_v13 = vadd.f32 1.0, %v2373_v27  ;;  %vm1167_vm2 = vweird.f32 %v3494_v34 }
 0x14c   :  { %1932 = vst.msk [vmem:[%s4119_s3 + $0xe0] sm:$0xf] %vm1875_vm8, %v1867_v21  ;;  %v1166_v22 = vadd.f32 %v2369_v61, %v1165_v50  ;;  %2380 = vpow2.f32 %v2154_v38  ;;  %vm1169_vm3 = vmor %vm1167_vm2, %vm1168_vm1  ;;  %v1174_v12 = vor.u32 1.1754944e-38, %v1173_v8  ;;  %v1411_v10 = vand.u32 2147483647, %v3560_v26 }
 0x14d   :  { %v1820_v46 = vpack.c.bf16 %v1756_v19, %v1756_v19  ;;  %v2375_v51 = vpop.eup %2374  ;;  %v1413_v42 = vand.u32 2147483648, %v3560_v26  ;;  %2382 = vrcp.f32 %v3567_v13  ;;  %vm1172_vm4 = vcmp.eq.f32.partialorder %v1171_v1, 8.507059e+37 }
 0x14e   :  { %v1170_v49 = vsel %vm1169_vm3, %v2369_v61, %v1166_v22  ;;  %v3583_v6 = vadd.f32 1.0, %v2375_v51  ;;  %v2123_v34 = vmul.f32 -1.442695, %v3553_v36  ;;  %2384 = vpow2.f32 %v2170_v25 }
 0x14f   :  { %1885 = vst.msk [vmem:[%s4119_s3 + $0x24] sm:$0xf] %vm1875_vm8, %v1820_v46  ;;  %v2377_v58 = vpop.eup %2376  ;;  %v1175_v48 = vsel %vm1172_vm4, %v1174_v12, %v1170_v49  ;;  %vm1407_vm5 = vweird.f32 %v3560_v26  ;;  %v1651_v23 = vand.u32 2147483647, %v3567_v13  ;;  %vm3591_vm6 = vcmp.eq.f32.partialorder %v1411_v10, 8.507059e+37 }
 0x150   :  { %v1772_v55 = vmul.f32 %v1175_v48, %v3410_v41  ;;  %2386 = vrcp.f32 %v3583_v6  ;;  %v1414_v3 = vor.u32 1.1754944e-38, %v1413_v42  ;;  %v1653_v5 = vand.u32 2147483648, %v3567_v13 }
 0x151   :  { %v2379_v35 = vpop.eup %2378  ;;  %vm1647_vm7 = vweird.f32 %v3567_v13  ;;  %v3597_v41 = vadd.f32 1.0, %v2377_v58  ;;  %2388 = vpow2.f32 %v2123_v34  ;;  %v3600_v47 = vadd.f32 %v3154_v37, %v438_v59 }
 0x152   :  { %v1403_v56 = vmul.f32 %v2379_v35, %v3560_v26  ;;  %v2381_v24 = vpop.eup %2380  ;;  %v1836_v4 = vpack.c.bf16 %v1772_v55, %v1772_v55  ;;  %v946_v53 = vand.u32 2147483647, %v3583_v6  ;;  %v948_v7 = vand.u32 2147483648, %v3583_v6  ;;  %v518_v55 = vpop.f32.mrf.mxu3 }
 0x153   :  { %v2383_v16 = vpop.eup %2382  ;;  %v3604_v43 = vadd.f32 1.0, %v2381_v24  ;;  %vm3611_vm9 = vcmp.eq.f32.partialorder %v1651_v23, 8.507059e+37  ;;  %2390 = vrcp.f32 %v3597_v41  ;;  %v3617_v52 = vadd.f32 %v3154_v37, %v478_v31 }
 0x154   :  { %v1404_v45 = vsub.f32 1.0, %v1403_v56  ;;  %1901 = vst.msk [vmem:[%s4119_s3 + $0x64] sm:$0xf] %vm1875_vm8, %v1836_v4  ;;  %v1643_v1 = vmul.f32 %v2383_v16, %v3567_v13  ;;  %v2385_v40 = vpop.eup %2384  ;;  %vm1408_vm10 = vweird.f32 %v2379_v35  ;;  %v1654_v62 = vor.u32 1.1754944e-38, %v1653_v5 }
 0x155   :  { %vm942_vm11 = vweird.f32 %v3583_v6  ;;  %vm1648_vm12 = vweird.f32 %v2383_v16  ;;  %2392 = vrcp.f32 %v3604_v43  ;;  %v2139_v11 = vmul.f32 -1.442695, %v3600_v47  ;;  %vm1409_vm15 = vmor %vm1407_vm5, %vm1408_vm10 }
 0x156   :  { %v1405_v9 = vmul.f32 %v2379_v35, %v1404_v45  ;;  %v2387_v61 = vpop.eup %2386  ;;  %v1644_v8 = vsub.f32 1.0, %v1643_v1  ;;  %vm3623_vm13 = vcmp.eq.f32.partialorder %v946_v53, 8.507059e+37  ;;  %v949_v37 = vor.u32 1.1754944e-38, %v948_v7  ;;  %vm1649_vm1 = vmor %vm1647_vm7, %vm1648_vm12 }
 0x157   :  { %v938_v29 = vmul.f32 %v2387_v61, %v3583_v6  ;;  %vm1182_vm14 = vweird.f32 %v3597_v41  ;;  %v2389_v39 = vpop.eup %2388  ;;  %v1186_v33 = vand.u32 2147483647, %v3597_v41  ;;  %v1188_v30 = vand.u32 2147483648, %v3597_v41 }
 0x158   :  { %v1406_v44 = vadd.f32 %v2379_v35, %v1405_v9  ;;  %v1645_v2 = vmul.f32 %v2383_v16, %v1644_v8  ;;  %v1426_v18 = vand.u32 2147483647, %v3604_v43  ;;  %vm943_vm0 = vweird.f32 %v2387_v61 }
 0x159   :  { %v939_v27 = vsub.f32 1.0, %v938_v29  ;;  %v3633_v17 = vadd.f32 1.0, %v2385_v40  ;;  %v2391_v38 = vpop.eup %2390  ;;  %v1428_v26 = vand.u32 2147483648, %v3604_v43  ;;  %2394 = vpow2.f32 %v2139_v11  ;;  %vm944_vm4 = vmor %vm942_vm11, %vm943_vm0 }
 0x15a   :  { %v1410_v54 = vsel %vm1409_vm15, %v2379_v35, %v1406_v44  ;;  %v1646_v19 = vadd.f32 %v2383_v16, %v1645_v2  ;;  %v1178_v46 = vmul.f32 %v2391_v38, %v3597_v41  ;;  %v3643_v22 = vadd.f32 1.0, %v2389_v39 }
 0x15b   :  { %v1415_v21 = vsel %vm3591_vm6, %v1414_v3, %v1410_v54  ;;  %v940_v25 = vmul.f32 %v2387_v61, %v939_v27  ;;  %v2393_v51 = vpop.eup %2392  ;;  %vm3645_vm2 = vcmp.eq.f32.partialorder %v1186_v33, 8.507059e+37  ;;  %v1189_v42 = vor.u32 1.1754944e-38, %v1188_v30  ;;  %v481_v54 = vpop.f32.mrf.mxu2 }
 0x15c   :  { %v1788_v50 = vmul.f32 %v1415_v21, %v3452_v28  ;;  %v1650_v12 = vsel %vm1649_vm1, %v2383_v16, %v1646_v19  ;;  %vm1422_vm3 = vweird.f32 %v3604_v43  ;;  %2396 = vrcp.f32 %v3633_v17  ;;  %v521_v19 = vpop.f32.mrf.mxu3 }
 0x15d   :  { %v1655_v13 = vsel %vm3611_vm9, %v1654_v62, %v1650_v12  ;;  %v941_v49 = vadd.f32 %v2387_v61, %v940_v25  ;;  %v1179_v34 = vsub.f32 1.0, %v1178_v46  ;;  %vm1183_vm5 = vweird.f32 %v2391_v38  ;;  %v401_v62 = vpop.f32.mrf.mxu0  ;;  %v3719_v25 = vld [vmem:[%s4117_s2] ss:$0 sm:$0xff] }
 0x15e   :  { %v1852_v28 = vpack.c.bf16 %v1788_v50, %v1788_v50  ;;  %v1804_v58 = vmul.f32 %v1655_v13, %v3461_v20  ;;  %v1418_v48 = vmul.f32 %v2393_v51, %v3604_v43  ;;  %vm3658_vm6 = vcmp.eq.f32.partialorder %v1426_v18, 8.507059e+37  ;;  %vm1184_vm10 = vmor %vm1182_vm14, %vm1183_vm5  ;;  %v441_v43 = vpop.f32.mrf.mxu1 }
 0x15f   :  { %v1429_v35 = vor.u32 1.1754944e-38, %v1428_v26  ;;  %v945_v23 = vsel %vm944_vm4, %v2387_v61, %v941_v49  ;;  %v1180_v20 = vmul.f32 %v2391_v38, %v1179_v34  ;;  %v1666_v56 = vand.u32 2147483647, %v3633_v17  ;;  %v2395_v6 = vpop.eup %2394 }
 0x160   :  { %1917 = vst.msk [vmem:[%s4119_s3 + $0xa4] sm:$0xf] %vm1875_vm8, %v1852_v28  ;;  %2398 = vrcp.f32 %v3643_v22  ;;  %v1868_v15 = vpack.c.bf16 %v1804_v58, %v1804_v58  ;;  %v950_v3 = vsel %vm3623_vm13, %v949_v37, %v945_v23  ;;  %v1419_v5 = vsub.f32 1.0, %v1418_v48 }
 0x161   :  { %v1668_v31 = vand.u32 2147483648, %v3633_v17  ;;  %v1757_v24 = vmul.f32 %v950_v3, %v3508_v63  ;;  %v1181_v4 = vadd.f32 %v2391_v38, %v1180_v20  ;;  %vm1423_vm7 = vweird.f32 %v2393_v51 }
 0x162   :  { %vm1662_vm9 = vweird.f32 %v3633_v17  ;;  %v2397_v16 = vpop.eup %2396  ;;  %1933 = vst.msk [vmem:[%s4119_s3 + $0xe4] sm:$0xf] %vm1875_vm8, %v1868_v15  ;;  %v1420_v45 = vmul.f32 %v2393_v51, %v1419_v5  ;;  %v961_v53 = vand.u32 2147483647, %v3643_v22  ;;  %v963_v7 = vand.u32 2147483648, %v3643_v22  ;;  %vm1424_vm13 = vmor %vm1422_vm3, %vm1423_vm7 }
 0x163   :  { %v3682_v63 = vadd.f32 1.0, %v2395_v6  ;;  %v1821_v1 = vpack.c.bf16 %v1757_v24, %v1757_v24  ;;  %v1185_v0 = vsel %vm1184_vm10, %v2391_v38, %v1181_v4  ;;  %v1658_v40 = vmul.f32 %v2397_v16, %v3633_v17 }
 0x164   :  { %vm3685_vm11 = vcmp.eq.f32.partialorder %v1666_v56, 8.507059e+37  ;;  %v1190_v41 = vsel %vm3645_vm2, %v1189_v42, %v1185_v0  ;;  %v1421_v61 = vadd.f32 %v2393_v51, %v1420_v45  ;;  %v1669_v8 = vor.u32 1.1754944e-38, %v1668_v31  ;;  %v483_v0 = vpop.f32.mrf.mxu2  ;;  %v523_v2 = vpop.f32.mrf.mxu3 }
 0x165   :  { %vm957_vm12 = vweird.f32 %v3643_v22  ;;  %v2155_v11 = vmul.f32 -1.442695, %v3617_v52  ;;  %1886 = vst.msk [vmem:[%s4119_s3 + $0x28] sm:$0xf] %vm1875_vm8, %v1821_v1  ;;  %v1773_v29 = vmul.f32 %v1190_v41, %v3537_v57  ;;  %v1659_v32 = vsub.f32 1.0, %v1658_v40  ;;  %v403_v20 = vpop.f32.mrf.mxu0 }
 0x166   :  { %v2399_v44 = vpop.eup %2398  ;;  %vm1663_vm14 = vweird.f32 %v2397_v16  ;;  %2400 = vrcp.f32 %v3682_v63  ;;  %v1425_v37 = vsel %vm1424_vm13, %v2393_v51, %v1421_v61  ;;  %vm3703_vm15 = vcmp.eq.f32.partialorder %v961_v53, 8.507059e+37  ;;  %v443_v53 = vpop.f32.mrf.mxu1 }
 0x167   :  { %v953_v39 = vmul.f32 %v2399_v44, %v3643_v22  ;;  %v964_v33 = vor.u32 1.1754944e-38, %v963_v7  ;;  %v1837_v30 = vpack.c.bf16 %v1773_v29, %v1773_v29  ;;  %v1430_v57 = vsel %vm3658_vm6, %v1429_v35, %v1425_v37  ;;  %vm1664_vm1 = vmor %vm1662_vm9, %vm1663_vm14 }
 0x168   :  { %v1660_v18 = vmul.f32 %v2397_v16, %v1659_v32  ;;  %vm958_vm0 = vweird.f32 %v2399_v44  ;;  %v1789_v27 = vmul.f32 %v1430_v57, %v3540_v60  ;;  %v1201_v21 = vand.u32 2147483647, %v3682_v63 }
 0x169   :  { %v954_v38 = vsub.f32 1.0, %v953_v39  ;;  %2402 = vpow2.f32 %v2155_v11  ;;  %1902 = vst.msk [vmem:[%s4119_s3 + $0x68] sm:$0xf] %vm1875_vm8, %v1837_v30  ;;  %v1203_v50 = vand.u32 2147483648, %v3682_v63  ;;  %v3722_v60 = vadd.f32 %v3719_v25, %v518_v55  ;;  %vm959_vm3 = vmor %vm957_vm12, %vm958_vm0 }
 0x16a   :  { %v1661_v26 = vadd.f32 %v2397_v16, %v1660_v18  ;;  %v3725_v46 = vadd.f32 %v3719_v25, %v401_v62  ;;  %v1853_v51 = vpack.c.bf16 %v1789_v27, %v1789_v27  ;;  %v3731_v10 = vadd.f32 %v3719_v25, %v441_v43 }
 0x16b   :  { %v955_v12 = vmul.f32 %v2399_v44, %v954_v38  ;;  %v3734_v42 = vadd.f32 %v3719_v25, %v481_v54  ;;  %v2171_v49 = vmul.f32 -1.442695, %v3722_v60  ;;  %v3739_v58 = vadd.f32 %v3719_v25, %v521_v19 }
 0x16c   :  { %v2401_v28 = vpop.eup %2400  ;;  %v1665_v13 = vsel %vm1664_vm1, %v2397_v16, %v1661_v26  ;;  %v2124_v34 = vmul.f32 -1.442695, %v3725_v46  ;;  %1918 = vst.msk [vmem:[%s4119_s3 + $0xa8] sm:$0xf] %vm1875_vm8, %v1853_v51  ;;  %v2140_v55 = vmul.f32 -1.442695, %v3731_v10  ;;  %v3761_v4 = vadd.f32 %v3719_v25, %v403_v20 }
 0x16d   :  { %v1670_v17 = vsel %vm3685_vm11, %v1669_v8, %v1665_v13  ;;  %v956_v48 = vadd.f32 %v2399_v44, %v955_v12  ;;  %v1193_v59 = vmul.f32 %v2401_v28, %v3682_v63  ;;  %vm1198_vm2 = vweird.f32 %v2401_v28 }
 0x16e   :  { %v1805_v35 = vmul.f32 %v1670_v17, %v3543_v14  ;;  %2404 = vpow2.f32 %v2171_v49  ;;  %v2156_v23 = vmul.f32 -1.442695, %v3734_v42  ;;  %v2172_v3 = vmul.f32 -1.442695, %v3739_v58 }
 0x16f   :  { %v2403_v56 = vpop.eup %2402  ;;  %v960_v6 = vsel %vm959_vm3, %v2399_v44, %v956_v48  ;;  %v1194_v15 = vsub.f32 1.0, %v1193_v59  ;;  %2406 = vpow2.f32 %v2124_v34  ;;  %vm1197_vm4 = vweird.f32 %v3682_v63  ;;  %v406_v48 = vpop.f32.mrf.mxu0 }
 0x170   :  { %v1869_v5 = vpack.c.bf16 %v1805_v35, %v1805_v35  ;;  %v965_v14 = vsel %vm3703_vm15, %v964_v33, %v960_v6  ;;  %v3757_v31 = vadd.f32 1.0, %v2403_v56  ;;  %2408 = vpow2.f32 %v2140_v55  ;;  %vm1199_vm5 = vmor %vm1197_vm4, %vm1198_vm2 }
 0x171   :  { %v1758_v22 = vmul.f32 %v965_v14, %v3553_v36  ;;  %v1195_v24 = vmul.f32 %v2401_v28, %v1194_v15  ;;  %2410 = vpow2.f32 %v2156_v23  ;;  %vm1202_vm6 = vcmp.eq.f32.partialorder %v1201_v21, 8.507059e+37  ;;  %v486_v15 = vpop.f32.mrf.mxu2 }
 0x172   :  { %1934 = vst.msk [vmem:[%s4119_s3 + $0xe8] sm:$0xf] %vm1875_vm8, %v1869_v5  ;;  %2412 = vrcp.f32 %v3757_v31  ;;  %v1204_v36 = vor.u32 1.1754944e-38, %v1203_v50  ;;  %v1441_v1 = vand.u32 2147483647, %v3757_v31  ;;  %v1443_v62 = vand.u32 2147483648, %v3757_v31 }
 0x173   :  { %v1822_v16 = vpack.c.bf16 %v1758_v22, %v1758_v22  ;;  %v1196_v45 = vadd.f32 %v2401_v28, %v1195_v24  ;;  %2414 = vpow2.f32 %v2172_v3  ;;  %v2125_v41 = vmul.f32 -1.442695, %v3761_v4 }
 0x174   :  { %v2405_v7 = vpop.eup %2404  ;;  %v3782_v44 = vadd.f32 %v3719_v25, %v443_v53  ;;  %v3787_v37 = vadd.f32 %v3719_v25, %v483_v0  ;;  %vm1437_vm7 = vweird.f32 %v3757_v31  ;;  %vm3792_vm9 = vcmp.eq.f32.partialorder %v1441_v1, 8.507059e+37 }
 0x175   :  { %v2407_v40 = vpop.eup %2406  ;;  %1887 = vst.msk [vmem:[%s4119_s3 + $0x2c] sm:$0xf] %vm1875_vm8, %v1822_v16  ;;  %v1200_v9 = vsel %vm1199_vm5, %v2401_v28, %v1196_v45  ;;  %v3776_v63 = vadd.f32 1.0, %v2405_v7  ;;  %v3811_v50 = vadd.f32 %v3719_v25, %v523_v2 }
 0x176   :  { %v2409_v61 = vpop.eup %2408  ;;  %v1205_v8 = vsel %vm1202_vm6, %v1204_v36, %v1200_v9  ;;  %v3779_v11 = vadd.f32 1.0, %v2407_v40  ;;  %v2141_v38 = vmul.f32 -1.442695, %v3782_v44  ;;  %v3808_v26 = vmul.f32 -1.442695, %v3787_v37 }
 0x177   :  { %v2411_v29 = vpop.eup %2410  ;;  %v1774_v32 = vmul.f32 %v1205_v8, %v3600_v47  ;;  %2416 = vrcp.f32 %v3776_v63  ;;  %v1444_v47 = vor.u32 1.1754944e-38, %v1443_v62  ;;  %v1681_v43 = vand.u32 2147483647, %v3776_v63 }
 0x178   :  { %v2413_v39 = vpop.eup %2412  ;;  %2418 = vrcp.f32 %v3779_v11  ;;  %v1683_v54 = vand.u32 2147483648, %v3776_v63  ;;  %v3798_v27 = vadd.f32 1.0, %v2409_v61  ;;  %v3805_v19 = vadd.f32 1.0, %v2411_v29 }
 0x179   :  { %v2415_v33 = vpop.eup %2414  ;;  %v1838_v30 = vpack.c.bf16 %v1774_v32, %v1774_v32  ;;  %v1433_v57 = vmul.f32 %v2413_v39, %v3757_v31  ;;  %2420 = vpow2.f32 %v2125_v41  ;;  %vm1677_vm10 = vweird.f32 %v3776_v63 }
 0x17a   :  { %v976_v51 = vand.u32 2147483647, %v3779_v11  ;;  %v978_v12 = vand.u32 2147483648, %v3779_v11  ;;  %2422 = vrcp.f32 %v3798_v27  ;;  %v3817_v28 = vadd.f32 1.0, %v2415_v33 }
 0x17b   :  { %1903 = vst.msk [vmem:[%s4119_s3 + $0x6c] sm:$0xf] %vm1875_vm8, %v1838_v30  ;;  %v1434_v21 = vsub.f32 1.0, %v1433_v57  ;;  %vm1438_vm11 = vweird.f32 %v2413_v39  ;;  %vm972_vm12 = vweird.f32 %v3779_v11  ;;  %2424 = vrcp.f32 %v3805_v19 }
 0x17c   :  { %vm3822_vm13 = vcmp.eq.f32.partialorder %v1681_v43, 8.507059e+37  ;;  %v1684_v59 = vor.u32 1.1754944e-38, %v1683_v54  ;;  %2426 = vpow2.f32 %v2141_v38  ;;  %v1216_v20 = vand.u32 2147483647, %v3798_v27  ;;  %vm1439_vm14 = vmor %vm1437_vm7, %vm1438_vm11 }
 0x17d   :  { %v2417_v13 = vpop.eup %2416  ;;  %v1435_v49 = vmul.f32 %v2413_v39, %v1434_v21  ;;  %v1218_v56 = vand.u32 2147483648, %v3798_v27  ;;  %vm3831_vm15 = vcmp.eq.f32.partialorder %v976_v51, 8.507059e+37  ;;  %v979_v3 = vor.u32 1.1754944e-38, %v978_v12 }
 0x17e   :  { %v2419_v34 = vpop.eup %2418  ;;  %v1673_v17 = vmul.f32 %v2417_v13, %v3776_v63  ;;  %2428 = vrcp.f32 %v3817_v28  ;;  %vm1678_vm0 = vweird.f32 %v2417_v13  ;;  %vm1212_vm1 = vweird.f32 %v3798_v27 }
 0x17f   :  { %v2421_v35 = vpop.eup %2420  ;;  %v1436_v55 = vadd.f32 %v2413_v39, %v1435_v49  ;;  %v968_v23 = vmul.f32 %v2419_v34, %v3779_v11  ;;  %vm973_vm2 = vweird.f32 %v2419_v34  ;;  %vm1452_vm3 = vweird.f32 %v3805_v19  ;;  %vm1679_vm5 = vmor %vm1677_vm10, %vm1678_vm0 }
 0x180   :  { %v1674_v6 = vsub.f32 1.0, %v1673_v17  ;;  %v2423_v22 = vpop.eup %2422  ;;  %v1456_v31 = vand.u32 2147483647, %v3805_v19  ;;  %vm3843_vm4 = vcmp.eq.f32.partialorder %v1216_v20, 8.507059e+37  ;;  %v1219_v0 = vor.u32 1.1754944e-38, %v1218_v56  ;;  %vm974_vm7 = vmor %vm972_vm12, %vm973_vm2 }
 0x181   :  { %v1440_v5 = vsel %vm1439_vm14, %v2413_v39, %v1436_v55  ;;  %v969_v14 = vsub.f32 1.0, %v968_v23  ;;  %v2425_v45 = vpop.eup %2424  ;;  %v1208_v36 = vmul.f32 %v2423_v22, %v3798_v27  ;;  %v1458_v41 = vand.u32 2147483648, %v3805_v19 }
 0x182   :  { %v1445_v24 = vsel %vm3792_vm9, %v1444_v47, %v1440_v5  ;;  %v1675_v16 = vmul.f32 %v2417_v13, %v1674_v6  ;;  %v2427_v40 = vpop.eup %2426  ;;  %v1448_v62 = vmul.f32 %v2425_v45, %v3805_v19  ;;  %v1696_v61 = vand.u32 2147483647, %v3817_v28  ;;  %v446_v6 = vpop.f32.mrf.mxu1 }
 0x183   :  { %v1790_v53 = vmul.f32 %v1445_v24, %v3617_v52  ;;  %v970_v7 = vmul.f32 %v2419_v34, %v969_v14  ;;  %v1209_v29 = vsub.f32 1.0, %v1208_v36  ;;  %vm1213_vm6 = vweird.f32 %v2423_v22 }
 0x184   :  { %v1676_v9 = vadd.f32 %v2417_v13, %v1675_v16  ;;  %v2429_v32 = vpop.eup %2428  ;;  %v1449_v2 = vsub.f32 1.0, %v1448_v62  ;;  %vm1453_vm9 = vweird.f32 %v2425_v45  ;;  %v3856_v33 = vadd.f32 1.0, %v2421_v35  ;;  %vm1214_vm10 = vmor %vm1212_vm1, %vm1213_vm6 }
 0x185   :  { %v1854_v8 = vpack.c.bf16 %v1790_v53, %v1790_v53  ;;  %v971_v52 = vadd.f32 %v2419_v34, %v970_v7  ;;  %v1210_v57 = vmul.f32 %v2423_v22, %v1209_v29  ;;  %v1688_v18 = vmul.f32 %v2429_v32, %v3817_v28  ;;  %vm1454_vm11 = vmor %vm1452_vm3, %vm1453_vm9 }
 0x186   :  { %v1680_v39 = vsel %vm1679_vm5, %v2417_v13, %v1676_v9  ;;  %v1450_v43 = vmul.f32 %v2425_v45, %v1449_v2  ;;  %v3868_v54 = vadd.f32 1.0, %v2427_v40  ;;  %2430 = vrcp.f32 %v3856_v33 }
 0x187   :  { %1919 = vst.msk [vmem:[%s4119_s3 + $0xac] sm:$0xf] %vm1875_vm8, %v1854_v8  ;;  %v1685_v63 = vsel %vm3822_vm13, %v1684_v59, %v1680_v39  ;;  %v975_v30 = vsel %vm974_vm7, %v2419_v34, %v971_v52  ;;  %v1211_v21 = vadd.f32 %v2423_v22, %v1210_v57  ;;  %v1689_v51 = vsub.f32 1.0, %v1688_v18 }
 0x188   :  { %v1806_v47 = vmul.f32 %v1685_v63, %v3722_v60  ;;  %v980_v11 = vsel %vm3831_vm15, %v979_v3, %v975_v30  ;;  %v1451_v13 = vadd.f32 %v2425_v45, %v1450_v43  ;;  %v1459_v49 = vor.u32 1.1754944e-38, %v1458_v41 }
 0x189   :  { %v1759_v38 = vmul.f32 %v980_v11, %v3725_v46  ;;  %v1698_v60 = vand.u32 2147483648, %v3817_v28  ;;  %v1215_v17 = vsel %vm1214_vm10, %v2423_v22, %v1211_v21  ;;  %v1690_v46 = vmul.f32 %v2429_v32, %v1689_v51 }
 0x18a   :  { %v1870_v12 = vpack.c.bf16 %v1806_v47, %v1806_v47  ;;  %vm1693_vm12 = vweird.f32 %v2429_v32  ;;  %v1220_v27 = vsel %vm3843_vm4, %v1219_v0, %v1215_v17  ;;  %v1455_v59 = vsel %vm1454_vm11, %v2425_v45, %v1451_v13  ;;  %v448_v43 = vpop.f32.mrf.mxu1 }
 0x18b   :  { %v1823_v34 = vpack.c.bf16 %v1759_v38, %v1759_v38  ;;  %vm1457_vm13 = vcmp.eq.f32.partialorder %v1456_v31, 8.507059e+37  ;;  %2432 = vrcp.f32 %v3868_v54  ;;  %v1775_v19 = vmul.f32 %v1220_v27, %v3731_v10  ;;  %v488_v38 = vpop.f32.mrf.mxu2 }
 0x18c   :  { %1935 = vst.msk [vmem:[%s4119_s3 + $0xec] sm:$0xf] %vm1875_vm8, %v1870_v12  ;;  %v1460_v35 = vsel %vm1457_vm13, %v1459_v49, %v1455_v59  ;;  %v1691_v55 = vadd.f32 %v2429_v32, %v1690_v46  ;;  %vm1692_vm14 = vweird.f32 %v3817_v28  ;;  %vm1697_vm0 = vcmp.eq.f32.partialorder %v1696_v61, 8.507059e+37  ;;  %v2431_v3 = vpop.eup %2430 }
 0x18d   :  { %1888 = vst.msk [vmem:[%s4119_s3 + $0x30] sm:$0xf] %vm1875_vm8, %v1823_v34  ;;  %v1791_v23 = vmul.f32 %v1460_v35, %v3734_v42  ;;  %vm1694_vm15 = vmor %vm1692_vm14, %vm1693_vm12  ;;  %v1699_v20 = vor.u32 1.1754944e-38, %v1698_v60  ;;  %v991_v56 = vand.u32 2147483647, %v3856_v33  ;;  %v1839_v5 = vpack.c.bf16 %v1775_v19, %v1775_v19 }
 0x18e   :  { %v1695_v14 = vsel %vm1694_vm15, %v2429_v32, %v1691_v55  ;;  %2434 = vpow2.f32 %v3808_v26  ;;  %v2173_v10 = vmul.f32 -1.442695, %v3811_v50  ;;  %v983_v28 = vmul.f32 %v2431_v3, %v3856_v33  ;;  %v408_v32 = vpop.f32.mrf.mxu0 }
 0x18f   :  { %v1855_v22 = vpack.c.bf16 %v1791_v23, %v1791_v23  ;;  %v1700_v24 = vsel %vm1697_vm0, %v1699_v20, %v1695_v14  ;;  %1904 = vst.msk [vmem:[%s4119_s3 + $0x70] sm:$0xf] %vm1875_vm8, %v1839_v5  ;;  %vm987_vm1 = vweird.f32 %v3856_v33  ;;  %v3908_v31 = vadd.f32 %v3719_v25, %v406_v48 }
 0x190   :  { %v1807_v42 = vmul.f32 %v1700_v24, %v3739_v58  ;;  %2436 = vpow2.f32 %v2173_v10  ;;  %v984_v26 = vsub.f32 1.0, %v983_v28  ;;  %v3911_v45 = vadd.f32 %v3719_v25, %v446_v6  ;;  %v526_v58 = vpop.f32.mrf.mxu3 }
 0x191   :  { %v2433_v16 = vpop.eup %2432  ;;  %1920 = vst.msk [vmem:[%s4119_s3 + $0xb0] sm:$0xf] %vm1875_vm8, %v1855_v22  ;;  %v3914_v53 = vadd.f32 %v3719_v25, %v486_v15  ;;  %vm3916_vm2 = vcmp.eq.f32.partialorder %v991_v56, 8.507059e+37  ;;  %v993_v1 = vand.u32 2147483648, %v3856_v33  ;;  %vm988_vm3 = vweird.f32 %v2431_v3 }
 0x192   :  { %v1871_v7 = vpack.c.bf16 %v1807_v42, %v1807_v42  ;;  %v1223_v0 = vmul.f32 %v2433_v16, %v3868_v54  ;;  %v985_v40 = vmul.f32 %v2431_v3, %v984_v26  ;;  %v2126_v9 = vmul.f32 -1.442695, %v3908_v31  ;;  %vm989_vm4 = vmor %vm987_vm1, %vm988_vm3 }
 0x193   :  { %v2142_v62 = vmul.f32 -1.442695, %v3911_v45  ;;  %v1231_v8 = vand.u32 2147483647, %v3868_v54  ;;  %v1233_v52 = vand.u32 2147483648, %v3868_v54  ;;  %v3931_v29 = vadd.f32 %v3719_v25, %v526_v58 }
 0x194   :  { %v2435_v41 = vpop.eup %2434  ;;  %1936 = vst.msk [vmem:[%s4119_s3 + $0xf0] sm:$0xf] %vm1875_vm8, %v1871_v7  ;;  %v1224_v61 = vsub.f32 1.0, %v1223_v0  ;;  %v986_v39 = vadd.f32 %v2431_v3, %v985_v40  ;;  %2438 = vpow2.f32 %v2126_v9  ;;  %v2158_v63 = vmul.f32 -1.442695, %v3914_v53 }
 0x195   :  { %v3933_v2 = vadd.f32 1.0, %v2435_v41  ;;  %v994_v57 = vor.u32 1.1754944e-38, %v993_v1  ;;  %vm1228_vm5 = vweird.f32 %v2433_v16  ;;  %2440 = vpow2.f32 %v2142_v62 }
 0x196   :  { %v2437_v30 = vpop.eup %2436  ;;  %v1225_v18 = vmul.f32 %v2433_v16, %v1224_v61  ;;  %v990_v47 = vsel %vm989_vm4, %v2431_v3, %v986_v39  ;;  %vm1227_vm6 = vweird.f32 %v3868_v54  ;;  %v3942_v11 = vadd.f32 %v3719_v25, %v408_v32 }
 0x197   :  { %2442 = vrcp.f32 %v3933_v2  ;;  %v995_v21 = vsel %vm3916_vm2, %v994_v57, %v990_v47  ;;  %v3946_v33 = vadd.f32 1.0, %v2437_v30  ;;  %v2174_v12 = vmul.f32 -1.442695, %v3931_v29  ;;  %vm1229_vm7 = vmor %vm1227_vm6, %vm1228_vm5 }
 0x198   :  { %v1226_v51 = vadd.f32 %v2433_v16, %v1225_v18  ;;  %v1760_v13 = vmul.f32 %v995_v21, %v3761_v4  ;;  %vm1232_vm9 = vcmp.eq.f32.partialorder %v1231_v8, 8.507059e+37  ;;  %v1234_v54 = vor.u32 1.1754944e-38, %v1233_v52  ;;  %v528_v3 = vpop.f32.mrf.mxu3 }
 0x199   :  { %2444 = vpow2.f32 %v2158_v63  ;;  %v3952_v60 = vadd.f32 %v3719_v25, %v448_v43  ;;  %v3955_v34 = vadd.f32 %v3719_v25, %v488_v38  ;;  %v1471_v27 = vand.u32 2147483647, %v3933_v2 }
 0x19a   :  { %v1230_v49 = vsel %vm1229_vm7, %v2433_v16, %v1226_v51  ;;  %2446 = vrcp.f32 %v3946_v33  ;;  %v2439_v17 = vpop.eup %2438  ;;  %v1824_v46 = vpack.c.bf16 %v1760_v13, %v1760_v13  ;;  %v2127_v4 = vmul.f32 -1.442695, %v3942_v11 }
 0x19b   :  { %v1235_v48 = vsel %vm1232_vm9, %v1234_v54, %v1230_v49  ;;  %v2441_v59 = vpop.eup %2440  ;;  %v1473_v35 = vand.u32 2147483648, %v3933_v2  ;;  %v3961_v55 = vadd.f32 1.0, %v2439_v17  ;;  %2448 = vpow2.f32 %v2174_v12 }
 0x19c   :  { %v1776_v19 = vmul.f32 %v1235_v48, %v3782_v44  ;;  %1889 = vst.msk [vmem:[%s4119_s3 + $0x34] sm:$0xf] %vm1875_vm8, %v1824_v46  ;;  %v1711_v20 = vand.u32 2147483647, %v3946_v33  ;;  %v3968_v56 = vadd.f32 1.0, %v2441_v59  ;;  %vm1467_vm10 = vweird.f32 %v3933_v2 }
 0x19d   :  { %v2443_v23 = vpop.eup %2442  ;;  %2450 = vrcp.f32 %v3961_v55  ;;  %v2143_v44 = vmul.f32 -1.442695, %v3952_v60  ;;  %vm3974_vm11 = vcmp.eq.f32.partialorder %v1471_v27, 8.507059e+37  ;;  %v1713_v10 = vand.u32 2147483648, %v3946_v33 }
 0x19e   :  { %v1840_v6 = vpack.c.bf16 %v1776_v19, %v1776_v19  ;;  %v1463_v15 = vmul.f32 %v2443_v23, %v3933_v2  ;;  %2452 = vrcp.f32 %v3968_v56  ;;  %v1474_v28 = vor.u32 1.1754944e-38, %v1473_v35 }
 0x19f   :  { %v2445_v5 = vpop.eup %2444  ;;  %vm1707_vm12 = vweird.f32 %v3946_v33  ;;  %v3986_v42 = vmul.f32 -1.442695, %v3955_v34  ;;  %vm3989_vm13 = vcmp.eq.f32.partialorder %v1711_v20, 8.507059e+37  ;;  %2454 = vpow2.f32 %v2127_v4 }
 0x1a0   :  { %v2447_v22 = vpop.eup %2446  ;;  %1905 = vst.msk [vmem:[%s4119_s3 + $0x74] sm:$0xf] %vm1875_vm8, %v1840_v6  ;;  %v1464_v24 = vsub.f32 1.0, %v1463_v15  ;;  %v3994_v58 = vadd.f32 %v3719_v25, %v528_v3  ;;  %vm1468_vm14 = vweird.f32 %v2443_v23  ;;  %v1006_v1 = vand.u32 2147483647, %v3961_v55 }
 0x1a1   :  { %v1703_v16 = vmul.f32 %v2447_v22, %v3946_v33  ;;  %v2449_v7 = vpop.eup %2448  ;;  %v3997_v0 = vadd.f32 1.0, %v2445_v5  ;;  %v1714_v9 = vor.u32 1.1754944e-38, %v1713_v10  ;;  %vm1002_vm15 = vweird.f32 %v3961_v55  ;;  %vm1469_vm1 = vmor %vm1467_vm10, %vm1468_vm14 }
 0x1a2   :  { %v1465_v36 = vmul.f32 %v2443_v23, %v1464_v24  ;;  %v1008_v62 = vand.u32 2147483648, %v3961_v55  ;;  %vm1242_vm0 = vweird.f32 %v3968_v56  ;;  %v4003_v25 = vadd.f32 1.0, %v2449_v7 }
 0x1a3   :  { %v1704_v40 = vsub.f32 1.0, %v1703_v16  ;;  %v2451_v41 = vpop.eup %2450  ;;  %2456 = vrcp.f32 %v3997_v0  ;;  %vm1708_vm2 = vweird.f32 %v2447_v22  ;;  %v1246_v39 = vand.u32 2147483647, %v3968_v56 }
 0x1a4   :  { %v1466_v61 = vadd.f32 %v2443_v23, %v1465_v36  ;;  %v2453_v8 = vpop.eup %2452  ;;  %v998_v32 = vmul.f32 %v2451_v41, %v3961_v55  ;;  %vm4009_vm3 = vcmp.eq.f32.partialorder %v1006_v1, 8.507059e+37  ;;  %v1248_v18 = vand.u32 2147483648, %v3968_v56  ;;  %vm1709_vm4 = vmor %vm1707_vm12, %vm1708_vm2 }
 0x1a5   :  { %v1705_v52 = vmul.f32 %v2447_v22, %v1704_v40  ;;  %v1238_v57 = vmul.f32 %v2453_v8, %v3968_v56  ;;  %v2455_v47 = vpop.eup %2454  ;;  %2458 = vpow2.f32 %v2143_v44  ;;  %v1009_v51 = vor.u32 1.1754944e-38, %v1008_v62 }
 0x1a6   :  { %v1470_v63 = vsel %vm1469_vm1, %v2443_v23, %v1466_v61  ;;  %v999_v38 = vsub.f32 1.0, %v998_v32  ;;  %2460 = vrcp.f32 %v4003_v25  ;;  %vm1003_vm5 = vweird.f32 %v2451_v41 }
 0x1a7   :  { %v1475_v2 = vsel %vm3974_vm11, %v1474_v28, %v1470_v63  ;;  %v1706_v43 = vadd.f32 %v2447_v22, %v1705_v52  ;;  %v1239_v12 = vsub.f32 1.0, %v1238_v57  ;;  %vm1243_vm6 = vweird.f32 %v2453_v8  ;;  %vm1004_vm9 = vmor %vm1002_vm15, %vm1003_vm5 }
 0x1a8   :  { %v1792_v21 = vmul.f32 %v1475_v2, %v3787_v37  ;;  %v1000_v54 = vmul.f32 %v2451_v41, %v999_v38  ;;  %v4023_v27 = vadd.f32 1.0, %v2455_v47  ;;  %vm4026_vm7 = vcmp.eq.f32.partialorder %v1246_v39, 8.507059e+37  ;;  %vm1244_vm10 = vmor %vm1242_vm0, %vm1243_vm6 }
 0x1a9   :  { %v1710_v13 = vsel %vm1709_vm4, %v2447_v22, %v1706_v43  ;;  %v2457_v49 = vpop.eup %2456  ;;  %v1240_v48 = vmul.f32 %v2453_v8, %v1239_v12  ;;  %v1249_v35 = vor.u32 1.1754944e-38, %v1248_v18  ;;  %v1486_v23 = vand.u32 2147483647, %v3997_v0 }
 0x1aa   :  { %v1856_v17 = vpack.c.bf16 %v1792_v21, %v1792_v21  ;;  %v1715_v46 = vsel %vm3989_vm13, %v1714_v9, %v1710_v13  ;;  %v1001_v33 = vadd.f32 %v2451_v41, %v1000_v54  ;;  %v1478_v59 = vmul.f32 %v2457_v49, %v3997_v0 }
 0x1ab   :  { %v1808_v37 = vmul.f32 %v1715_v46, %v3811_v50  ;;  %v1241_v19 = vadd.f32 %v2453_v8, %v1240_v48  ;;  %2462 = vrcp.f32 %v4023_v27  ;;  %v2459_v50 = vpop.eup %2458  ;;  %v2175_v44 = vmul.f32 -1.442695, %v3994_v58 }
 0x1ac   :  { %1921 = vst.msk [vmem:[%s4119_s3 + $0xb4] sm:$0xf] %vm1875_vm8, %v1856_v17  ;;  %v1005_v6 = vsel %vm1004_vm9, %v2451_v41, %v1001_v33  ;;  %v1479_v15 = vsub.f32 1.0, %v1478_v59  ;;  %v2461_v3 = vpop.eup %2460  ;;  %vm1483_vm11 = vweird.f32 %v2457_v49  ;;  %v1488_v14 = vand.u32 2147483648, %v3997_v0 }
 0x1ad   :  { %v1872_v20 = vpack.c.bf16 %v1808_v37, %v1808_v37  ;;  %v1010_v55 = vsel %vm4009_vm3, %v1009_v51, %v1005_v6  ;;  %v1245_v5 = vsel %vm1244_vm10, %v2453_v8, %v1241_v19  ;;  %v1718_v24 = vmul.f32 %v2461_v3, %v4003_v25 }
 0x1ae   :  { %v1761_v10 = vmul.f32 %v1010_v55, %v3908_v31  ;;  %v1250_v56 = vsel %vm4026_vm7, %v1249_v35, %v1245_v5  ;;  %v1480_v22 = vmul.f32 %v2457_v49, %v1479_v15  ;;  %vm1482_vm12 = vweird.f32 %v3997_v0 }
 0x1af   :  { %1937 = vst.msk [vmem:[%s4119_s3 + $0xf4] sm:$0xf] %vm1875_vm8, %v1872_v20  ;;  %v1777_v28 = vmul.f32 %v1250_v56, %v3911_v45  ;;  %vm4056_vm13 = vcmp.eq.f32.partialorder %v1486_v23, 8.507059e+37  ;;  %v1726_v26 = vand.u32 2147483647, %v4003_v25  ;;  %v1719_v1 = vsub.f32 1.0, %v1718_v24  ;;  %vm1484_vm14 = vmor %vm1482_vm12, %vm1483_vm11 }
 0x1b0   :  { %v1825_v7 = vpack.c.bf16 %v1761_v10, %v1761_v10  ;;  %v1481_v36 = vadd.f32 %v2457_v49, %v1480_v22  ;;  %v4061_v31 = vadd.f32 1.0, %v2459_v50  ;;  %v1489_v62 = vor.u32 1.1754944e-38, %v1488_v14 }
 0x1b1   :  { %v2463_v40 = vpop.eup %2462  ;;  %v1841_v9 = vpack.c.bf16 %v1777_v28, %v1777_v28  ;;  %v1728_v45 = vand.u32 2147483648, %v4003_v25  ;;  %2464 = vpow2.f32 %v3986_v42  ;;  %v1720_v41 = vmul.f32 %v2461_v3, %v1719_v1 }
 0x1b2   :  { %1890 = vst.msk [vmem:[%s4119_s3 + $0x38] sm:$0xf] %vm1875_vm8, %v1825_v7  ;;  %v1485_v0 = vsel %vm1484_vm14, %v2457_v49, %v1481_v36  ;;  %vm1723_vm15 = vweird.f32 %v2461_v3  ;;  %v1013_v61 = vmul.f32 %v2463_v40, %v4023_v27  ;;  %vm1722_vm0 = vweird.f32 %v4003_v25 }
 0x1b3   :  { %1906 = vst.msk [vmem:[%s4119_s3 + $0x78] sm:$0xf] %vm1875_vm8, %v1841_v9  ;;  %v1490_v8 = vsel %vm4056_vm13, %v1489_v62, %v1485_v0  ;;  %2466 = vrcp.f32 %v4061_v31  ;;  %v1721_v52 = vadd.f32 %v2461_v3, %v1720_v41  ;;  %vm1727_vm1 = vcmp.eq.f32.partialorder %v1726_v26, 8.507059e+37  ;;  %vm1724_vm2 = vmor %vm1722_vm0, %vm1723_vm15 }
 0x1b4   :  { %v1793_v42 = vmul.f32 %v1490_v8, %v3914_v53  ;;  %v1014_v32 = vsub.f32 1.0, %v1013_v61  ;;  %v1729_v39 = vor.u32 1.1754944e-38, %v1728_v45  ;;  %v1021_v63 = vand.u32 2147483647, %v4023_v27 }
 0x1b5   :  { %v1023_v30 = vand.u32 2147483648, %v4023_v27  ;;  %2468 = vpow2.f32 %v2175_v44  ;;  %v1725_v18 = vsel %vm1724_vm2, %v2461_v3, %v1721_v52  ;;  %vm1018_vm3 = vweird.f32 %v2463_v40 }
 0x1b6   :  { %v1857_v57 = vpack.c.bf16 %v1793_v42, %v1793_v42  ;;  %v1015_v47 = vmul.f32 %v2463_v40, %v1014_v32  ;;  %v1730_v25 = vsel %vm1727_vm1, %v1729_v39, %v1725_v18  ;;  %vm1017_vm4 = vweird.f32 %v4023_v27 }
 0x1b7   :  { %v2465_v2 = vpop.eup %2464  ;;  %v1809_v53 = vmul.f32 %v1730_v25, %v3931_v29  ;;  %vm1019_vm5 = vmor %vm1017_vm4, %vm1018_vm3  ;;  %v1024_v51 = vor.u32 1.1754944e-38, %v1023_v30  ;;  %vm1022_vm6 = vcmp.eq.f32.partialorder %v1021_v63, 8.507059e+37  ;;  %v1261_v27 = vand.u32 2147483647, %v4061_v31 }
 0x1b8   :  { %1922 = vst.msk [vmem:[%s4119_s3 + $0xb8] sm:$0xf] %vm1875_vm8, %v1857_v57  ;;  %v1016_v43 = vadd.f32 %v2463_v40, %v1015_v47  ;;  %v770_v38 = vadd.f32 1.0, %v2465_v2  ;;  %v1263_v37 = vand.u32 2147483648, %v4061_v31  ;;  %vm1257_vm9 = vweird.f32 %v4061_v31 }
 0x1b9   :  { %v2467_v21 = vpop.eup %2466  ;;  %v1873_v12 = vpack.c.bf16 %v1809_v53, %v1809_v53  ;;  %vm1262_vm11 = vcmp.eq.f32.partialorder %v1261_v27, 8.507059e+37 }
 0x1ba   :  { %v1020_v13 = vsel %vm1019_vm5, %v2463_v40, %v1016_v43  ;;  %v1253_v54 = vmul.f32 %v2467_v21, %v4061_v31  ;;  %2470 = vrcp.f32 %v770_v38  ;;  %vm1258_vm7 = vweird.f32 %v2467_v21 }
 0x1bb   :  { %v2469_v49 = vpop.eup %2468  ;;  %v1025_v17 = vsel %vm1022_vm6, %v1024_v51, %v1020_v13  ;;  %1938 = vst.msk [vmem:[%s4119_s3 + $0xf8] sm:$0xf] %vm1875_vm8, %v1873_v12  ;;  %vm1259_vm10 = vmor %vm1257_vm9, %vm1258_vm7  ;;  %v1503_v44 = vand.u32 2147483648, %v770_v38  ;;  %v1501_v14 = vand.u32 2147483647, %v770_v38  ;;  %vm1497_vm13 = vweird.f32 %v770_v38 }
 0x1bc   :  { %v1762_v29 = vmul.f32 %v1025_v17, %v3942_v11  ;;  %v1254_v46 = vsub.f32 1.0, %v1253_v54  ;;  %v786_v48 = vadd.f32 1.0, %v2469_v49  ;;  %v1264_v11 = vor.u32 1.1754944e-38, %v1263_v37 }
 0x1bd   :  { %v1504_v24 = vor.u32 1.1754944e-38, %v1503_v44  ;;  %vm1502_vm0 = vcmp.eq.f32.partialorder %v1501_v14, 8.507059e+37 }
 0x1be   :  { %v1826_v33 = vpack.c.bf16 %v1762_v29, %v1762_v29  ;;  %v1255_v4 = vmul.f32 %v2467_v21, %v1254_v46  ;;  %2472 = vrcp.f32 %v786_v48  ;;  %v1743_v22 = vand.u32 2147483648, %v786_v48 }
 0x1bf   :  { %vm1737_vm1 = vweird.f32 %v786_v48 }
 0x1c0   :  { %1891 = vst.msk [vmem:[%s4119_s3 + $0x3c] sm:$0xf] %vm1875_vm8, %v1826_v33  ;;  %v1256_v59 = vadd.f32 %v2467_v21, %v1255_v4  ;;  %v2471_v19 = vpop.eup %2470  ;;  %v1744_v1 = vor.u32 1.1754944e-38, %v1743_v22 }
 0x1c1   :  { %v1493_v23 = vmul.f32 %v2471_v19, %v770_v38  ;;  %vm1498_vm12 = vweird.f32 %v2471_v19 }
 0x1c2   :  { %v1260_v35 = vsel %vm1259_vm10, %v2467_v21, %v1256_v59  ;;  %vm1499_vm14 = vmor %vm1497_vm13, %vm1498_vm12 }
 0x1c3   :  { %v1265_v50 = vsel %vm1262_vm11, %v1264_v11, %v1260_v35  ;;  %v1494_v15 = vsub.f32 1.0, %v1493_v23 }
 0x1c4   :  { %v2473_v20 = vpop.eup %2472  ;;  %v1778_v6 = vmul.f32 %v1265_v50, %v3952_v60  ;;  %v1741_v60 = vand.u32 2147483647, %v786_v48 }
 0x1c5   :  { %v1733_v3 = vmul.f32 %v2473_v20, %v786_v48  ;;  %v1495_v5 = vmul.f32 %v2471_v19, %v1494_v15  ;;  %vm1738_vm15 = vweird.f32 %v2473_v20 }
 0x1c6   :  { %v1842_v55 = vpack.c.bf16 %v1778_v6, %v1778_v6  ;;  %vm1739_vm2 = vmor %vm1737_vm1, %vm1738_vm15  ;;  %vm1742_vm3 = vcmp.eq.f32.partialorder %v1741_v60, 8.507059e+37 }
 0x1c7   :  { %v1734_v10 = vsub.f32 1.0, %v1733_v3  ;;  %v1496_v56 = vadd.f32 %v2471_v19, %v1495_v5 }
 0x1c8   :  { %1907 = vst.msk [vmem:[%s4119_s3 + $0x7c] sm:$0xf] %vm1875_vm8, %v1842_v55 }
 0x1c9   :  { %v1735_v28 = vmul.f32 %v2473_v20, %v1734_v10  ;;  %v1500_v16 = vsel %vm1499_vm14, %v2471_v19, %v1496_v56 }
 0x1ca   :  { %v1505_v26 = vsel %vm1502_vm0, %v1504_v24, %v1500_v16 }
 0x1cb   :  { %v1736_v7 = vadd.f32 %v2473_v20, %v1735_v28  ;;  %v1794_v36 = vmul.f32 %v1505_v26, %v3955_v34 }
 0x1cd   :  { %v1740_v31 = vsel %vm1739_vm2, %v2473_v20, %v1736_v7  ;;  %v1858_v40 = vpack.c.bf16 %v1794_v36, %v1794_v36 }
 0x1ce   :  { %v1745_v9 = vsel %vm1742_vm3, %v1744_v1, %v1740_v31 }
 0x1cf   :  { %v1810_v62 = vmul.f32 %v1745_v9, %v3994_v58  ;;  %1923 = vst.msk [vmem:[%s4119_s3 + $0xbc] sm:$0xf] %vm1875_vm8, %v1858_v40 }
 0x1d1   :  { %v1874_v45 = vpack.c.bf16 %v1810_v62, %v1810_v62 }
 0x1d3   :  { %1939 = vst.msk [vmem:[%s4119_s3 + $0xfc] sm:$0xf] %vm1875_vm8, %v1874_v45 }

// kernel: discriminator_forward.5
= control target key start
LH: loop header
LB: loop body
LE: loop exit
PB: predicated region body
PF: predicated region fallthrough
CT: control target
= control target key end

     0   :  { %vm178_vm0 = vcmask 130048   ;;  %vm301_vm1 = vcmask 261120   ;;  %s2051_s1 = inlined_call_operand.vmem [shape: bf16[144,32], index: 1, kind: input, shape index: {}]   ;;  %s2052_s0 = inlined_call_operand.vmem [shape: bf16[128,144], index: 0, kind: input, shape index: {}]   ;;  %s2053_s3 = inlined_call_operand.vmem [shape: f32[1,32], index: 3, kind: input, shape index: {}]   ;;  %s2054_s2 = inlined_call_operand.vmem [shape: f32[1,32], index: 2, kind: input, shape index: {}]   ;;  %s2055_s4 = inlined_call_operand.vmem [shape: bf16[128,32], index: 4, kind: output, shape index: {}]  }
   0x1   :  { %v973_v0 = vld [vmem:[%s2051_s1 + $0x38] sm:$0xff]  ;;  %v974_v1 = vld [vmem:[%s2051_s1 + $0x40] sm:$0xff]  ;;  %v830_v3 = vld [vmem:[%s2052_s0 + $0x8] sm:$0xf0] }
   0x2   :  { %v950_v2 = vld [vmem:[%s2052_s0 + $0x4] sm:$0xf]  ;;  %203 = vmatpush.bf16.msra.mxu0 %v973_v0  ;;  %259 = vmatpush.bf16.msra.mxu1 %v974_v1  ;;  %v972_v5 = vld [vmem:[%s2051_s1 + $0x30] sm:$0xff]  ;;  %v971_v6 = vld [vmem:[%s2051_s1 + $0x28] sm:$0xff] }
   0x3   :  { %v833_v4 = vor.u32 %v950_v2, %v830_v3  ;;  %975 = vmatpush.bf16.msra.mxu2 %v973_v0  ;;  %983 = vmatpush.bf16.msra.mxu3 %v974_v1  ;;  %v970_v7 = vld [vmem:[%s2051_s1 + $0x20] sm:$0xff]  ;;  %v969_v8 = vld [vmem:[%s2051_s1 + $0x18] sm:$0xff]  ;;  %v952_v9 = vld [vmem:[%s2052_s0 + $0x14] sm:$0xf] }
   0x4   :  { %v838_v10 = vld [vmem:[%s2052_s0 + $0x18] sm:$0xf0]  ;;  %v960_v11 = vld [vmem:[%s2052_s0 + $0x54] sm:$0xf]  ;;  %v967_v16 = vld [vmem:[%s2051_s1 + $0x8] sm:$0xff] }
   0x5   :  { %926 = vmatmul.msk.bf16.vlgmr.msra.gmra.mxu1 %vm178_vm0, %v833_v4  ;;  %v841_v12 = vor.u32 %v952_v9, %v838_v10  ;;  %v870_v13 = vld [vmem:[%s2052_s0 + $0x58] sm:$0xf0]  ;;  %v968_v14 = vld [vmem:[%s2051_s1 + $0x10] sm:$0xff]  ;;  %v966_v17 = vld [vmem:[%s2051_s1] sm:$0xff] }
   0x6   :  { %204 = vmatpush.bf16.msra.mxu0 %v972_v5  ;;  %v873_v15 = vor.u32 %v960_v11, %v870_v13  ;;  %v828_v18 = vld [vmem:[%s2052_s0] sm:$0xf]  ;;  %v951_v19 = vld [vmem:[%s2052_s0 + $0x4] sm:$0xf0]  ;;  %v954_v24 = vld [vmem:[%s2052_s0 + $0x24] sm:$0xf] }
   0x7   :  { %976 = vmatpush.bf16.msra.mxu2 %v972_v5  ;;  %v860_v20 = vld [vmem:[%s2052_s0 + $0x40] sm:$0xf]  ;;  %v959_v21 = vld [vmem:[%s2052_s0 + $0x44] sm:$0xf0]  ;;  %v829_v22 = vor.u32 %v951_v19, %v828_v18  ;;  %v846_v25 = vld [vmem:[%s2052_s0 + $0x28] sm:$0xf0] }
   0x8   :  { %931 = vmatmul.msk.bf16.vlgmr.msra.gmra.mxu3 %vm178_vm0, %v873_v15  ;;  %v861_v23 = vor.u32 %v959_v21, %v860_v20  ;;  %v962_v26 = vld [vmem:[%s2052_s0 + $0x64] sm:$0xf]  ;;  %v849_v27 = vor.u32 %v954_v24, %v846_v25  ;;  %v878_v28 = vld [vmem:[%s2052_s0 + $0x68] sm:$0xf0]  ;;  %v836_v30 = vld [vmem:[%s2052_s0 + $0x10] sm:$0xf] }
   0x9   :  { %v881_v29 = vor.u32 %v962_v26, %v878_v28  ;;  %v953_v31 = vld [vmem:[%s2052_s0 + $0x14] sm:$0xf0]  ;;  %v868_v32 = vld [vmem:[%s2052_s0 + $0x50] sm:$0xf]  ;;  %v956_v36 = vld [vmem:[%s2052_s0 + $0x34] sm:$0xf] }
   0xa   :  { %205 = vmatpush.bf16.msra.mxu0 %v971_v6  ;;  %v961_v33 = vld [vmem:[%s2052_s0 + $0x54] sm:$0xf0]  ;;  %v837_v34 = vor.u32 %v953_v31, %v836_v30  ;;  %v854_v37 = vld [vmem:[%s2052_s0 + $0x38] sm:$0xf0]  ;;  %v964_v38 = vld [vmem:[%s2052_s0 + $0x74] sm:$0xf] }
   0xb   :  { %977 = vmatpush.bf16.msra.mxu2 %v971_v6  ;;  %v869_v35 = vor.u32 %v961_v33, %v868_v32  ;;  %v857_v39 = vor.u32 %v956_v36, %v854_v37  ;;  %v886_v40 = vld [vmem:[%s2052_s0 + $0x78] sm:$0xf0]  ;;  %v844_v42 = vld [vmem:[%s2052_s0 + $0x20] sm:$0xf]  ;;  %v955_v43 = vld [vmem:[%s2052_s0 + $0x24] sm:$0xf0] }
   0xc   :  { %v889_v41 = vor.u32 %v964_v38, %v886_v40  ;;  %v876_v44 = vld [vmem:[%s2052_s0 + $0x60] sm:$0xf]  ;;  %v963_v45 = vld [vmem:[%s2052_s0 + $0x64] sm:$0xf0]  ;;  %v845_v46 = vor.u32 %v955_v43, %v844_v42  ;;  %v958_v48 = vld [vmem:[%s2052_s0 + $0x44] sm:$0xf] }
   0xd   :  { %v877_v47 = vor.u32 %v963_v45, %v876_v44  ;;  %v862_v49 = vld [vmem:[%s2052_s0 + $0x48] sm:$0xf0]  ;;  %v852_v51 = vld [vmem:[%s2052_s0 + $0x30] sm:$0xf]  ;;  %v957_v52 = vld [vmem:[%s2052_s0 + $0x34] sm:$0xf0] }
   0xe   :  { %206 = vmatpush.bf16.msra.mxu0 %v970_v7  ;;  %v865_v50 = vor.u32 %v958_v48, %v862_v49  ;;  %v884_v53 = vld [vmem:[%s2052_s0 + $0x70] sm:$0xf]  ;;  %v965_v54 = vld [vmem:[%s2052_s0 + $0x74] sm:$0xf0]  ;;  %v853_v55 = vor.u32 %v957_v52, %v852_v51  ;;  %v1054_v51 = vmov 128.0  }
   0xf   :  { %978 = vmatpush.bf16.msra.mxu2 %v970_v7  ;;  %v885_v56 = vor.u32 %v965_v54, %v884_v53  ;;  %986 = vrcp.f32 %v1054_v51 }
  0x12   :  { %207 = vmatpush.bf16.msra.mxu0 %v969_v8 }
  0x13   :  { %979 = vmatpush.bf16.msra.mxu2 %v969_v8 }
  0x15   :  { %927 = vmatmul.msk.bf16.gmra.mxu1 %vm178_vm0, %v841_v12 }
  0x16   :  { %208 = vmatpush.bf16.msra.mxu0 %v968_v14 }
  0x17   :  { %980 = vmatpush.bf16.msra.mxu2 %v968_v14 }
  0x18   :  { %932 = vmatmul.msk.bf16.gmra.mxu3 %vm178_vm0, %v881_v29 }
  0x1a   :  { %209 = vmatpush.bf16.msra.mxu0 %v967_v16 }
  0x1b   :  { %981 = vmatpush.bf16.msra.mxu2 %v967_v16 }
  0x1e   :  { %210 = vmatpush.bf16.msra.mxu0 %v966_v17 }
  0x1f   :  { %982 = vmatpush.bf16.msra.mxu2 %v966_v17 }
  0x21   :  { %211 = vmatmul.bf16.vlgmr.msra.gmra.mxu0 %v829_v22 }
  0x22   :  { %231 = vmatmul.bf16.vlgmr.msra.gmra.mxu2 %v861_v23 }
  0x25   :  { %928 = vmatmul.msk.bf16.gmra.mxu1 %vm178_vm0, %v849_v27 }
  0x28   :  { %933 = vmatmul.msk.bf16.gmra.mxu3 %vm178_vm0, %v889_v41 }
  0x31   :  { %216 = vmatmul.bf16.gmra.mxu0 %v837_v34 }
  0x32   :  { %236 = vmatmul.bf16.gmra.mxu2 %v869_v35 }
  0x35   :  { %929 = vmatmul.msk.bf16.gmra.mxu1 %vm178_vm0, %v857_v39 }
  0x41   :  { %221 = vmatmul.bf16.gmra.mxu0 %v845_v46 }
  0x42   :  { %241 = vmatmul.bf16.gmra.mxu2 %v877_v47 }
  0x45   :  { %930 = vmatmul.msk.bf16.gmra.mxu1 %vm178_vm0, %v865_v50 }
  0x51   :  { %226 = vmatmul.bf16.gmra.mxu0 %v853_v55 }
  0x52   :  { %246 = vmatmul.bf16.gmra.mxu2 %v885_v56 }
  0x82   :  { %v261_v57 = vpop.f32.mrf.mxu1 }
  0x8a   :  { %v263_v58 = vpop.f32.mrf.mxu1 }
  0x8b   :  { %v286_v4 = vpop.f32.mrf.mxu3 }
  0x92   :  { %v266_v59 = vpop.f32.mrf.mxu1 }
  0x93   :  { %v288_v8 = vpop.f32.mrf.mxu3 }
  0x9a   :  { %v268_v60 = vpop.f32.mrf.mxu1 }
  0x9b   :  { %v291_v12 = vpop.f32.mrf.mxu3 }
  0x9e   :  { %v212_v61 = vpop.f32.mrf.mxu0 }
  0x9f   :  { %v1213_v16 = vadd.f32 %v261_v57, %v212_v61 }
  0xa1   :  { %v302_v21 = vsel %vm301_vm1, %v1213_v16, 0.0 }
  0xa2   :  { %v271_v62 = vpop.f32.mrf.mxu1 }
  0xa3   :  { %v293_v24 = vpop.f32.mrf.mxu3 }
  0xa5   :  { %v232_v63 = vpop.f32.mrf.mxu2 }
  0xa6   :  { %v214_v0 = vpop.f32.mrf.mxu0 }
  0xa7   :  { %v1211_v15 = vadd.f32 %v263_v58, %v214_v0 }
  0xa9   :  { %v303_v18 = vsel %vm301_vm1, %v1211_v15, 0.0 }
  0xaa   :  { %v273_v2 = vpop.f32.mrf.mxu1  ;;  %v304_v25 = vadd.f32 %v303_v18, %v302_v21 }
  0xab   :  { %v296_v44 = vpop.f32.mrf.mxu3 }
  0xad   :  { %v234_v1 = vpop.f32.mrf.mxu2 }
  0xae   :  { %v217_v3 = vpop.f32.mrf.mxu0 }
  0xaf   :  { %v1215_v17 = vadd.f32 %v266_v59, %v217_v3 }
  0xb1   :  { %v305_v22 = vsel %vm301_vm1, %v1215_v17, 0.0 }
  0xb2   :  { %v276_v7 = vpop.f32.mrf.mxu1  ;;  %v306_v30 = vadd.f32 %v305_v22, %v304_v25 }
  0xb5   :  { %v237_v5 = vpop.f32.mrf.mxu2 }
  0xb6   :  { %v219_v6 = vpop.f32.mrf.mxu0  ;;  %v1247_v48 = vadd.f32 %v286_v4, %v237_v5 }
  0xb7   :  { %v1219_v19 = vadd.f32 %v268_v60, %v219_v6  ;;  %v987_v60 = vpop.eup %986 }
  0xb8   :  { %v321_v55 = vsel %vm301_vm1, %v1247_v48, 0.0  ;;  %v340_v5 = vmul.f32 128.0, %v987_v60  ;;  %vm344_vm2 = vweird.f32 %v987_v60 }
  0xb9   :  { %v307_v28 = vsel %vm301_vm1, %v1219_v19, 0.0 }
  0xba   :  { %v278_v11 = vpop.f32.mrf.mxu1  ;;  %v308_v33 = vadd.f32 %v307_v28, %v306_v30 }
  0xbd   :  { %v239_v9 = vpop.f32.mrf.mxu2 }
  0xbe   :  { %v222_v10 = vpop.f32.mrf.mxu0  ;;  %v1251_v52 = vadd.f32 %v288_v8, %v239_v9 }
  0xbf   :  { %v1225_v23 = vadd.f32 %v271_v62, %v222_v10  ;;  %v341_v10 = vsub.f32 1.0, %v340_v5 }
  0xc0   :  { %v323_v58 = vsel %vm301_vm1, %v1251_v52, 0.0 }
  0xc1   :  { %v309_v31 = vsel %vm301_vm1, %v1225_v23, 0.0 }
  0xc2   :  { %v281_v20 = vpop.f32.mrf.mxu1  ;;  %v310_v35 = vadd.f32 %v309_v31, %v308_v33 }
  0xc3   :  { %v1239_v40 = vadd.f32 %v281_v20, %v232_v63  ;;  %v298_v63 = vpop.f32.mrf.mxu3 }
  0xc5   :  { %v242_v13 = vpop.f32.mrf.mxu2  ;;  %v317_v49 = vsel %vm301_vm1, %v1239_v40, 0.0 }
  0xc6   :  { %v224_v14 = vpop.f32.mrf.mxu0  ;;  %v1257_v56 = vadd.f32 %v291_v12, %v242_v13  ;;  %v342_v13 = vmul.f32 %v987_v60, %v341_v10 }
  0xc7   :  { %v1229_v29 = vadd.f32 %v273_v2, %v224_v14 }
  0xc8   :  { %v325_v0 = vsel %vm301_vm1, %v1257_v56, 0.0  ;;  %v343_v20 = vadd.f32 %v987_v60, %v342_v13 }
  0xc9   :  { %v311_v34 = vsel %vm301_vm1, %v1229_v29, 0.0 }
  0xca   :  { %v312_v37 = vadd.f32 %v311_v34, %v310_v35  ;;  %v283_v38 = vpop.f32.mrf.mxu1 }
  0xcb   :  { %v1243_v45 = vadd.f32 %v283_v38, %v234_v1 }
  0xcd   :  { %v244_v27 = vpop.f32.mrf.mxu2  ;;  %v319_v53 = vsel %vm301_vm1, %v1243_v45, 0.0 }
  0xce   :  { %v227_v26 = vpop.f32.mrf.mxu0  ;;  %v1261_v59 = vadd.f32 %v293_v24, %v244_v27  ;;  %v1275_v24 = vsel %vm344_vm2, %v987_v60, %v343_v20 }
  0xcf   :  { %v1233_v32 = vadd.f32 %v276_v7, %v227_v26 }
  0xd0   :  { %v327_v3 = vsel %vm301_vm1, %v1261_v59, 0.0 }
  0xd1   :  { %v313_v36 = vsel %vm301_vm1, %v1233_v32, 0.0 }
  0xd2   :  { %v314_v42 = vadd.f32 %v313_v36, %v312_v37 }
  0xd5   :  { %v247_v43 = vpop.f32.mrf.mxu2 }
  0xd6   :  { %v229_v39 = vpop.f32.mrf.mxu0  ;;  %v1265_v1 = vadd.f32 %v296_v44, %v247_v43 }
  0xd7   :  { %v1241_v41 = vadd.f32 %v278_v11, %v229_v39 }
  0xd8   :  { %v329_v7 = vsel %vm301_vm1, %v1265_v1, 0.0 }
  0xd9   :  { %v315_v46 = vsel %vm301_vm1, %v1241_v41, 0.0 }
  0xda   :  { %v316_v47 = vadd.f32 %v315_v46, %v314_v42 }
  0xdc   :  { %v318_v50 = vadd.f32 %v317_v49, %v316_v47 }
  0xdd   :  { %v249_v62 = vpop.f32.mrf.mxu2 }
  0xde   :  { %v320_v54 = vadd.f32 %v319_v53, %v318_v50  ;;  %v1269_v4 = vadd.f32 %v298_v63, %v249_v62 }
  0xe0   :  { %v322_v57 = vadd.f32 %v321_v55, %v320_v54  ;;  %v331_v9 = vsel %vm301_vm1, %v1269_v4, 0.0 }
  0xe2   :  { %v324_v61 = vadd.f32 %v323_v58, %v322_v57 }
  0xe4   :  { %v326_v2 = vadd.f32 %v325_v0, %v324_v61 }
  0xe6   :  { %v328_v6 = vadd.f32 %v327_v3, %v326_v2 }
  0xe8   :  { %v330_v8 = vadd.f32 %v329_v7, %v328_v6 }
  0xea   :  { %v332_v11 = vadd.f32 %v331_v9, %v330_v8 }
  0xec   :  { %v333_v12 = vrot.slane %v332_v11, 4 }
  0xee   :  { %v334_v14 = vadd.f32 %v333_v12, %v332_v11 }
  0xf0   :  { %v335_v18 = vrot.slane %v334_v14, 2 }
  0xf2   :  { %v336_v21 = vadd.f32 %v335_v18, %v334_v14 }
  0xf4   :  { %v337_v22 = vrot.slane %v336_v21, 1 }
  0xf6   :  { %v338_v25 = vadd.f32 %v337_v22, %v336_v21 }
  0xf8   :  { %v346_v26 = vmul.f32 %v1275_v24, %v338_v25 }
  0xfa   :  { %v1279_v27 = vsub.f32 %v1213_v16, %v346_v26  ;;  %v1282_v28 = vsub.f32 %v1211_v15, %v346_v26  ;;  %v1285_v30 = vsub.f32 %v1215_v17, %v346_v26  ;;  %v1288_v31 = vsub.f32 %v1219_v19, %v346_v26 }
  0xfb   :  { %v1295_v35 = vsub.f32 %v1225_v23, %v346_v26  ;;  %v1300_v15 = vsub.f32 %v1229_v29, %v346_v26  ;;  %v1307_v38 = vsub.f32 %v1233_v32, %v346_v26  ;;  %v1313_v29 = vsub.f32 %v1241_v41, %v346_v26 }
  0xfc   :  { %v363_v33 = vmul.f32 %v1279_v27, %v1279_v27  ;;  %v364_v34 = vmul.f32 %v1282_v28, %v1282_v28  ;;  %v365_v16 = vmul.f32 %v1285_v30, %v1285_v30  ;;  %v366_v17 = vmul.f32 %v1288_v31, %v1288_v31 }
  0xfd   :  { %v367_v23 = vmul.f32 %v1295_v35, %v1295_v35  ;;  %v368_v43 = vmul.f32 %v1300_v15, %v1300_v15  ;;  %v1319_v47 = vsub.f32 %v1239_v40, %v346_v26  ;;  %v369_v32 = vmul.f32 %v1307_v38, %v1307_v38 }
  0xfe   :  { %v379_v19 = vsel %vm301_vm1, %v363_v33, 0.0  ;;  %v380_v36 = vsel %vm301_vm1, %v364_v34, 0.0  ;;  %v382_v39 = vsel %vm301_vm1, %v365_v16, 0.0  ;;  %v384_v44 = vsel %vm301_vm1, %v366_v17, 0.0 }
  0xff   :  { %v381_v37 = vadd.f32 %v380_v36, %v379_v19  ;;  %v386_v49 = vsel %vm301_vm1, %v367_v23, 0.0  ;;  %v1325_v51 = vsub.f32 %v1243_v45, %v346_v26  ;;  %v370_v41 = vmul.f32 %v1313_v29, %v1313_v29 }
 0x100   :  { %v388_v53 = vsel %vm301_vm1, %v368_v43, 0.0  ;;  %v1331_v55 = vsub.f32 %v1247_v48, %v346_v26  ;;  %v371_v40 = vmul.f32 %v1319_v47, %v1319_v47  ;;  %v390_v57 = vsel %vm301_vm1, %v369_v32, 0.0  ;;  %v417_v32 = vld [vmem:[%s2054_s2] sm:$0x1] }
 0x101   :  { %v383_v42 = vadd.f32 %v382_v39, %v381_v37  ;;  %v1337_v60 = vsub.f32 %v1251_v52, %v346_v26  ;;  %v372_v45 = vmul.f32 %v1325_v51, %v1325_v51  ;;  %v392_v61 = vsel %vm301_vm1, %v370_v41, 0.0 }
 0x102   :  { %v1343_v63 = vsub.f32 %v1257_v56, %v346_v26  ;;  %v373_v48 = vmul.f32 %v1331_v55, %v1331_v55  ;;  %v394_v0 = vsel %vm301_vm1, %v371_v40, 0.0  ;;  %v1349_v3 = vsub.f32 %v1261_v59, %v346_v26 }
 0x103   :  { %v385_v46 = vadd.f32 %v384_v44, %v383_v42  ;;  %v374_v52 = vmul.f32 %v1337_v60, %v1337_v60  ;;  %v396_v5 = vsel %vm301_vm1, %v372_v45, 0.0  ;;  %v1355_v7 = vsub.f32 %v1265_v1, %v346_v26 }
 0x104   :  { %v375_v56 = vmul.f32 %v1343_v63, %v1343_v63  ;;  %v398_v8 = vsel %vm301_vm1, %v373_v48, 0.0  ;;  %v1361_v10 = vsub.f32 %v1269_v4, %v346_v26  ;;  %v376_v59 = vmul.f32 %v1349_v3, %v1349_v3 }
 0x105   :  { %v387_v50 = vadd.f32 %v386_v49, %v385_v46  ;;  %v400_v11 = vsel %vm301_vm1, %v374_v52, 0.0  ;;  %v377_v13 = vmul.f32 %v1355_v7, %v1355_v7 }
 0x106   :  { %v402_v1 = vsel %vm301_vm1, %v375_v56, 0.0  ;;  %v378_v18 = vmul.f32 %v1361_v10, %v1361_v10  ;;  %v404_v20 = vsel %vm301_vm1, %v376_v59, 0.0 }
 0x107   :  { %v389_v54 = vadd.f32 %v388_v53, %v387_v50  ;;  %v406_v4 = vsel %vm301_vm1, %v377_v13, 0.0 }
 0x108   :  { %v408_v25 = vsel %vm301_vm1, %v378_v18, 0.0 }
 0x109   :  { %v391_v58 = vadd.f32 %v390_v57, %v389_v54  ;;  %v1382_v54 = vld [vmem:[%s2053_s3] ss:$0 sm:$0xff] }
 0x10b   :  { %v393_v62 = vadd.f32 %v392_v61, %v391_v58 }
 0x10d   :  { %v395_v2 = vadd.f32 %v394_v0, %v393_v62 }
 0x10f   :  { %v397_v6 = vadd.f32 %v396_v5, %v395_v2 }
 0x111   :  { %v399_v9 = vadd.f32 %v398_v8, %v397_v6 }
 0x113   :  { %v401_v12 = vadd.f32 %v400_v11, %v399_v9 }
 0x115   :  { %v403_v14 = vadd.f32 %v402_v1, %v401_v12 }
 0x117   :  { %v405_v21 = vadd.f32 %v404_v20, %v403_v14 }
 0x119   :  { %v407_v22 = vadd.f32 %v406_v4, %v405_v21 }
 0x11b   :  { %v409_v26 = vadd.f32 %v408_v25, %v407_v22 }
 0x11d   :  { %v410_v33 = vrot.slane %v409_v26, 4 }
 0x11f   :  { %v411_v34 = vadd.f32 %v410_v33, %v409_v26 }
 0x121   :  { %v412_v16 = vrot.slane %v411_v34, 2 }
 0x123   :  { %v413_v17 = vadd.f32 %v412_v16, %v411_v34 }
 0x125   :  { %v414_v19 = vrot.slane %v413_v17, 1 }
 0x127   :  { %v415_v36 = vadd.f32 %v414_v19, %v413_v17 }
 0x129   :  { %v416_v37 = vmul.f32 %v415_v36, %v1275_v24 }
 0x12b   :  { %v418_v23 = vadd.f32 1e-05, %v416_v37 }
 0x12d   :  { %988 = vrsqrt.f32 %v418_v23  ;;  %vm425_vm4 = vweird.f32 %v418_v23 }
 0x133   :  { %v989_v39 = vpop.eup %988 }
 0x134   :  { %v420_v42 = vmul.f32 %v989_v39, %v418_v23  ;;  %vm426_vm3 = vweird.f32 %v989_v39 }
 0x135   :  { %vm427_vm5 = vmor %vm425_vm4, %vm426_vm3 }
 0x136   :  { %v421_v43 = vmul.f32 %v989_v39, %v420_v42 }
 0x138   :  { %v422_v44 = vmul.f32 0.5, %v421_v43 }
 0x13a   :  { %v423_v46 = vsub.f32 1.5, %v422_v44 }
 0x13c   :  { %v424_v49 = vmul.f32 %v989_v39, %v423_v46 }
 0x13e   :  { %v428_v50 = vsel %vm427_vm5, %v989_v39, %v424_v49 }
 0x13f   :  { %v429_v41 = vmul.f32 %v428_v50, %v417_v32 }
 0x141   :  { %v431_v53 = vperm.slane %v429_v41, 0 }
 0x143   :  { %v433_v24 = vmul.f32 %v431_v53, %v1279_v27  ;;  %v434_v40 = vmul.f32 %v431_v53, %v1282_v28  ;;  %v435_v57 = vmul.f32 %v431_v53, %v1285_v30  ;;  %v436_v58 = vmul.f32 %v431_v53, %v1288_v31 }
 0x144   :  { %v437_v45 = vmul.f32 %v431_v53, %v1295_v35  ;;  %v438_v62 = vmul.f32 %v431_v53, %v1300_v15  ;;  %v439_v48 = vmul.f32 %v431_v53, %v1307_v38  ;;  %v440_v30 = vmul.f32 %v431_v53, %v1313_v29 }
 0x145   :  { %v1389_v61 = vadd.f32 %v1382_v54, %v433_v24  ;;  %v1393_v27 = vadd.f32 %v1382_v54, %v434_v40  ;;  %v1397_v0 = vadd.f32 %v1382_v54, %v435_v57  ;;  %v1400_v28 = vadd.f32 %v1382_v54, %v436_v58 }
 0x146   :  { %v1404_v31 = vadd.f32 %v1382_v54, %v437_v45  ;;  %v441_v15 = vmul.f32 %v431_v53, %v1319_v47  ;;  %v1409_v2 = vadd.f32 %v1382_v54, %v438_v62  ;;  %v442_v52 = vmul.f32 %v431_v53, %v1325_v51 }
 0x147   :  { %v934_v35 = vmul.f32 -1.442695, %v1389_v61  ;;  %v935_v38 = vmul.f32 -1.442695, %v1393_v27  ;;  %v1414_v5 = vadd.f32 %v1382_v54, %v439_v48  ;;  %v936_v6 = vmul.f32 -1.442695, %v1397_v0 }
 0x148   :  { %v443_v29 = vmul.f32 %v431_v53, %v1331_v55  ;;  %v937_v56 = vmul.f32 -1.442695, %v1400_v28  ;;  %v444_v8 = vmul.f32 %v431_v53, %v1337_v60  ;;  %v1421_v47 = vadd.f32 %v1382_v54, %v440_v30 }
 0x149   :  { %990 = vpow2.f32 %v934_v35  ;;  %v938_v9 = vmul.f32 -1.442695, %v1404_v31  ;;  %v1425_v59 = vadd.f32 %v1382_v54, %v441_v15  ;;  %v939_v51 = vmul.f32 -1.442695, %v1409_v2 }
 0x14a   :  { %992 = vpow2.f32 %v935_v38  ;;  %v1429_v11 = vadd.f32 %v1382_v54, %v442_v52  ;;  %v940_v55 = vmul.f32 -1.442695, %v1414_v5  ;;  %v1433_v60 = vadd.f32 %v1382_v54, %v443_v29 }
 0x14b   :  { %994 = vpow2.f32 %v936_v6  ;;  %v1436_v12 = vadd.f32 %v1382_v54, %v444_v8  ;;  %v941_v13 = vmul.f32 -1.442695, %v1421_v47  ;;  %v942_v1 = vmul.f32 -1.442695, %v1425_v59 }
 0x14c   :  { %996 = vpow2.f32 %v937_v56  ;;  %v943_v18 = vmul.f32 -1.442695, %v1429_v11  ;;  %v944_v21 = vmul.f32 -1.442695, %v1433_v60  ;;  %v445_v22 = vmul.f32 %v431_v53, %v1343_v63 }
 0x14d   :  { %998 = vpow2.f32 %v938_v9  ;;  %v945_v25 = vmul.f32 -1.442695, %v1436_v12  ;;  %v446_v33 = vmul.f32 %v431_v53, %v1349_v3  ;;  %v447_v17 = vmul.f32 %v431_v53, %v1355_v7 }
 0x14e   :  { %1000 = vpow2.f32 %v939_v51  ;;  %v448_v23 = vmul.f32 %v431_v53, %v1361_v10  ;;  %v1454_v39 = vadd.f32 %v1382_v54, %v445_v22 }
 0x14f   :  { %v991_v14 = vpop.eup %990  ;;  %1002 = vpow2.f32 %v940_v55  ;;  %v1459_v42 = vadd.f32 %v1382_v54, %v446_v33  ;;  %v1465_v44 = vadd.f32 %v1382_v54, %v447_v17 }
 0x150   :  { %v993_v20 = vpop.eup %992  ;;  %1004 = vpow2.f32 %v941_v13  ;;  %v1445_v34 = vadd.f32 1.0, %v991_v14  ;;  %v1474_v50 = vadd.f32 %v1382_v54, %v448_v23  ;;  %v946_v41 = vmul.f32 -1.442695, %v1454_v39 }
 0x151   :  { %v995_v4 = vpop.eup %994  ;;  %1006 = vpow2.f32 %v942_v1  ;;  %v1448_v19 = vadd.f32 1.0, %v993_v20  ;;  %2058 = vst [vmem:[#allocation2_spill] sm:$0xff] %v1465_v44  ;;  %v947_v24 = vmul.f32 -1.442695, %v1459_v42  ;;  %v948_v57 = vmul.f32 -1.442695, %v1465_v44 }
 0x152   :  { %v997_v26 = vpop.eup %996  ;;  %1008 = vpow2.f32 %v943_v18  ;;  %v1450_v37 = vadd.f32 1.0, %v995_v4  ;;  %2059 = vst [vmem:[#allocation3_spill] sm:$0xff] %v1474_v50  ;;  %v949_v45 = vmul.f32 -1.442695, %v1474_v50  ;;  %v544_v62 = vand.u32 2147483648, %v1445_v34 }
 0x153   :  { %v999_v16 = vpop.eup %998  ;;  %1010 = vpow2.f32 %v944_v21  ;;  %v1456_v3 = vadd.f32 1.0, %v997_v26  ;;  %v559_v30 = vand.u32 2147483648, %v1448_v19  ;;  %v542_v52 = vand.u32 2147483647, %v1445_v34 }
 0x154   :  { %v1001_v36 = vpop.eup %1000  ;;  %1012 = vpow2.f32 %v945_v25  ;;  %v1461_v7 = vadd.f32 1.0, %v999_v16  ;;  %v557_v29 = vand.u32 2147483647, %v1448_v19  ;;  %v1504_v8 = vor.u32 1.1754944e-38, %v544_v62 }
 0x155   :  { %v1003_v63 = vpop.eup %1002  ;;  %1014 = vrcp.f32 %v1445_v34  ;;  %v1467_v46 = vadd.f32 1.0, %v1001_v36  ;;  %v574_v51 = vand.u32 2147483648, %v1450_v37  ;;  %v1513_v1 = vor.u32 1.1754944e-38, %v559_v30 }
 0x156   :  { %v1005_v43 = vpop.eup %1004  ;;  %1016 = vrcp.f32 %v1448_v19  ;;  %v1470_v32 = vadd.f32 1.0, %v1003_v63  ;;  %v572_v14 = vand.u32 2147483647, %v1450_v37  ;;  %v589_v22 = vand.u32 2147483648, %v1456_v3 }
 0x157   :  { %v1007_v10 = vpop.eup %1006  ;;  %1018 = vrcp.f32 %v1450_v37  ;;  %v1511_v13 = vadd.f32 1.0, %v1005_v43  ;;  %v587_v17 = vand.u32 2147483647, %v1456_v3  ;;  %vm538_vm6 = vweird.f32 %v1445_v34 }
 0x158   :  { %v1009_v49 = vpop.eup %1008  ;;  %1020 = vrcp.f32 %v1456_v3  ;;  %v1518_v21 = vadd.f32 1.0, %v1007_v10  ;;  %v1531_v10 = vor.u32 1.1754944e-38, %v574_v51  ;;  %vm553_vm7 = vweird.f32 %v1448_v19 }
 0x159   :  { %v1011_v53 = vpop.eup %1010  ;;  %1022 = vrcp.f32 %v1461_v7  ;;  %v1520_v4 = vadd.f32 1.0, %v1009_v49  ;;  %vm568_vm8 = vweird.f32 %v1450_v37  ;;  %v1544_v30 = vor.u32 1.1754944e-38, %v589_v22 }
 0x15a   :  { %v1013_v40 = vpop.eup %1012  ;;  %1024 = vrcp.f32 %v1467_v46  ;;  %v1528_v23 = vadd.f32 1.0, %v1011_v53  ;;  %vm583_vm9 = vweird.f32 %v1456_v3  ;;  %vm1558_vm11 = vcmp.eq.f32.partialorder %v542_v52, 8.507059e+37 }
 0x15b   :  { %v1482_v58 = vpop.eup %1014  ;;  %1026 = vrcp.f32 %v1470_v32  ;;  %vm1562_vm12 = vcmp.eq.f32.partialorder %v557_v29, 8.507059e+37  ;;  %vm1572_vm15 = vcmp.eq.f32.partialorder %v572_v14, 8.507059e+37  ;;  %vm1582_vm2 = vcmp.eq.f32.partialorder %v587_v17, 8.507059e+37 }
 0x15c   :  { %v1485_v54 = vpop.eup %1016  ;;  %1028 = vpow2.f32 %v946_v41  ;;  %v534_v38 = vmul.f32 %v1482_v58, %v1445_v34  ;;  %v1535_v41 = vadd.f32 1.0, %v1013_v40  ;;  %vm539_vm14 = vweird.f32 %v1482_v58 }
 0x15d   :  { %v1489_v48 = vpop.eup %1018  ;;  %1030 = vpow2.f32 %v947_v24  ;;  %v549_v6 = vmul.f32 %v1485_v54, %v1448_v19  ;;  %vm554_vm1 = vweird.f32 %v1485_v54  ;;  %vm1599_vm5 = vmor %vm538_vm6, %vm539_vm14 }
 0x15e   :  { %v1492_v35 = vpop.eup %1020  ;;  %1032 = vpow2.f32 %v948_v57  ;;  %v564_v9 = vmul.f32 %v1489_v48, %v1450_v37  ;;  %v535_v33 = vsub.f32 1.0, %v534_v38  ;;  %vm569_vm3 = vweird.f32 %v1489_v48  ;;  %vm1617_vm6 = vmor %vm553_vm7, %vm554_vm1 }
 0x15f   :  { %v1494_v15 = vpop.eup %1022  ;;  %1034 = vpow2.f32 %v949_v45  ;;  %v579_v18 = vmul.f32 %v1492_v35, %v1456_v3  ;;  %v550_v16 = vsub.f32 1.0, %v549_v6  ;;  %v604_v45 = vand.u32 2147483648, %v1461_v7  ;;  %vm1635_vm7 = vmor %vm568_vm8, %vm569_vm3 }
 0x160   :  { %v1502_v56 = vpop.eup %1024  ;;  %v594_v25 = vmul.f32 %v1494_v15, %v1461_v7  ;;  %v565_v43 = vsub.f32 1.0, %v564_v9  ;;  %v602_v6 = vand.u32 2147483647, %v1461_v7  ;;  %v536_v40 = vmul.f32 %v1482_v58, %v535_v33 }
 0x161   :  { %v1509_v55 = vpop.eup %1026  ;;  %v609_v36 = vmul.f32 %v1502_v56, %v1467_v46  ;;  %v580_v57 = vsub.f32 1.0, %v579_v18  ;;  %v551_v51 = vmul.f32 %v1485_v54, %v550_v16  ;;  %1036 = vrcp.f32 %v1511_v13 }
 0x162   :  { %v1029_v20 = vpop.eup %1028  ;;  %v624_v49 = vmul.f32 %v1509_v55, %v1470_v32  ;;  %v595_v38 = vsub.f32 1.0, %v594_v25  ;;  %1038 = vrcp.f32 %v1518_v21  ;;  %v537_v29 = vadd.f32 %v1482_v58, %v536_v40 }
 0x163   :  { %v1031_v26 = vpop.eup %1030  ;;  %v1537_v24 = vadd.f32 1.0, %v1029_v20  ;;  %v610_v18 = vsub.f32 1.0, %v609_v36  ;;  %v566_v20 = vmul.f32 %v1489_v48, %v565_v43  ;;  %v581_v16 = vmul.f32 %v1492_v35, %v580_v57 }
 0x164   :  { %v1033_v63 = vpop.eup %1032  ;;  %v1541_v53 = vadd.f32 1.0, %v1031_v26  ;;  %v617_v26 = vand.u32 2147483647, %v1467_v46  ;;  %v625_v22 = vsub.f32 1.0, %v624_v49  ;;  %v1567_v36 = vor.u32 1.1754944e-38, %v604_v45 }
 0x165   :  { %v1035_v62 = vpop.eup %1034  ;;  %v1547_v9 = vadd.f32 1.0, %v1033_v63  ;;  %v619_v43 = vand.u32 2147483648, %v1467_v46  ;;  %v596_v52 = vmul.f32 %v1494_v15, %v595_v38  ;;  %v552_v57 = vadd.f32 %v1485_v54, %v551_v51 }
 0x166   :  { %v1556_v25 = vadd.f32 1.0, %v1035_v62  ;;  %v611_v14 = vmul.f32 %v1502_v56, %v610_v18  ;;  %v567_v62 = vadd.f32 %v1489_v48, %v566_v20  ;;  %vm1589_vm4 = vcmp.eq.f32.partialorder %v602_v6, 8.507059e+37 }
 0x167   :  { %v626_v40 = vmul.f32 %v1509_v55, %v625_v22  ;;  %1040 = vrcp.f32 %v1520_v4  ;;  %v582_v51 = vadd.f32 %v1492_v35, %v581_v16  ;;  %vm584_vm0 = vweird.f32 %v1492_v35  ;;  %v1611_v20 = vpop.eup %1036 }
 0x168   :  { %vm1605_vm13 = vcmp.eq.f32.partialorder %v617_v26, 8.507059e+37  ;;  %v632_v18 = vand.u32 2147483647, %v1470_v32  ;;  %1042 = vrcp.f32 %v1528_v23  ;;  %v597_v22 = vadd.f32 %v1494_v15, %v596_v52  ;;  %v1641_v44 = vpop.eup %1038 }
 0x169   :  { %vm599_vm14 = vweird.f32 %v1494_v15  ;;  %vm614_vm10 = vweird.f32 %v1502_v56  ;;  %v634_v26 = vand.u32 2147483648, %v1470_v32  ;;  %v541_v16 = vsel %vm1599_vm5, %v1482_v58, %v537_v29  ;;  %vm1650_vm5 = vmor %vm583_vm9, %vm584_vm0 }
 0x16a   :  { %v556_v19 = vsel %vm1617_vm6, %v1485_v54, %v552_v57  ;;  %v612_v50 = vadd.f32 %v1502_v56, %v611_v14  ;;  %vm629_vm1 = vweird.f32 %v1509_v55  ;;  %v571_v58 = vsel %vm1635_vm7, %v1489_v48, %v567_v62 }
 0x16b   :  { %v627_v54 = vadd.f32 %v1509_v55, %v626_v40  ;;  %v639_v29 = vmul.f32 %v1611_v20, %v1511_v13  ;;  %1044 = vrcp.f32 %v1535_v41  ;;  %v586_v57 = vsel %vm1650_vm5, %v1492_v35, %v582_v51 }
 0x16c   :  { %vm2080_vm8 = vweird.f32 %v1461_v7  ;;  %v620_v48 = vor.u32 1.1754944e-38, %v619_v43  ;;  %vm1669_vm9 = vcmp.eq.f32.partialorder %v632_v18, 8.507059e+37  ;;  %v654_v62 = vmul.f32 %v1641_v44, %v1518_v21 }
 0x16d   :  { %vm1665_vm3 = vmor %vm2080_vm8, %vm599_vm14  ;;  %v1675_v40 = vpop.eup %1040  ;;  %v1680_v35 = vsel %vm1558_vm11, %v1504_v8, %v541_v16  ;;  %v1685_v7 = vsel %vm1562_vm12, %v1513_v1, %v556_v19  ;;  %vm2085_vm0 = vweird.f32 %v1467_v46  ;;  %1046 = vrcp.f32 %v1537_v24 }
 0x16e   :  { %v601_v43 = vsel %vm1665_vm3, %v1494_v15, %v597_v22  ;;  %vm1694_vm6 = vmor %vm2085_vm0, %vm614_vm10  ;;  %v1699_v8 = vpop.eup %1042  ;;  %v1704_v1 = vsel %vm1572_vm15, %v1531_v10, %v571_v58  ;;  %vm2088_vm10 = vweird.f32 %v1470_v32  ;;  %v635_v63 = vor.u32 1.1754944e-38, %v634_v26 }
 0x16f   :  { %v616_v15 = vsel %vm1694_vm6, %v1502_v56, %v612_v50  ;;  %vm1713_vm11 = vmor %vm2088_vm10, %vm629_vm1  ;;  %v669_v33 = vmul.f32 %v1675_v40, %v1520_v4  ;;  %v1722_v10 = vsel %vm1582_vm2, %v1544_v30, %v586_v57  ;;  %v640_v56 = vsub.f32 1.0, %v639_v29 }
 0x170   :  { %v631_v50 = vsel %vm1713_vm11, %v1509_v55, %v627_v54  ;;  %v684_v32 = vmul.f32 %v1699_v8, %v1528_v23  ;;  %v1732_v49 = vsel %vm1589_vm4, %v1567_v36, %v601_v43  ;;  %v647_v51 = vand.u32 2147483647, %v1511_v13 }
 0x171   :  { %v649_v18 = vand.u32 2147483648, %v1511_v13  ;;  %v655_v45 = vsub.f32 1.0, %v654_v62  ;;  %v1736_v30 = vpop.eup %1044  ;;  %v1740_v34 = vsel %vm1605_vm13, %v620_v48, %v616_v15  ;;  %vm643_vm12 = vweird.f32 %v1511_v13 }
 0x172   :  { %v664_v55 = vand.u32 2147483648, %v1518_v21  ;;  %v670_v22 = vsub.f32 1.0, %v669_v33  ;;  %1048 = vrcp.f32 %v1541_v53  ;;  %v1747_v36 = vsel %vm1669_vm9, %v635_v63, %v631_v50 }
 0x173   :  { %v662_v38 = vand.u32 2147483647, %v1518_v21  ;;  %v685_v26 = vsub.f32 1.0, %v684_v32  ;;  %v699_v16 = vmul.f32 %v1736_v30, %v1535_v41  ;;  %v1752_v6 = vpop.eup %1046  ;;  %v641_v19 = vmul.f32 %v1611_v20, %v640_v56 }
 0x174   :  { %vm658_vm13 = vweird.f32 %v1518_v21  ;;  %v677_v52 = vand.u32 2147483647, %v1520_v4  ;;  %v679_v58 = vand.u32 2147483648, %v1520_v4  ;;  %v650_v37 = vor.u32 1.1754944e-38, %v649_v18 }
 0x175   :  { %v656_v54 = vmul.f32 %v1641_v44, %v655_v45  ;;  %v692_v29 = vand.u32 2147483647, %v1528_v23  ;;  %v700_v57 = vsub.f32 1.0, %v699_v16  ;;  %vm1760_vm15 = vcmp.eq.f32.partialorder %v647_v51, 8.507059e+37 }
 0x176   :  { %v665_v48 = vor.u32 1.1754944e-38, %v664_v55  ;;  %v671_v14 = vmul.f32 %v1675_v40, %v670_v22  ;;  %vm673_vm2 = vweird.f32 %v1520_v4  ;;  %v714_v62 = vmul.f32 %v1752_v6, %v1537_v24 }
 0x177   :  { %vm644_vm4 = vweird.f32 %v1611_v20  ;;  %vm1769_vm14 = vcmp.eq.f32.partialorder %v662_v38, 8.507059e+37  ;;  %v686_v17 = vmul.f32 %v1699_v8, %v685_v26  ;;  %vm688_vm7 = vweird.f32 %v1528_v23 }
 0x178   :  { %v694_v15 = vand.u32 2147483648, %v1528_v23  ;;  %v1776_v46 = vpop.eup %1048  ;;  %v642_v63 = vadd.f32 %v1611_v20, %v641_v19  ;;  %vm659_vm1 = vweird.f32 %v1641_v44  ;;  %vm1780_vm5 = vcmp.eq.f32.partialorder %v677_v52, 8.507059e+37  ;;  %vm1801_vm9 = vmor %vm643_vm12, %vm644_vm4 }
 0x179   :  { %v680_v50 = vor.u32 1.1754944e-38, %v679_v58  ;;  %1050 = vrcp.f32 %v1547_v9  ;;  %v657_v56 = vadd.f32 %v1641_v44, %v656_v54  ;;  %vm1786_vm8 = vcmp.eq.f32.partialorder %v692_v29, 8.507059e+37  ;;  %vm1815_vm10 = vmor %vm658_vm13, %vm659_vm1 }
 0x17a   :  { %v701_v51 = vmul.f32 %v1736_v30, %v700_v57  ;;  %v707_v18 = vand.u32 2147483647, %v1535_v41  ;;  %v709_v45 = vand.u32 2147483648, %v1535_v41  ;;  %v672_v55 = vadd.f32 %v1675_v40, %v671_v14 }
 0x17b   :  { %vm674_vm3 = vweird.f32 %v1675_v40  ;;  %v715_v22 = vsub.f32 1.0, %v714_v62  ;;  %v729_v38 = vmul.f32 %v1776_v46, %v1541_v53  ;;  %v687_v16 = vadd.f32 %v1699_v8, %v686_v17 }
 0x17c   :  { %vm689_vm0 = vweird.f32 %v1699_v8  ;;  %v695_v19 = vor.u32 1.1754944e-38, %v694_v15  ;;  %vm703_vm6 = vweird.f32 %v1535_v41  ;;  %v646_v52 = vsel %vm1801_vm9, %v1611_v20, %v642_v63  ;;  %vm1830_vm12 = vmor %vm673_vm2, %vm674_vm3 }
 0x17d   :  { %vm718_vm11 = vweird.f32 %v1537_v24  ;;  %v722_v58 = vand.u32 2147483647, %v1537_v24  ;;  %v724_v54 = vand.u32 2147483648, %v1537_v24  ;;  %1052 = vrcp.f32 %v1556_v25  ;;  %vm1849_vm2 = vmor %vm688_vm7, %vm689_vm0 }
 0x17e   :  { %v661_v20 = vsel %vm1815_vm10, %v1641_v44, %v657_v56  ;;  %v702_v29 = vadd.f32 %v1736_v30, %v701_v51  ;;  %vm704_vm13 = vweird.f32 %v1736_v30  ;;  %vm1836_vm4 = vcmp.eq.f32.partialorder %v707_v18, 8.507059e+37 }
 0x17f   :  { %v1840_v14 = vpop.eup %1050  ;;  %v676_v44 = vsel %vm1830_vm12, %v1675_v40, %v672_v55  ;;  %v710_v62 = vor.u32 1.1754944e-38, %v709_v45  ;;  %v716_v17 = vmul.f32 %v1752_v6, %v715_v22  ;;  %v730_v15 = vsub.f32 1.0, %v729_v38  ;;  %vm1866_vm7 = vmor %vm703_vm6, %vm704_vm13 }
 0x180   :  { %v651_v63 = vsel %vm1760_vm15, %v650_v37, %v646_v52  ;;  %v691_v56 = vsel %vm1849_vm2, %v1699_v8, %v687_v16  ;;  %v739_v40 = vand.u32 2147483648, %v1541_v53  ;;  %v744_v23 = vmul.f32 %v1840_v14, %v1547_v9 }
 0x181   :  { %v666_v51 = vsel %vm1769_vm14, %v665_v48, %v661_v20  ;;  %vm719_vm15 = vweird.f32 %v1752_v6  ;;  %v725_v37 = vor.u32 1.1754944e-38, %v724_v54  ;;  %vm733_vm1 = vweird.f32 %v1541_v53 }
 0x182   :  { %v737_v8 = vand.u32 2147483647, %v1541_v53  ;;  %v681_v3 = vsel %vm1780_vm5, %v680_v50, %v676_v44  ;;  %v706_v48 = vsel %vm1866_vm7, %v1736_v30, %v702_v29  ;;  %v745_v43 = vsub.f32 1.0, %v744_v23  ;;  %vm1909_vm9 = vmor %vm718_vm11, %vm719_vm15 }
 0x183   :  { %v752_v41 = vand.u32 2147483647, %v1547_v9  ;;  %v1879_v45 = vpop.eup %1052  ;;  %v696_v55 = vsel %vm1786_vm8, %v695_v19, %v691_v56  ;;  %v717_v22 = vadd.f32 %v1752_v6, %v716_v17  ;;  %v731_v38 = vmul.f32 %v1776_v46, %v730_v15 }
 0x184   :  { %vm734_vm14 = vweird.f32 %v1776_v46  ;;  %vm1886_vm3 = vcmp.eq.f32.partialorder %v722_v58, 8.507059e+37  ;;  %v740_v50 = vor.u32 1.1754944e-38, %v739_v40  ;;  %v746_v30 = vmul.f32 %v1840_v14, %v745_v43 }
 0x185   :  { %v759_v26 = vmul.f32 %v1879_v45, %v1556_v25  ;;  %v773_v32 = vmul.f32 %v1680_v35, %v1389_v61  ;;  %v711_v16 = vsel %vm1836_vm4, %v710_v62, %v706_v48  ;;  %vm1897_vm5 = vcmp.eq.f32.partialorder %v737_v8, 8.507059e+37  ;;  %vm1939_vm12 = vmor %vm733_vm1, %vm734_vm14 }
 0x186   :  { %vm748_vm8 = vweird.f32 %v1547_v9  ;;  %v754_v52 = vand.u32 2147483648, %v1547_v9  ;;  %v774_v13 = vmul.f32 %v1685_v7, %v1393_v27  ;;  %vm1913_vm0 = vcmp.eq.f32.partialorder %v752_v41, 8.507059e+37 }
 0x187   :  { %v760_v58 = vsub.f32 1.0, %v759_v26  ;;  %vm763_vm6 = vweird.f32 %v1556_v25  ;;  %v775_v54 = vmul.f32 %v1704_v1, %v1397_v0  ;;  %v721_v27 = vsel %vm1909_vm9, %v1752_v6, %v717_v22 }
 0x188   :  { %v732_v24 = vadd.f32 %v1776_v46, %v731_v38  ;;  %vm749_vm10 = vweird.f32 %v1840_v14  ;;  %v776_v7 = vmul.f32 %v1722_v10, %v1400_v28  ;;  %v747_v20 = vadd.f32 %v1840_v14, %v746_v30 }
 0x189   :  { %v761_v21 = vmul.f32 %v1879_v45, %v760_v58  ;;  %v777_v29 = vmul.f32 %v1732_v49, %v1404_v31  ;;  %v789_v57 = vpack.c.bf16 %v773_v32, %v773_v32  ;;  %vm764_vm11 = vweird.f32 %v1879_v45  ;;  %vm1954_vm13 = vmor %vm748_vm8, %vm749_vm10 }
 0x18a   :  { %v767_v0 = vand.u32 2147483647, %v1556_v25  ;;  %v778_v1 = vmul.f32 %v1740_v34, %v1409_v2  ;;  %v790_v6 = vpack.c.bf16 %v774_v13, %v774_v13  ;;  %v769_v31 = vand.u32 2147483648, %v1556_v25  ;;  %vm1966_vm2 = vmor %vm763_vm6, %vm764_vm11 }
 0x18b   :  { %v762_v10 = vadd.f32 %v1879_v45, %v761_v21  ;;  %v779_v49 = vmul.f32 %v1747_v36, %v1414_v5  ;;  %v791_v44 = vpack.c.bf16 %v775_v54, %v775_v54  ;;  %v736_v2 = vsel %vm1939_vm12, %v1776_v46, %v732_v24 }
 0x18c   :  { %v780_v34 = vmul.f32 %v651_v63, %v1421_v47  ;;  %v792_v4 = vpack.c.bf16 %v776_v7, %v776_v7  ;;  %vm805_vm4 = vcmask 257024   ;;  %v751_v5 = vsel %vm1954_vm13, %v1840_v14, %v747_v20 }
 0x18d   :  { %v755_v36 = vor.u32 1.1754944e-38, %v754_v52  ;;  %v781_v9 = vmul.f32 %v666_v51, %v1425_v59  ;;  %v793_v62 = vpack.c.bf16 %v777_v29, %v777_v29  ;;  %806 = vst.msk [vmem:[%s2055_s4] sm:$0xf] %vm805_vm4, %v789_v57  ;;  %v726_v47 = vsel %vm1886_vm3, %v725_v37, %v721_v27 }
 0x18e   :  { %v766_v14 = vsel %vm1966_vm2, %v1879_v45, %v762_v10  ;;  %v782_v25 = vmul.f32 %v681_v3, %v1429_v11  ;;  %v794_v17 = vpack.c.bf16 %v778_v1, %v778_v1  ;;  %807 = vst.msk [vmem:[%s2055_s4 + $0x4] sm:$0xf] %vm805_vm4, %v790_v6  ;;  %v741_v59 = vsel %vm1897_vm5, %v740_v50, %v736_v2 }
 0x18f   :  { %v770_v15 = vor.u32 1.1754944e-38, %v769_v31  ;;  %v783_v63 = vmul.f32 %v696_v55, %v1433_v60  ;;  %v795_v56 = vpack.c.bf16 %v779_v49, %v779_v49  ;;  %808 = vst.msk [vmem:[%s2055_s4 + $0x8] sm:$0xf] %vm805_vm4, %v791_v44  ;;  %v756_v11 = vsel %vm1913_vm0, %v755_v36, %v751_v5 }
 0x190   :  { %vm768_vm7 = vcmp.eq.f32.partialorder %v767_v0, 8.507059e+37  ;;  %v784_v40 = vmul.f32 %v711_v16, %v1436_v12  ;;  %v796_v23 = vpack.c.bf16 %v780_v34, %v780_v34  ;;  %809 = vst.msk [vmem:[%s2055_s4 + $0xc] sm:$0xf] %vm805_vm4, %v792_v4  ;;  %v785_v60 = vmul.f32 %v726_v47, %v1454_v39  ;;  %v2125_v12 = vld [vmem:[#allocation2_spill] sm:$0xff]  ;;  %v2126_v39 = vld [vmem:[#allocation3_spill] sm:$0xff] }
 0x191   :  { %v771_v51 = vsel %vm768_vm7, %v770_v15, %v766_v14  ;;  %v797_v18 = vpack.c.bf16 %v781_v9, %v781_v9  ;;  %810 = vst.msk [vmem:[%s2055_s4 + $0x10] sm:$0xf] %vm805_vm4, %v793_v62  ;;  %v786_v37 = vmul.f32 %v741_v59, %v1459_v42  ;;  %v798_v8 = vpack.c.bf16 %v782_v25, %v782_v25 }
 0x192   :  { %811 = vst.msk [vmem:[%s2055_s4 + $0x14] sm:$0xf] %vm805_vm4, %v794_v17  ;;  %v787_v3 = vmul.f32 %v756_v11, %v2125_v12  ;;  %v799_v48 = vpack.c.bf16 %v783_v63, %v783_v63  ;;  %v788_v43 = vmul.f32 %v771_v51, %v2126_v39  ;;  %v800_v41 = vpack.c.bf16 %v784_v40, %v784_v40 }
 0x193   :  { %812 = vst.msk [vmem:[%s2055_s4 + $0x18] sm:$0xf] %vm805_vm4, %v795_v56  ;;  %v801_v42 = vpack.c.bf16 %v785_v60, %v785_v60  ;;  %v802_v45 = vpack.c.bf16 %v786_v37, %v786_v37 }
 0x194   :  { %813 = vst.msk [vmem:[%s2055_s4 + $0x1c] sm:$0xf] %vm805_vm4, %v796_v23  ;;  %v803_v55 = vpack.c.bf16 %v787_v3, %v787_v3  ;;  %v804_v22 = vpack.c.bf16 %v788_v43, %v788_v43 }
 0x195   :  { %814 = vst.msk [vmem:[%s2055_s4 + $0x20] sm:$0xf] %vm805_vm4, %v797_v18 }
 0x196   :  { %815 = vst.msk [vmem:[%s2055_s4 + $0x24] sm:$0xf] %vm805_vm4, %v798_v8 }
 0x197   :  { %816 = vst.msk [vmem:[%s2055_s4 + $0x28] sm:$0xf] %vm805_vm4, %v799_v48 }
 0x198   :  { %817 = vst.msk [vmem:[%s2055_s4 + $0x2c] sm:$0xf] %vm805_vm4, %v800_v41 }
 0x199   :  { %818 = vst.msk [vmem:[%s2055_s4 + $0x30] sm:$0xf] %vm805_vm4, %v801_v42 }
 0x19a   :  { %819 = vst.msk [vmem:[%s2055_s4 + $0x34] sm:$0xf] %vm805_vm4, %v802_v45 }
 0x19b   :  { %820 = vst.msk [vmem:[%s2055_s4 + $0x38] sm:$0xf] %vm805_vm4, %v803_v55 }
 0x19c   :  { %821 = vst.msk [vmem:[%s2055_s4 + $0x3c] sm:$0xf] %vm805_vm4, %v804_v22 }

// kernel: discriminator_forward.6
= control target key start
LH: loop header
LB: loop body
LE: loop exit
PB: predicated region body
PF: predicated region fallthrough
CT: control target
= control target key end

     0   :  { %vm200_vm0 = vcmask 261120   ;;  %v585_v46 = vmov 32.0   ;;  %vm264_vm1 = vcmask 523264   ;;  %s769_s1 = inlined_call_operand.vmem [shape: bf16[288,64], index: 1, kind: input, shape index: {}]   ;;  %s770_s0 = inlined_call_operand.vmem [shape: bf16[32,288], index: 0, kind: input, shape index: {}]   ;;  %s771_s3 = inlined_call_operand.vmem [shape: f32[1,64], index: 3, kind: input, shape index: {}]   ;;  %s772_s2 = inlined_call_operand.vmem [shape: f32[1,64], index: 2, kind: input, shape index: {}]   ;;  %s773_s4 = inlined_call_operand.vmem [shape: bf16[32,64], index: 4, kind: output, shape index: {}]  }
   0x1   :  { %v544_v0 = vld [vmem:[%s769_s1 + $0x38] sm:$0xff]  ;;  %v543_v2 = vld [vmem:[%s769_s1 + $0x30] sm:$0xff]  ;;  %v554_v4 = vld [vmem:[%s769_s1 + $0x88] sm:$0xff]  ;;  %565 = vrcp.f32 %v585_v46 }
   0x2   :  { %v552_v1 = vld [vmem:[%s769_s1 + $0x78] sm:$0xff]  ;;  %207 = vmatpush.bf16.msra.mxu0 %v544_v0  ;;  %v551_v3 = vld [vmem:[%s769_s1 + $0x70] sm:$0xff]  ;;  %555 = vmatpush.bf16.msra.mxu3 %v544_v0  ;;  %v553_v5 = vld [vmem:[%s769_s1 + $0x80] sm:$0xff] }
   0x3   :  { %226 = vmatpush.bf16.msra.mxu1 %v552_v1  ;;  %251 = vmatpush.bf16.msra.mxu2 %v554_v4  ;;  %v439_v6 = vld [vmem:[%s770_s0 + $0x8] sm:$0xf]  ;;  %v533_v7 = vld [vmem:[%s770_s0 + $0x10] sm:$0xf0]  ;;  %v541_v11 = vld [vmem:[%s769_s1 + $0x20] sm:$0xff] }
   0x4   :  { %v542_v8 = vld [vmem:[%s769_s1 + $0x28] sm:$0xff]  ;;  %v440_v10 = vor.u32 %v533_v7, %v439_v6  ;;  %v549_v12 = vld [vmem:[%s769_s1 + $0x60] sm:$0xff]  ;;  %v540_v13 = vld [vmem:[%s769_s1 + $0x18] sm:$0xff] }
   0x5   :  { %v550_v9 = vld [vmem:[%s769_s1 + $0x68] sm:$0xff]  ;;  %v548_v14 = vld [vmem:[%s769_s1 + $0x58] sm:$0xff]  ;;  %v539_v15 = vld [vmem:[%s769_s1 + $0x10] sm:$0xff] }
   0x6   :  { %208 = vmatpush.bf16.msra.mxu0 %v543_v2  ;;  %556 = vmatpush.bf16.msra.mxu3 %v543_v2  ;;  %v547_v16 = vld [vmem:[%s769_s1 + $0x50] sm:$0xff]  ;;  %v451_v17 = vld [vmem:[%s770_s0 + $0x20] sm:$0xf]  ;;  %v536_v18 = vld [vmem:[%s770_s0 + $0x28] sm:$0xf0] }
   0x7   :  { %227 = vmatpush.bf16.msra.mxu1 %v551_v3  ;;  %252 = vmatpush.bf16.msra.mxu2 %v553_v5  ;;  %v538_v19 = vld [vmem:[%s769_s1 + $0x8] sm:$0xff]  ;;  %v452_v21 = vor.u32 %v536_v18, %v451_v17  ;;  %v537_v22 = vld [vmem:[%s769_s1] sm:$0xff]  ;;  %v433_v27 = vld [vmem:[%s770_s0 + $0xc] sm:$0xf0]  ;;  %v566_v52 = vpop.eup %565 }
   0x8   :  { %v546_v20 = vld [vmem:[%s769_s1 + $0x48] sm:$0xff]  ;;  %v545_v23 = vld [vmem:[%s769_s1 + $0x40] sm:$0xff]  ;;  %v443_v28 = vld [vmem:[%s770_s0 + $0x18] sm:$0xf]  ;;  %v279_v59 = vmul.f32 32.0, %v566_v52  ;;  %vm283_vm2 = vweird.f32 %v566_v52 }
   0x9   :  { %v431_v24 = vld [vmem:[%s770_s0] sm:$0xf]  ;;  %v532_v25 = vld [vmem:[%s770_s0 + $0x8] sm:$0xf0]  ;;  %v531_v26 = vld [vmem:[%s770_s0 + $0x4] sm:$0xf] }
   0xa   :  { %209 = vmatpush.bf16.msra.mxu0 %v542_v8  ;;  %557 = vmatpush.bf16.msra.mxu3 %v542_v8  ;;  %v535_v29 = vld [vmem:[%s770_s0 + $0x20] sm:$0xf0]  ;;  %v432_v30 = vor.u32 %v532_v25, %v431_v24  ;;  %v436_v31 = vor.u32 %v531_v26, %v433_v27  ;;  %v534_v33 = vld [vmem:[%s770_s0 + $0x1c] sm:$0xf]  ;;  %v445_v34 = vld [vmem:[%s770_s0 + $0x24] sm:$0xf0] }
   0xb   :  { %228 = vmatpush.bf16.msra.mxu1 %v550_v9  ;;  %525 = vmatmul.msk.bf16.vlgmr.msra.gmra.mxu2 %vm200_vm0, %v440_v10  ;;  %v444_v32 = vor.u32 %v535_v29, %v443_v28  ;;  %v448_v35 = vor.u32 %v534_v33, %v445_v34  ;;  %v280_v1 = vsub.f32 1.0, %v279_v59  ;;  %v564_v46 = vld [vmem:[%s771_s3] ss:$0 sm:$0xff] }
   0xd   :  { %v281_v4 = vmul.f32 %v566_v52, %v280_v1 }
   0xe   :  { %210 = vmatpush.bf16.msra.mxu0 %v541_v11  ;;  %558 = vmatpush.bf16.msra.mxu3 %v541_v11 }
   0xf   :  { %229 = vmatpush.bf16.msra.mxu1 %v549_v12  ;;  %v282_v7 = vadd.f32 %v566_v52, %v281_v4 }
  0x11   :  { %v284_v10 = vsel %vm283_vm2, %v566_v52, %v282_v7 }
  0x12   :  { %211 = vmatpush.bf16.msra.mxu0 %v540_v13  ;;  %559 = vmatpush.bf16.msra.mxu3 %v540_v13 }
  0x13   :  { %230 = vmatpush.bf16.msra.mxu1 %v548_v14 }
  0x16   :  { %212 = vmatpush.bf16.msra.mxu0 %v539_v15  ;;  %560 = vmatpush.bf16.msra.mxu3 %v539_v15 }
  0x17   :  { %231 = vmatpush.bf16.msra.mxu1 %v547_v16 }
  0x1a   :  { %213 = vmatpush.bf16.msra.mxu0 %v538_v19  ;;  %561 = vmatpush.bf16.msra.mxu3 %v538_v19 }
  0x1b   :  { %232 = vmatpush.bf16.msra.mxu1 %v546_v20  ;;  %526 = vmatmul.msk.bf16.gmra.mxu2 %vm200_vm0, %v452_v21 }
  0x1e   :  { %214 = vmatpush.bf16.msra.mxu0 %v537_v22  ;;  %562 = vmatpush.bf16.msra.mxu3 %v537_v22 }
  0x1f   :  { %233 = vmatpush.bf16.msra.mxu1 %v545_v23 }
  0x21   :  { %215 = vmatmul.bf16.vlgmr.msra.gmra.mxu0 %v432_v30  ;;  %220 = vmatmul.bf16.vlgmr.msra.gmra.mxu3 %v444_v32 }
  0x22   :  { %234 = vmatmul.bf16.vlgmr.msra.gmra.mxu1 %v436_v31 }
  0x32   :  { %239 = vmatmul.bf16.gmra.mxu1 %v448_v35 }
  0x8e   :  { %v254_v36 = vpop.f32.mrf.mxu2 }
  0x96   :  { %v256_v39 = vpop.f32.mrf.mxu2 }
  0x9e   :  { %v216_v38 = vpop.f32.mrf.mxu0  ;;  %v259_v44 = vpop.f32.mrf.mxu2 }
  0x9f   :  { %v235_v37 = vpop.f32.mrf.mxu1 }
  0xa0   :  { %v236_v47 = vadd.f32 %v235_v37, %v216_v38 }
  0xa2   :  { %v255_v50 = vadd.f32 %v254_v36, %v236_v47 }
  0xa4   :  { %v221_v42 = vpop.f32.mrf.mxu3  ;;  %v265_v56 = vsel %vm264_vm1, %v255_v50, 0.0 }
  0xa6   :  { %v218_v41 = vpop.f32.mrf.mxu0  ;;  %v261_v61 = vpop.f32.mrf.mxu2 }
  0xa7   :  { %v237_v40 = vpop.f32.mrf.mxu1 }
  0xa8   :  { %v238_v43 = vadd.f32 %v237_v40, %v218_v41  ;;  %v308_v41 = vld [vmem:[%s772_s2] sm:$0x1] }
  0xaa   :  { %v257_v49 = vadd.f32 %v256_v39, %v238_v43 }
  0xac   :  { %v266_v53 = vsel %vm264_vm1, %v257_v49, 0.0  ;;  %v223_v54 = vpop.f32.mrf.mxu3 }
  0xad   :  { %v267_v60 = vadd.f32 %v266_v53, %v265_v56 }
  0xaf   :  { %v240_v45 = vpop.f32.mrf.mxu1 }
  0xb0   :  { %v241_v48 = vadd.f32 %v240_v45, %v221_v42 }
  0xb2   :  { %v260_v51 = vadd.f32 %v259_v44, %v241_v48 }
  0xb4   :  { %v268_v57 = vsel %vm264_vm1, %v260_v51, 0.0 }
  0xb5   :  { %v269_v63 = vadd.f32 %v268_v57, %v267_v60 }
  0xb7   :  { %v242_v55 = vpop.f32.mrf.mxu1 }
  0xb8   :  { %v243_v58 = vadd.f32 %v242_v55, %v223_v54 }
  0xba   :  { %v262_v62 = vadd.f32 %v261_v61, %v243_v58 }
  0xbc   :  { %v270_v0 = vsel %vm264_vm1, %v262_v62, 0.0 }
  0xbd   :  { %v271_v2 = vadd.f32 %v270_v0, %v269_v63 }
  0xbf   :  { %v272_v3 = vrot.slane %v271_v2, 4 }
  0xc1   :  { %v273_v5 = vadd.f32 %v272_v3, %v271_v2 }
  0xc3   :  { %v274_v6 = vrot.slane %v273_v5, 2 }
  0xc5   :  { %v275_v8 = vadd.f32 %v274_v6, %v273_v5 }
  0xc7   :  { %v276_v9 = vrot.slane %v275_v8, 1 }
  0xc9   :  { %v277_v11 = vadd.f32 %v276_v9, %v275_v8 }
  0xcb   :  { %v285_v12 = vmul.f32 %v284_v10, %v277_v11 }
  0xcd   :  { %v286_v13 = vsub.f32 %v255_v50, %v285_v12  ;;  %v287_v14 = vsub.f32 %v257_v49, %v285_v12  ;;  %v288_v15 = vsub.f32 %v260_v51, %v285_v12  ;;  %v289_v16 = vsub.f32 %v262_v62, %v285_v12 }
  0xcf   :  { %v290_v17 = vmul.f32 %v286_v13, %v286_v13  ;;  %v291_v18 = vmul.f32 %v287_v14, %v287_v14  ;;  %v292_v19 = vmul.f32 %v288_v15, %v288_v15  ;;  %v293_v20 = vmul.f32 %v289_v16, %v289_v16 }
  0xd1   :  { %v294_v21 = vsel %vm264_vm1, %v290_v17, 0.0  ;;  %v295_v22 = vsel %vm264_vm1, %v291_v18, 0.0  ;;  %v297_v24 = vsel %vm264_vm1, %v292_v19, 0.0  ;;  %v299_v26 = vsel %vm264_vm1, %v293_v20, 0.0 }
  0xd2   :  { %v296_v23 = vadd.f32 %v295_v22, %v294_v21 }
  0xd4   :  { %v298_v25 = vadd.f32 %v297_v24, %v296_v23 }
  0xd6   :  { %v300_v27 = vadd.f32 %v299_v26, %v298_v25 }
  0xd8   :  { %v301_v28 = vrot.slane %v300_v27, 4 }
  0xda   :  { %v302_v29 = vadd.f32 %v301_v28, %v300_v27 }
  0xdc   :  { %v303_v30 = vrot.slane %v302_v29, 2 }
  0xde   :  { %v304_v31 = vadd.f32 %v303_v30, %v302_v29 }
  0xe0   :  { %v305_v32 = vrot.slane %v304_v31, 1 }
  0xe2   :  { %v306_v33 = vadd.f32 %v305_v32, %v304_v31 }
  0xe4   :  { %v307_v34 = vmul.f32 %v306_v33, %v284_v10 }
  0xe6   :  { %v309_v35 = vadd.f32 1e-05, %v307_v34 }
  0xe8   :  { %567 = vrsqrt.f32 %v309_v35  ;;  %vm316_vm4 = vweird.f32 %v309_v35 }
  0xee   :  { %v568_v36 = vpop.eup %567 }
  0xef   :  { %v311_v37 = vmul.f32 %v568_v36, %v309_v35  ;;  %vm317_vm3 = vweird.f32 %v568_v36 }
  0xf0   :  { %vm318_vm5 = vmor %vm316_vm4, %vm317_vm3 }
  0xf1   :  { %v312_v38 = vmul.f32 %v568_v36, %v311_v37 }
  0xf3   :  { %v313_v39 = vmul.f32 0.5, %v312_v38 }
  0xf5   :  { %v314_v40 = vsub.f32 1.5, %v313_v39 }
  0xf7   :  { %v315_v42 = vmul.f32 %v568_v36, %v314_v40 }
  0xf9   :  { %v319_v43 = vsel %vm318_vm5, %v568_v36, %v315_v42  ;;  %vm420_vm5 = vcmask 519168  }
  0xfa   :  { %v320_v44 = vmul.f32 %v319_v43, %v308_v41 }
  0xfc   :  { %v322_v45 = vperm.slane %v320_v44, 0 }
  0xfe   :  { %v324_v47 = vmul.f32 %v322_v45, %v286_v13  ;;  %v325_v48 = vmul.f32 %v322_v45, %v287_v14  ;;  %v326_v49 = vmul.f32 %v322_v45, %v288_v15  ;;  %v327_v50 = vmul.f32 %v322_v45, %v289_v16 }
 0x100   :  { %v717_v51 = vadd.f32 %v564_v46, %v324_v47  ;;  %v719_v52 = vadd.f32 %v564_v46, %v325_v48  ;;  %v721_v53 = vadd.f32 %v564_v46, %v326_v49  ;;  %v723_v54 = vadd.f32 %v564_v46, %v327_v50 }
 0x102   :  { %v527_v55 = vmul.f32 -1.442695, %v717_v51  ;;  %v528_v56 = vmul.f32 -1.442695, %v719_v52  ;;  %v529_v57 = vmul.f32 -1.442695, %v721_v53 }
 0x103   :  { %v530_v58 = vmul.f32 -1.442695, %v723_v54 }
 0x104   :  { %569 = vpow2.f32 %v527_v55 }
 0x105   :  { %571 = vpow2.f32 %v528_v56 }
 0x106   :  { %573 = vpow2.f32 %v529_v57 }
 0x107   :  { %575 = vpow2.f32 %v530_v58 }
 0x10a   :  { %v570_v59 = vpop.eup %569 }
 0x10b   :  { %v572_v60 = vpop.eup %571  ;;  %v348_v61 = vadd.f32 1.0, %v570_v59 }
 0x10c   :  { %v574_v62 = vpop.eup %573  ;;  %v349_v63 = vadd.f32 1.0, %v572_v60 }
 0x10d   :  { %v576_v0 = vpop.eup %575  ;;  %v350_v1 = vadd.f32 1.0, %v574_v62  ;;  %577 = vrcp.f32 %v348_v61  ;;  %v361_v3 = vand.u32 2147483647, %v348_v61  ;;  %v363_v4 = vand.u32 2147483648, %v348_v61 }
 0x10e   :  { %v729_v2 = vadd.f32 1.0, %v576_v0  ;;  %579 = vrcp.f32 %v349_v63  ;;  %vm357_vm6 = vweird.f32 %v348_v61  ;;  %vm372_vm7 = vweird.f32 %v349_v63 }
 0x10f   :  { %581 = vrcp.f32 %v350_v1  ;;  %v376_v10 = vand.u32 2147483647, %v349_v63  ;;  %v378_v11 = vand.u32 2147483648, %v349_v63  ;;  %vm732_vm8 = vcmp.eq.f32.partialorder %v361_v3, 8.507059e+37 }
 0x110   :  { %583 = vrcp.f32 %v729_v2  ;;  %v364_v14 = vor.u32 1.1754944e-38, %v363_v4  ;;  %vm387_vm9 = vweird.f32 %v350_v1  ;;  %v391_v18 = vand.u32 2147483647, %v350_v1 }
 0x111   :  { %v393_v19 = vand.u32 2147483648, %v350_v1  ;;  %vm737_vm12 = vcmp.eq.f32.partialorder %v376_v10, 8.507059e+37  ;;  %v379_v25 = vor.u32 1.1754944e-38, %v378_v11  ;;  %vm402_vm15 = vweird.f32 %v729_v2 }
 0x112   :  { %v406_v30 = vand.u32 2147483647, %v729_v2  ;;  %v408_v31 = vand.u32 2147483648, %v729_v2  ;;  %vm392_vm3 = vcmp.eq.f32.partialorder %v391_v18, 8.507059e+37 }
 0x113   :  { %v578_v5 = vpop.eup %577  ;;  %v394_v37 = vor.u32 1.1754944e-38, %v393_v19 }
 0x114   :  { %v580_v6 = vpop.eup %579  ;;  %v353_v7 = vmul.f32 %v578_v5, %v348_v61  ;;  %vm358_vm10 = vweird.f32 %v578_v5  ;;  %v409_v43 = vor.u32 1.1754944e-38, %v408_v31 }
 0x115   :  { %v582_v8 = vpop.eup %581  ;;  %v368_v9 = vmul.f32 %v580_v6, %v349_v63  ;;  %vm373_vm11 = vweird.f32 %v580_v6  ;;  %vm359_vm14 = vmor %vm357_vm6, %vm358_vm10  ;;  %vm407_vm6 = vcmp.eq.f32.partialorder %v406_v30, 8.507059e+37 }
 0x116   :  { %v354_v12 = vsub.f32 1.0, %v353_v7  ;;  %v383_v15 = vmul.f32 %v582_v8, %v350_v1  ;;  %v584_v16 = vpop.eup %583  ;;  %vm388_vm13 = vweird.f32 %v582_v8  ;;  %vm374_vm0 = vmor %vm372_vm7, %vm373_vm11 }
 0x117   :  { %v369_v17 = vsub.f32 1.0, %v368_v9  ;;  %v398_v22 = vmul.f32 %v584_v16, %v729_v2  ;;  %vm403_vm1 = vweird.f32 %v584_v16  ;;  %vm389_vm2 = vmor %vm387_vm9, %vm388_vm13 }
 0x118   :  { %v355_v20 = vmul.f32 %v578_v5, %v354_v12  ;;  %v384_v21 = vsub.f32 1.0, %v383_v15  ;;  %vm404_vm4 = vmor %vm402_vm15, %vm403_vm1 }
 0x119   :  { %v370_v23 = vmul.f32 %v580_v6, %v369_v17  ;;  %v399_v28 = vsub.f32 1.0, %v398_v22 }
 0x11a   :  { %v356_v26 = vadd.f32 %v578_v5, %v355_v20  ;;  %v385_v27 = vmul.f32 %v582_v8, %v384_v21 }
 0x11b   :  { %v371_v29 = vadd.f32 %v580_v6, %v370_v23  ;;  %v400_v34 = vmul.f32 %v584_v16, %v399_v28 }
 0x11c   :  { %v360_v32 = vsel %vm359_vm14, %v578_v5, %v356_v26  ;;  %v386_v33 = vadd.f32 %v582_v8, %v385_v27 }
 0x11d   :  { %v365_v35 = vsel %vm732_vm8, %v364_v14, %v360_v32  ;;  %v375_v36 = vsel %vm374_vm0, %v580_v6, %v371_v29  ;;  %v401_v40 = vadd.f32 %v584_v16, %v400_v34 }
 0x11e   :  { %v380_v38 = vsel %vm737_vm12, %v379_v25, %v375_v36  ;;  %v390_v39 = vsel %vm389_vm2, %v582_v8, %v386_v33  ;;  %v412_v41 = vmul.f32 %v365_v35, %v717_v51 }
 0x11f   :  { %v395_v42 = vsel %vm392_vm3, %v394_v37, %v390_v39  ;;  %v413_v44 = vmul.f32 %v380_v38, %v719_v52  ;;  %v405_v45 = vsel %vm404_vm4, %v584_v16, %v401_v40 }
 0x120   :  { %v414_v46 = vmul.f32 %v395_v42, %v721_v53  ;;  %v416_v47 = vpack.c.bf16 %v412_v41, %v412_v41  ;;  %v410_v48 = vsel %vm407_vm6, %v409_v43, %v405_v45 }
 0x121   :  { %v417_v49 = vpack.c.bf16 %v413_v44, %v413_v44  ;;  %v415_v50 = vmul.f32 %v410_v48, %v723_v54 }
 0x122   :  { %v418_v55 = vpack.c.bf16 %v414_v46, %v414_v46  ;;  %421 = vst.msk [vmem:[%s773_s4] sm:$0xf] %vm420_vm5, %v416_v47 }
 0x123   :  { %422 = vst.msk [vmem:[%s773_s4 + $0x4] sm:$0xf] %vm420_vm5, %v417_v49  ;;  %v419_v51 = vpack.c.bf16 %v415_v50, %v415_v50 }
 0x124   :  { %423 = vst.msk [vmem:[%s773_s4 + $0x8] sm:$0xf] %vm420_vm5, %v418_v55 }
 0x125   :  { %424 = vst.msk [vmem:[%s773_s4 + $0xc] sm:$0xf] %vm420_vm5, %v419_v51 }

// kernel: discriminator_forward.7
= control target key start
LH: loop header
LB: loop body
LE: loop exit
PB: predicated region body
PF: predicated region fallthrough
CT: control target
= control target key end

     0   :  { %s1020_s0 = inlined_call_operand.vmem [shape: bf16[8,576], index: 0, kind: input, shape index: {}]   ;;  %s1021_s1 = inlined_call_operand.vmem [shape: bf16[576,128], index: 1, kind: input, shape index: {}]   ;;  %s1022_s2 = inlined_call_operand.vmem [shape: f32[1,128], index: 2, kind: input, shape index: {}]   ;;  %s1023_s3 = inlined_call_operand.vmem [shape: f32[1,128], index: 3, kind: input, shape index: {}]   ;;  %s1024_s4 = inlined_call_operand.vmem [shape: f32[2,8], index: 4, kind: input, shape index: {}]   ;;  %s1025_s5 = inlined_call_operand.vmem [shape: f32[128,3], index: 5, kind: input, shape index: {}]   ;;  %s1026_s6 = inlined_call_operand.vmem [shape: f32[1,3], index: 6, kind: input, shape index: {}]   ;;  %s1027_s7 = inlined_call_operand.hbm [shape: f32[2,3], index: 7, kind: output, shape index: {}]  }
   0x1   :  { %v727_v0 = vld [vmem:[%s1021_s1 + $0x38] sm:$0xff]  ;;  %v726_v4 = vld [vmem:[%s1021_s1 + $0x30] sm:$0xff]  ;;  %v725_v8 = vld [vmem:[%s1021_s1 + $0x28] sm:$0xff] }
   0x2   :  { %v735_v1 = vld [vmem:[%s1021_s1 + $0x78] sm:$0xff]  ;;  %340 = vmatpush.bf16.msra.mxu0 %v727_v0  ;;  %v734_v5 = vld [vmem:[%s1021_s1 + $0x70] sm:$0xff]  ;;  %v733_v9 = vld [vmem:[%s1021_s1 + $0x68] sm:$0xff] }
   0x3   :  { %v743_v2 = vld [vmem:[%s1021_s1 + $0xb8] sm:$0xff]  ;;  %353 = vmatpush.bf16.msra.mxu1 %v735_v1  ;;  %v742_v6 = vld [vmem:[%s1021_s1 + $0xb0] sm:$0xff]  ;;  %v741_v10 = vld [vmem:[%s1021_s1 + $0xa8] sm:$0xff] }
   0x4   :  { %v751_v3 = vld [vmem:[%s1021_s1 + $0xf8] sm:$0xff]  ;;  %366 = vmatpush.bf16.msra.mxu2 %v743_v2  ;;  %v750_v7 = vld [vmem:[%s1021_s1 + $0xf0] sm:$0xff]  ;;  %v749_v11 = vld [vmem:[%s1021_s1 + $0xe8] sm:$0xff] }
   0x5   :  { %379 = vmatpush.bf16.msra.mxu3 %v751_v3  ;;  %v724_v12 = vld [vmem:[%s1021_s1 + $0x20] sm:$0xff] }
   0x6   :  { %341 = vmatpush.bf16.msra.mxu0 %v726_v4  ;;  %v732_v13 = vld [vmem:[%s1021_s1 + $0x60] sm:$0xff] }
   0x7   :  { %354 = vmatpush.bf16.msra.mxu1 %v734_v5  ;;  %v740_v14 = vld [vmem:[%s1021_s1 + $0xa0] sm:$0xff] }
   0x8   :  { %367 = vmatpush.bf16.msra.mxu2 %v742_v6  ;;  %v748_v15 = vld [vmem:[%s1021_s1 + $0xe0] sm:$0xff] }
   0x9   :  { %380 = vmatpush.bf16.msra.mxu3 %v750_v7 }
   0xa   :  { %342 = vmatpush.bf16.msra.mxu0 %v725_v8 }
   0xb   :  { %355 = vmatpush.bf16.msra.mxu1 %v733_v9 }
   0xc   :  { %368 = vmatpush.bf16.msra.mxu2 %v741_v10 }
   0xd   :  { %381 = vmatpush.bf16.msra.mxu3 %v749_v11 }
   0xe   :  { %12 = vsyncpa [#allocation3], 0  ;;  %343 = vmatpush.bf16.msra.mxu0 %v724_v12  ;;  %v723_v16 = vld [vmem:[%s1021_s1 + $0x18] sm:$0xff]  ;;  %v722_v20 = vld [vmem:[%s1021_s1 + $0x10] sm:$0xff]  ;;  %vm336_vm0 = vcmask 523264   ;;  %v798_v51 = vmov 8.0  }
   0xf   :  { %356 = vmatpush.bf16.msra.mxu1 %v732_v13  ;;  %v731_v17 = vld [vmem:[%s1021_s1 + $0x58] sm:$0xff]  ;;  %v730_v21 = vld [vmem:[%s1021_s1 + $0x50] sm:$0xff]  ;;  %v721_v24 = vld [vmem:[%s1021_s1 + $0x8] sm:$0xff]  ;;  %760 = vrcp.f32 %v798_v51  ;;  %vm471_vm9 = vcmask 64512   ;;  %vm554_vm13 = vcmask 17408  }
  0x10   :  { %369 = vmatpush.bf16.msra.mxu2 %v740_v14  ;;  %v739_v18 = vld [vmem:[%s1021_s1 + $0x98] sm:$0xff]  ;;  %v738_v22 = vld [vmem:[%s1021_s1 + $0x90] sm:$0xff]  ;;  %v729_v25 = vld [vmem:[%s1021_s1 + $0x48] sm:$0xff] }
  0x11   :  { %382 = vmatpush.bf16.msra.mxu3 %v748_v15  ;;  %v747_v19 = vld [vmem:[%s1021_s1 + $0xd8] sm:$0xff]  ;;  %v746_v23 = vld [vmem:[%s1021_s1 + $0xd0] sm:$0xff]  ;;  %v28_v26 = vld [vmem:[%s1020_s0] sm:$0xff] }
  0x12   :  { %344 = vmatpush.bf16.msra.mxu0 %v723_v16  ;;  %v737_v27 = vld [vmem:[%s1021_s1 + $0x88] sm:$0xff]  ;;  %v106_v30 = vunpack.c.l.b16 %v28_v26  ;;  %v107_v31 = vunpack.c.h.b16 %v28_v26  ;;  %v720_v32 = vld [vmem:[%s1021_s1] sm:$0xff]  ;;  %v755_v38 = vld [vmem:[%s1021_s1 + $0x118] sm:$0xff] }
  0x13   :  { %357 = vmatpush.bf16.msra.mxu1 %v731_v17  ;;  %v745_v28 = vld [vmem:[%s1021_s1 + $0xc8] sm:$0xff]  ;;  %v728_v33 = vld [vmem:[%s1021_s1 + $0x40] sm:$0xff]  ;;  %v754_v43 = vld [vmem:[%s1021_s1 + $0x110] sm:$0xff] }
  0x14   :  { %370 = vmatpush.bf16.msra.mxu2 %v739_v18  ;;  %v29_v29 = vld [vmem:[%s1020_s0 + $0x8] sm:$0xff]  ;;  %v736_v36 = vld [vmem:[%s1021_s1 + $0x80] sm:$0xff]  ;;  %v111_v39 = vpack.c.b16 %v106_v30, %v106_v30  ;;  %v112_v40 = vpack.c.b16 %v107_v31, %v107_v31  ;;  %v30_v45 = vld [vmem:[%s1020_s0 + $0x10] sm:$0xf] }
  0x15   :  { %383 = vmatpush.bf16.msra.mxu3 %v747_v19  ;;  %v108_v34 = vunpack.c.l.b16 %v29_v29  ;;  %v109_v35 = vunpack.c.h.b16 %v29_v29  ;;  %v744_v37 = vld [vmem:[%s1021_s1 + $0xc0] sm:$0xff]  ;;  %v753_v44 = vld [vmem:[%s1021_s1 + $0x108] sm:$0xff]  ;;  %v110_v47 = vunpack.c.l.b16 %v30_v45  ;;  %v761_v56 = vpop.eup %760 }
  0x16   :  { %345 = vmatpush.bf16.msra.mxu0 %v722_v20  ;;  %v752_v46 = vld [vmem:[%s1021_s1 + $0x100] sm:$0xff]  ;;  %v412_v59 = vmul.f32 8.0, %v761_v56  ;;  %vm416_vm1 = vweird.f32 %v761_v56  ;;  %v504_v45 = vld [vmem:[%s1025_s5 + $0x48] sm:$0xff] }
  0x17   :  { %358 = vmatpush.bf16.msra.mxu1 %v730_v21  ;;  %v113_v41 = vpack.c.b16 %v108_v34, %v108_v34  ;;  %v114_v42 = vpack.c.b16 %v109_v35, %v109_v35  ;;  %v115_v48 = vpack.c.b16 %v110_v47, %v110_v47  ;;  %v502_v47 = vld [vmem:[%s1025_s5 + $0x38] sm:$0xff] }
  0x18   :  { %371 = vmatpush.bf16.msra.mxu2 %v738_v22  ;;  %v413_v0 = vsub.f32 1.0, %v412_v59 }
  0x19   :  { %384 = vmatpush.bf16.msra.mxu3 %v746_v23 }
  0x1a   :  { %346 = vmatpush.bf16.msra.mxu0 %v721_v24  ;;  %v414_v3 = vmul.f32 %v761_v56, %v413_v0 }
  0x1b   :  { %359 = vmatpush.bf16.msra.mxu1 %v729_v25 }
  0x1c   :  { %372 = vmatpush.bf16.msra.mxu2 %v737_v27  ;;  %v415_v6 = vadd.f32 %v761_v56, %v414_v3 }
  0x1d   :  { %385 = vmatpush.bf16.msra.mxu3 %v745_v28  ;;  %v428_v28 = vld [vmem:[%s1022_s2] sm:$0x1] }
  0x1e   :  { %347 = vmatpush.bf16.msra.mxu0 %v720_v32  ;;  %v417_v10 = vsel %vm416_vm1, %v761_v56, %v415_v6 }
  0x1f   :  { %360 = vmatpush.bf16.msra.mxu1 %v728_v33  ;;  %v758_v33 = vld [vmem:[%s1023_s3] ss:$0 sm:$0xff] }
  0x20   :  { %373 = vmatpush.bf16.msra.mxu2 %v736_v36  ;;  %v510_v36 = vld [vmem:[%s1025_s5 + $0x78] sm:$0xff] }
  0x21   :  { %386 = vmatpush.bf16.msra.mxu3 %v744_v37  ;;  %348 = vmatmul.bf16.vlgmr.msra.gmra.mxu0 %v111_v39  ;;  %v509_v37 = vld [vmem:[%s1025_s5 + $0x70] sm:$0xff]  ;;  %v508_v39 = vld [vmem:[%s1025_s5 + $0x68] sm:$0xff] }
  0x22   :  { %396 = vmatpush.bf16.msrb.mxu0 %v755_v38  ;;  %361 = vmatmul.bf16.vlgmr.msra.gmra.mxu1 %v112_v40  ;;  %v507_v40 = vld [vmem:[%s1025_s5 + $0x60] sm:$0xff] }
  0x23   :  { %374 = vmatmul.bf16.vlgmr.msra.gmra.mxu2 %v113_v41  ;;  %v506_v41 = vld [vmem:[%s1025_s5 + $0x58] sm:$0xff] }
  0x24   :  { %387 = vmatmul.bf16.vlgmr.msra.gmra.mxu3 %v114_v42  ;;  %515 = vmatpush.msrb.mxu2 %v510_v36  ;;  %v505_v42 = vld [vmem:[%s1025_s5 + $0x50] sm:$0xff] }
  0x26   :  { %397 = vmatpush.bf16.msrb.mxu0 %v754_v43  ;;  %516 = vmatpush.msrb.mxu2 %v509_v37 }
  0x28   :  { %517 = vmatpush.msrb.mxu2 %v508_v39 }
  0x2a   :  { %398 = vmatpush.bf16.msrb.mxu0 %v753_v44  ;;  %518 = vmatpush.msrb.mxu2 %v507_v40 }
  0x2c   :  { %519 = vmatpush.msrb.mxu2 %v506_v41 }
  0x2e   :  { %399 = vmatpush.bf16.msrb.mxu0 %v752_v46  ;;  %520 = vmatpush.msrb.mxu2 %v505_v42  ;;  %v503_v46 = vld [vmem:[%s1025_s5 + $0x40] sm:$0xff] }
  0x30   :  { %521 = vmatpush.msrb.mxu2 %v504_v45 }
  0x31   :  { %716 = vmatmul.msk.bf16.vlgmr.msrb.gmra.mxu0 %vm336_vm0, %v115_v48  ;;  %v501_v48 = vld [vmem:[%s1025_s5 + $0x30] sm:$0xff] }
  0x32   :  { %522 = vmatpush.msrb.mxu2 %v503_v46 }
  0x34   :  { %523 = vmatpush.msrb.mxu2 %v502_v47 }
  0x36   :  { %524 = vmatpush.msrb.mxu2 %v501_v48 }
  0x9e   :  { %v349_v49 = vpop.f32.mrf.mxu0 }
  0x9f   :  { %v362_v50 = vpop.f32.mrf.mxu1 }
  0xa0   :  { %v363_v57 = vadd.f32 %v362_v50, %v349_v49  ;;  %v500_v50 = vld [vmem:[%s1025_s5 + $0x28] sm:$0xff] }
  0xa1   :  { %525 = vmatpush.msrb.mxu2 %v500_v50 }
  0xa6   :  { %v375_v52 = vpop.f32.mrf.mxu2  ;;  %v351_v54 = vpop.f32.mrf.mxu0 }
  0xa7   :  { %v388_v53 = vpop.f32.mrf.mxu3  ;;  %v364_v55 = vpop.f32.mrf.mxu1  ;;  %v376_v58 = vadd.f32 %v375_v52, %v363_v57  ;;  %v499_v52 = vld [vmem:[%s1025_s5 + $0x20] sm:$0xff] }
  0xa8   :  { %v498_v55 = vld [vmem:[%s1025_s5 + $0x18] sm:$0xff]  ;;  %526 = vmatpush.msrb.mxu2 %v499_v52 }
  0xa9   :  { %v389_v60 = vadd.f32 %v388_v53, %v376_v58  ;;  %v497_v58 = vld [vmem:[%s1025_s5 + $0x10] sm:$0xff] }
  0xaa   :  { %527 = vmatpush.msrb.mxu2 %v498_v55 }
  0xac   :  { %528 = vmatpush.msrb.mxu2 %v497_v58 }
  0xae   :  { %v377_v61 = vpop.f32.mrf.mxu2  ;;  %v401_v63 = vpop.f32.mrf.mxu0 }
  0xaf   :  { %v390_v62 = vpop.f32.mrf.mxu3  ;;  %v402_v1 = vadd.f32 %v401_v63, %v389_v60  ;;  %v496_v61 = vld [vmem:[%s1025_s5 + $0x8] sm:$0xff] }
  0xb0   :  { %529 = vmatpush.msrb.mxu2 %v496_v61 }
  0xb1   :  { %v405_v2 = vrot.slane %v402_v1, 4 }
  0xb3   :  { %v406_v4 = vadd.f32 %v405_v2, %v402_v1  ;;  %v495_v2 = vld [vmem:[%s1025_s5] sm:$0xff] }
  0xb4   :  { %530 = vmatpush.msrb.mxu2 %v495_v2 }
  0xb5   :  { %v407_v5 = vrot.slane %v406_v4, 2 }
  0xb6   :  { %v403_v7 = vpop.f32.mrf.mxu0 }
  0xb7   :  { %v408_v8 = vadd.f32 %v407_v5, %v406_v4  ;;  %v759_v4 = vld [vmem:[%s1026_s6] ss:$0 sm:$0xff]  ;;  %s563_s6 = sshll.u32 %s1027_s7, 4  ;;  %s564_s6 = int_to_ptr.hbm [resolvable:$true] %s563_s6 }
  0xb9   :  { %v409_v9 = vrot.slane %v408_v8, 1 }
  0xbb   :  { %v410_v11 = vadd.f32 %v409_v9, %v408_v8 }
  0xbd   :  { %v418_v12 = vmul.f32 %v417_v10, %v410_v11 }
  0xbf   :  { %v419_v13 = vsub.f32 %v402_v1, %v418_v12  ;;  %v470_v1 = vld [vmem:[%s1024_s4] sm:$0x3]  ;;  %s799_s4 = smov [#allocation2]  }
  0xc0   :  { %s561_s5 = sshll.u32 %s799_s4, 4  ;;  %s562_s5 = int_to_ptr.vmem [resolvable:$true] %s561_s5 }
  0xc1   :  { %v420_v14 = vmul.f32 %v419_v13, %v419_v13 }
  0xc3   :  { %v421_v15 = vrot.slane %v420_v14, 4 }
  0xc5   :  { %v422_v16 = vadd.f32 %v421_v15, %v420_v14 }
  0xc7   :  { %v423_v17 = vrot.slane %v422_v16, 2 }
  0xc9   :  { %v424_v18 = vadd.f32 %v423_v17, %v422_v16 }
  0xcb   :  { %v425_v19 = vrot.slane %v424_v18, 1 }
  0xcd   :  { %v426_v20 = vadd.f32 %v425_v19, %v424_v18 }
  0xcf   :  { %v427_v21 = vmul.f32 %v426_v20, %v417_v10 }
  0xd1   :  { %v429_v22 = vadd.f32 1e-05, %v427_v21 }
  0xd3   :  { %762 = vrsqrt.f32 %v429_v22  ;;  %vm436_vm3 = vweird.f32 %v429_v22 }
  0xd9   :  { %v763_v23 = vpop.eup %762 }
  0xda   :  { %v431_v24 = vmul.f32 %v763_v23, %v429_v22  ;;  %vm437_vm2 = vweird.f32 %v763_v23 }
  0xdb   :  { %vm438_vm4 = vmor %vm436_vm3, %vm437_vm2 }
  0xdc   :  { %v432_v25 = vmul.f32 %v763_v23, %v431_v24 }
  0xde   :  { %v433_v26 = vmul.f32 0.5, %v432_v25 }
  0xe0   :  { %v434_v27 = vsub.f32 1.5, %v433_v26 }
  0xe2   :  { %v435_v29 = vmul.f32 %v763_v23, %v434_v27 }
  0xe4   :  { %v439_v30 = vsel %vm438_vm4, %v763_v23, %v435_v29 }
  0xe5   :  { %v440_v31 = vmul.f32 %v439_v30, %v428_v28 }
  0xe7   :  { %v442_v32 = vperm.slane %v440_v31, 0 }
  0xe9   :  { %v444_v34 = vmul.f32 %v442_v32, %v419_v13 }
  0xeb   :  { %v449_v35 = vadd.f32 %v758_v33, %v444_v34 }
  0xed   :  { %v717_v38 = vmul.f32 -1.442695, %v449_v35 }
  0xef   :  { %764 = vpow2.f32 %v717_v38 }
  0xf5   :  { %v765_v43 = vpop.eup %764 }
  0xf6   :  { %v453_v44 = vadd.f32 1.0, %v765_v43 }
  0xf8   :  { %766 = vrcp.f32 %v453_v44  ;;  %v465_v54 = vand.u32 2147483648, %v453_v44  ;;  %v463_v57 = vand.u32 2147483647, %v453_v44  ;;  %vm459_vm6 = vweird.f32 %v453_v44 }
  0xfa   :  { %v466_v60 = vor.u32 1.1754944e-38, %v465_v54  ;;  %vm464_vm8 = vcmp.eq.f32.partialorder %v463_v57, 8.507059e+37 }
  0xfe   :  { %v767_v49 = vpop.eup %766 }
  0xff   :  { %v455_v51 = vmul.f32 %v767_v49, %v453_v44  ;;  %vm460_vm5 = vweird.f32 %v767_v49 }
 0x100   :  { %vm461_vm7 = vmor %vm459_vm6, %vm460_vm5 }
 0x101   :  { %v456_v53 = vsub.f32 1.0, %v455_v51 }
 0x103   :  { %v457_v56 = vmul.f32 %v767_v49, %v456_v53 }
 0x105   :  { %v458_v59 = vadd.f32 %v767_v49, %v457_v56 }
 0x107   :  { %v462_v62 = vsel %vm461_vm7, %v767_v49, %v458_v59 }
 0x108   :  { %v467_v63 = vsel %vm464_vm8, %v466_v60, %v462_v62 }
 0x109   :  { %v469_v0 = vmul.f32 %v467_v63, %v449_v35 }
 0x10b   :  { %490 = vmatpush.msrb.mxu1 %v469_v0 }
 0x10c   :  { %718 = vmatmul.msk.f32.vlgmr.msrb.gmra.mxu1 %vm471_vm9, %v470_v1 }
 0x189   :  { %v492_v3 = vpop.f32.mrf.mxu1 }
 0x18a   :  { %531 = vmatmul.f32.vlgmr.msrb.gmra.mxu2 %v492_v3 }
 0x20d   :  { %v532_v5 = vpop.f32.mrf.mxu2 }
 0x20e   :  { %v533_v6 = vadd.f32 %v759_v4, %v532_v5 }
 0x210   :  { %v719_v7 = vmul.f32 -1.442695, %v533_v6 }
 0x212   :  { %768 = vpow2.f32 %v719_v7 }
 0x218   :  { %v769_v8 = vpop.eup %768 }
 0x219   :  { %v538_v9 = vadd.f32 1.0, %v769_v8 }
 0x21b   :  { %770 = vrcp.f32 %v538_v9  ;;  %v550_v13 = vand.u32 2147483648, %v538_v9  ;;  %v548_v15 = vand.u32 2147483647, %v538_v9  ;;  %vm544_vm11 = vweird.f32 %v538_v9 }
 0x21d   :  { %v551_v17 = vor.u32 1.1754944e-38, %v550_v13  ;;  %vm549_vm14 = vcmp.eq.f32.partialorder %v548_v15, 8.507059e+37 }
 0x221   :  { %v771_v10 = vpop.eup %770 }
 0x222   :  { %v540_v11 = vmul.f32 %v771_v10, %v538_v9  ;;  %vm545_vm10 = vweird.f32 %v771_v10 }
 0x223   :  { %vm546_vm12 = vmor %vm544_vm11, %vm545_vm10 }
 0x224   :  { %v541_v12 = vsub.f32 1.0, %v540_v11 }
 0x226   :  { %v542_v14 = vmul.f32 %v771_v10, %v541_v12 }
 0x228   :  { %v543_v16 = vadd.f32 %v771_v10, %v542_v14 }
 0x22a   :  { %v547_v18 = vsel %vm546_vm12, %v771_v10, %v543_v16 }
 0x22b   :  { %v552_v19 = vsel %vm549_vm14, %v551_v17, %v547_v18 }
 0x22c   :  { %555 = vst.msk [vmem:[#allocation2] sm:$0x3] %vm554_vm13, %v552_v19 }
 0x22d   :  { %566 = dma.vmem_to_hbm [thread:$0]  %s562_s5, 32, %s564_s6, [#allocation3]  }
 0x22e   :  { %796 = dma.done.wait [#allocation3], 32  }
 0x22f   :  { %797 = vsyncadd [#allocation3], 4294967264 }
 0x230   :  { %571 = vsyncpa [#allocation3], 1 }

</bundles_post_ra>
